<compile_context>
chip_gen: v5e
topology: v5e:2x2
jax: 0.10.0
libtpu: 0.0.40
codegen_flags: <defaults>
</compile_context>

<pallas_src>
import numpy as np
import jax
import jax.numpy as jnp
from jax import lax
from jax.experimental import pallas as pl
from jax.experimental.pallas import tpu as pltpu


def _round_up(x, m):
    return (x + m - 1) // m * m


# ---------------------------------------------------------------------------
# Shared GRU recurrence (runs fully inside one kernel invocation).
# ---------------------------------------------------------------------------
def _gru_recurrence(len_ref, x_ref, wih_ref, whh_ref, bih_ref, bhh_ref, h0_ref,
                    gi_ref, hseq_ref, hT_ref):
    T, Bp, Fp = x_ref.shape
    Hp = h0_ref.shape[-1]

    # Input projection for ALL timesteps at once: one well-shaped MXU matmul
    # (bf16 operands, f32 accumulation), hoisted out of the recurrence.
    x2d = x_ref[...].reshape(T * Bp, Fp).astype(jnp.bfloat16)
    gi2d = jnp.dot(x2d, wih_ref[...], preferred_element_type=jnp.float32) + bih_ref[...]
    gi_ref[...] = gi2d.reshape(T, Bp, 3 * Hp)

    lengths = len_ref[...]                       # (Bp, 1) int32

    def step(t, h):
        gi = gi_ref[t]                           # (Bp, 3*Hp) f32, gates lane-aligned
        gh = (jnp.dot(h.astype(jnp.bfloat16), whh_ref[...],
                      preferred_element_type=jnp.float32) + bhh_ref[...])
        # PyTorch gate order [r | z | n]; each gate block is 128-lane aligned (Hp).
        r = jax.nn.sigmoid(gi[:, 0:Hp] + gh[:, 0:Hp])
        z = jax.nn.sigmoid(gi[:, Hp:2 * Hp] + gh[:, Hp:2 * Hp])
        n = jnp.tanh(gi[:, 2 * Hp:3 * Hp] + r * gh[:, 2 * Hp:3 * Hp])
        h_new = (1.0 - z) * n + z * h
        mask = lengths > t                       # (Bp, 1) bool, broadcasts over Hp lanes
        hseq_ref[t] = jnp.where(mask, h_new, 0.0)      # zero-pad like pad_packed_sequence
        return jnp.where(mask, h_new, h)               # freeze h past each seq's length

    hT_ref[...] = lax.fori_loop(0, T, step, h0_ref[...], unroll=(T <= 16))


def _gru_layer_kernel(len_ref, x_ref, wih_ref, whh_ref, bih_ref, bhh_ref, h0_ref,
                      hseq_ref, hT_ref, gi_scratch):
    _gru_recurrence(len_ref, x_ref, wih_ref, whh_ref, bih_ref, bhh_ref, h0_ref,
                    gi_scratch, hseq_ref, hT_ref)


def _gru_layer_head_kernel(len_ref, x_ref, wih_ref, whh_ref, bih_ref, bhh_ref, h0_ref,
                           wout_ref, bout_ref, out_ref, hT_ref, gi_scratch, hseq_scratch):
    _gru_recurrence(len_ref, x_ref, wih_ref, whh_ref, bih_ref, bhh_ref, h0_ref,
                    gi_scratch, hseq_scratch, hT_ref)
    # Fused rnn2out head: hidden sequence is still in VMEM; one (T*B, H)@(H, O) matmul
    # with a lane-dense 128-wide output.
    T, Bp, Hp = hseq_scratch.shape
    Op = out_ref.shape[-1]
    hid2d = hseq_scratch[...].reshape(T * Bp, Hp).astype(jnp.bfloat16)
    out2d = (jnp.dot(hid2d, wout_ref[...], preferred_element_type=jnp.float32)
             + bout_ref[...])
    out_ref[...] = out2d.reshape(T, Bp, Op)


# ---------------------------------------------------------------------------
# pallas_call wrappers (single grid step; whole layer resident in VMEM)
# ---------------------------------------------------------------------------
def gru_layer(x, len_col, wih_t, whh_t, bih_row, bhh_row, h0):
    T, Bp, Fp = x.shape
    Hp = h0.shape[-1]
    return pl.pallas_call(
        _gru_layer_kernel,
        out_shape=(jax.ShapeDtypeStruct((T, Bp, Hp), jnp.float32),
                   jax.ShapeDtypeStruct((Bp, Hp), jnp.float32)),
        grid=(1,),
        in_specs=[
            pl.BlockSpec((Bp, 1), lambda i: (0, 0)),           # lengths
            pl.BlockSpec((T, Bp, Fp), lambda i: (0, 0, 0)),    # x slab
            pl.BlockSpec((Fp, 3 * Hp), lambda i: (0, 0)),      # W_ih^T (gate-blocked, bf16)
            pl.BlockSpec((Hp, 3 * Hp), lambda i: (0, 0)),      # W_hh^T (gate-blocked, bf16)
            pl.BlockSpec((1, 3 * Hp), lambda i: (0, 0)),       # b_ih
            pl.BlockSpec((1, 3 * Hp), lambda i: (0, 0)),       # b_hh
            pl.BlockSpec((Bp, Hp), lambda i: (0, 0)),          # h0
        ],
        out_specs=(pl.BlockSpec((T, Bp, Hp), lambda i: (0, 0, 0)),
                   pl.BlockSpec((Bp, Hp), lambda i: (0, 0))),
        scratch_shapes=[pltpu.VMEM((T, Bp, 3 * Hp), jnp.float32)],   # hoisted gi
        compiler_params=pltpu.CompilerParams(dimension_semantics=("arbitrary",)),
    )(len_col, x, wih_t, whh_t, bih_row, bhh_row, h0)


def gru_layer_with_head(x, len_col, wih_t, whh_t, bih_row, bhh_row, h0, wout_t, bout_row):
    T, Bp, Fp = x.shape
    Hp = h0.shape[-1]
    Op = wout_t.shape[-1]
    return pl.pallas_call(
        _gru_layer_head_kernel,
        out_shape=(jax.ShapeDtypeStruct((T, Bp, Op), jnp.float32),
                   jax.ShapeDtypeStruct((Bp, Hp), jnp.float32)),
        grid=(1,),
        in_specs=[
            pl.BlockSpec((Bp, 1), lambda i: (0, 0)),           # lengths
            pl.BlockSpec((T, Bp, Fp), lambda i: (0, 0, 0)),    # x slab
            pl.BlockSpec((Fp, 3 * Hp), lambda i: (0, 0)),      # W_ih^T
            pl.BlockSpec((Hp, 3 * Hp), lambda i: (0, 0)),      # W_hh^T
            pl.BlockSpec((1, 3 * Hp), lambda i: (0, 0)),       # b_ih
            pl.BlockSpec((1, 3 * Hp), lambda i: (0, 0)),       # b_hh
            pl.BlockSpec((Bp, Hp), lambda i: (0, 0)),          # h0
            pl.BlockSpec((Hp, Op), lambda i: (0, 0)),          # W_out^T (bf16)
            pl.BlockSpec((1, Op), lambda i: (0, 0)),           # b_out
        ],
        out_specs=(pl.BlockSpec((T, Bp, Op), lambda i: (0, 0, 0)),
                   pl.BlockSpec((Bp, Hp), lambda i: (0, 0))),
        scratch_shapes=[pltpu.VMEM((T, Bp, 3 * Hp), jnp.float32),   # hoisted gi
                        pltpu.VMEM((T, Bp, Hp), jnp.float32)],      # hidden seq (fused head)
        compiler_params=pltpu.CompilerParams(dimension_semantics=("arbitrary",)),
    )(len_col, x, wih_t, whh_t, bih_row, bhh_row, h0, wout_t, bout_row)


# ---------------------------------------------------------------------------
# Parameters (deterministic, mimicking PyTorch default init shapes)
# ---------------------------------------------------------------------------
def init_decoder_params(key, embed_size, hidden_size, hidden_layers, output_size):
    params = {"gru": [], "out": None}
    bound = 1.0 / float(np.sqrt(hidden_size))
    k = key
    for layer in range(hidden_layers):
        in_size = embed_size if layer == 0 else hidden_size
        k, k1, k2, k3, k4 = jax.random.split(k, 5)
        wih = jax.random.uniform(k1, (3 * hidden_size, in_size), jnp.float32, -bound, bound)
        whh = jax.random.uniform(k2, (3 * hidden_size, hidden_size), jnp.float32, -bound, bound)
        bih = jax.random.uniform(k3, (3 * hidden_size,), jnp.float32, -bound, bound)
        bhh = jax.random.uniform(k4, (3 * hidden_size,), jnp.float32, -bound, bound)
        params["gru"].append((wih, whh, bih, bhh))
    k, k1, k2 = jax.random.split(k, 3)
    w_out = jax.random.uniform(k1, (output_size, hidden_size), jnp.float32, -bound, bound)
    b_out = jax.random.uniform(k2, (output_size,), jnp.float32, -bound, bound)
    params["out"] = (w_out, b_out)
    return params


# ---------------------------------------------------------------------------
# Weight packing: per-gate 128-lane-aligned blocks, zero-padded, bf16 MXU operands
# ---------------------------------------------------------------------------
def _pack_gate_weight(w, in_pad, Hp):
    """PyTorch (3H, F) GRU weight -> (in_pad, 3*Hp) bf16, gate g at cols [g*Hp, g*Hp+H)."""
    threeH, F = w.shape
    H = threeH // 3
    out = jnp.zeros((in_pad, 3 * Hp), jnp.float32)
    for g in range(3):
        out = out.at[:F, g * Hp:g * Hp + H].set(jnp.transpose(w[g * H:(g + 1) * H, :]))
    return out.astype(jnp.bfloat16)


def _pack_gate_bias(b, Hp):
    H = b.shape[0] // 3
    out = jnp.zeros((1, 3 * Hp), jnp.float32)
    for g in range(3):
        out = out.at[0, g * Hp:g * Hp + H].set(b[g * H:(g + 1) * H])
    return out


# ---------------------------------------------------------------------------
# Decoder.forward equivalent
# ---------------------------------------------------------------------------
def decoder_forward(params, embeddings, state, lengths):
    """embeddings: (B, T, E) f32; state: (L, B, H) f32; lengths: int, sorted descending."""
    B, T, E = embeddings.shape
    L, _, H = state.shape
    O = params["out"][0].shape[0]
    lengths_np = np.asarray(lengths, np.int32)
    lmax = int(lengths_np.max())                 # pad_packed_sequence pads to max length

    Bp = _round_up(max(B, 8), 8)                 # sublane-aligned batch
    Ep = _round_up(E, 128)                       # lane-aligned feature dims
    Hp = _round_up(H, 128)
    Op = _round_up(O, 128)

    # time-major, truncated to lmax, zero-padded batch/feature dims
    x = jnp.transpose(embeddings.astype(jnp.float32), (1, 0, 2))[:lmax]
    x = jnp.pad(x, ((0, 0), (0, Bp - B), (0, Ep - E)))

    len_col = jnp.zeros((Bp, 1), jnp.int32).at[:B, 0].set(jnp.asarray(lengths_np, jnp.int32))

    w_out, b_out = params["out"]
    wout_t = (jnp.zeros((Hp, Op), jnp.float32)
              .at[:H, :O].set(jnp.transpose(w_out)).astype(jnp.bfloat16))
    bout_r = jnp.zeros((1, Op), jnp.float32).at[0, :O].set(b_out)

    final_states = []
    out_pad = None
    for layer in range(L):
        wih, whh, bih, bhh = params["gru"][layer]
        in_pad = Ep if layer == 0 else Hp
        wih_t = _pack_gate_weight(wih, in_pad, Hp)
        whh_t = _pack_gate_weight(whh, Hp, Hp)
        bih_r = _pack_gate_bias(bih, Hp)
        bhh_r = _pack_gate_bias(bhh, Hp)
        h0 = jnp.zeros((Bp, Hp), jnp.float32).at[:B, :H].set(state[layer].astype(jnp.float32))
        if layer == L - 1:
            out_pad, hT = gru_layer_with_head(x, len_col, wih_t, whh_t, bih_r, bhh_r, h0,
                                              wout_t, bout_r)
        else:
            x, hT = gru_layer(x, len_col, wih_t, whh_t, bih_r, bhh_r, h0)
        final_states.append(hT[:B, :H])

    output = jnp.transpose(out_pad[:, :B, :O], (1, 0, 2))    # (B, lmax, O)
    new_state = jnp.stack(final_states, axis=0)              # (L, B, H)
    return output, new_state


# ---------------------------------------------------------------------------
# Pure-NumPy reference (mirrors PyTorch packed-GRU + Linear semantics)
# ---------------------------------------------------------------------------
def _sigmoid(x):
    return 1.0 / (1.0 + np.exp(-x))


def decoder_forward_ref(params, embeddings, state, lengths):
    emb = np.asarray(embeddings, np.float32)
    st = np.asarray(state, np.float32)
    lengths = np.asarray(lengths, np.int64)
    B, T, E = emb.shape
    L, _, H = st.shape
    lmax = int(lengths.max())

    x = emb[:, :lmax, :]
    finals = []
    for layer in range(L):
        wih, whh, bih, bhh = [np.asarray(p, np.float32) for p in params["gru"][layer]]
        h = st[layer].copy()
        out = np.zeros((B, lmax, H), np.float32)
        for t in range(lmax):
            gi = x[:, t, :] @ wih.T + bih
            gh = h @ whh.T + bhh
            r = _sigmoid(gi[:, :H] + gh[:, :H])
            z = _sigmoid(gi[:, H:2 * H] + gh[:, H:2 * H])
            n = np.tanh(gi[:, 2 * H:] + r * gh[:, 2 * H:])
            h_new = (1.0 - z) * n + z * h
            mask = (lengths > t)[:, None]
            h = np.where(mask, h_new, h)
            out[:, t, :] = np.where(mask, h_new, 0.0)
        finals.append(h)
        x = out
    w_out, b_out = [np.asarray(p, np.float32) for p in params["out"]]
    output = x @ w_out.T + b_out
    return output, np.stack(finals, axis=0)


if __name__ == "__main__":
    embed_size, latent_size, hidden_size = 16, 8, 32
    hidden_layers, dropout, output_size = 2, 0.0, 24
    B, T = 4, 8

    key = jax.random.PRNGKey(0)
    k_emb, k_state, k_param = jax.random.split(key, 3)
    embeddings = jax.random.normal(k_emb, (B, T, embed_size), jnp.float32)
    state = jax.random.normal(k_state, (hidden_layers, B, hidden_size), jnp.float32)
    lengths = np.array([8, 7, 5, 3], np.int32)    # sorted descending (enforce_sorted=True)

    params = init_decoder_params(k_param, embed_size, hidden_size, hidden_layers, output_size)

    output, new_state = decoder_forward(params, embeddings, state, lengths)
    jax.block_until_ready((output, new_state))

    lmax = int(lengths.max())
    assert output.shape == (B, lmax, output_size)
    assert new_state.shape == (hidden_layers, B, hidden_size)

    out_ref, state_ref = decoder_forward_ref(params, embeddings, state, lengths)
    np.testing.assert_allclose(np.asarray(output), out_ref, atol=5e-2, rtol=5e-2)
    np.testing.assert_allclose(np.asarray(new_state), state_ref, atol=5e-2, rtol=5e-2)

    print("KERNEL_OK")
</pallas_src>

<mosaic_0001>
module attributes {stable_mosaic.version = 11 : i64} {
  func.func @_gru_layer_kernel(%arg0: i32, %arg1: memref<8x1xi32, #tpu.memory_space<vmem>>, %arg2: memref<8x8x128xf32, #tpu.memory_space<vmem>>, %arg3: memref<128x384xbf16, #tpu.memory_space<vmem>>, %arg4: memref<128x384xbf16, #tpu.memory_space<vmem>>, %arg5: memref<1x384xf32, #tpu.memory_space<vmem>>, %arg6: memref<1x384xf32, #tpu.memory_space<vmem>>, %arg7: memref<8x128xf32, #tpu.memory_space<vmem>>, %arg8: memref<8x8x128xf32, #tpu.memory_space<vmem>>, %arg9: memref<8x128xf32, #tpu.memory_space<vmem>>, %arg10: memref<8x8x384xf32, #tpu.memory_space<vmem>>) attributes {dimension_semantics = [#tpu.dimension_semantics<arbitrary>], iteration_bounds = array<i64: 1>, scalar_prefetch = 0 : i64, scratch_operands = 1 : i64, tpu.core_type = #tpu.core_type<tc>, window_params = [{pipeline_mode = #tpu.pipeline_mode<synchronous>, transform_indices = @transform_0, window_bounds = array<i64: 8, 1>}, {pipeline_mode = #tpu.pipeline_mode<synchronous>, transform_indices = @transform_1, window_bounds = array<i64: 8, 8, 128>}, {pipeline_mode = #tpu.pipeline_mode<synchronous>, transform_indices = @transform_2, window_bounds = array<i64: 128, 384>}, {pipeline_mode = #tpu.pipeline_mode<synchronous>, transform_indices = @transform_3, window_bounds = array<i64: 128, 384>}, {pipeline_mode = #tpu.pipeline_mode<synchronous>, transform_indices = @transform_4, window_bounds = array<i64: 1, 384>}, {pipeline_mode = #tpu.pipeline_mode<synchronous>, transform_indices = @transform_5, window_bounds = array<i64: 1, 384>}, {pipeline_mode = #tpu.pipeline_mode<synchronous>, transform_indices = @transform_6, window_bounds = array<i64: 8, 128>}, {pipeline_mode = #tpu.pipeline_mode<synchronous>, transform_indices = @transform_7, window_bounds = array<i64: 8, 8, 128>}, {pipeline_mode = #tpu.pipeline_mode<synchronous>, transform_indices = @transform_8, window_bounds = array<i64: 8, 128>}]} {
    %c0 = arith.constant 0 : index
    %c0_0 = arith.constant 0 : index
    %c0_1 = arith.constant 0 : index
    %0 = vector.load %arg2[%c0, %c0_0, %c0_1] : memref<8x8x128xf32, #tpu.memory_space<vmem>>, vector<8x8x128xf32>
    %1 = vector.shape_cast %0 : vector<8x8x128xf32> to vector<64x128xf32>
    %2 = arith.truncf %1 : vector<64x128xf32> to vector<64x128xbf16>
    %c0_2 = arith.constant 0 : index
    %c0_3 = arith.constant 0 : index
    %3 = vector.load %arg3[%c0_2, %c0_3] : memref<128x384xbf16, #tpu.memory_space<vmem>>, vector<128x384xbf16>
    %cst = arith.constant dense<0.000000e+00> : vector<64x384xf32>
    %4 = tpu.matmul %2, %3, %cst {dimension_numbers = #tpu.dot_dimension_numbers<[1], [0], [0], [1], [0, 0, 1, 1], [], []>} : vector<64x128xbf16>, vector<128x384xbf16>, vector<64x384xf32> -> vector<64x384xf32>
    %c0_4 = arith.constant 0 : index
    %c0_5 = arith.constant 0 : index
    %5 = vector.load %arg5[%c0_4, %c0_5] : memref<1x384xf32, #tpu.memory_space<vmem>>, vector<1x384xf32>
    %6 = vector.broadcast %5 : vector<1x384xf32> to vector<64x384xf32>
    %7 = arith.addf %4, %6 : vector<64x384xf32>
    %8 = vector.shape_cast %7 : vector<64x384xf32> to vector<8x8x384xf32>
    %c0_6 = arith.constant 0 : index
    %c0_7 = arith.constant 0 : index
    %c0_8 = arith.constant 0 : index
    %9 = vector.load %arg10[%c0_6, %c0_7, %c0_8] : memref<8x8x384xf32, #tpu.memory_space<vmem>>, vector<8x8x384xf32>
    tpu.vector_store %arg10[%c0_6, %c0_7, %c0_8], %8 {strides = array<i32>} : memref<8x8x384xf32, #tpu.memory_space<vmem>>, vector<8x8x384xf32>,
    %c0_9 = arith.constant 0 : index
    %c0_10 = arith.constant 0 : index
    %10 = vector.load %arg1[%c0_9, %c0_10] : memref<8x1xi32, #tpu.memory_space<vmem>>, vector<8x1xi32>
    %c0_11 = arith.constant 0 : index
    %c0_12 = arith.constant 0 : index
    %11 = vector.load %arg7[%c0_11, %c0_12] : memref<8x128xf32, #tpu.memory_space<vmem>>, vector<8x128xf32>
    %c0_i32 = arith.constant 0 : i32
    %12 = arith.index_cast %c0_i32 : i32 to index
    %c0_13 = arith.constant 0 : index
    %c0_14 = arith.constant 0 : index
    %13 = vector.load %arg10[%12, %c0_13, %c0_14] : memref<8x8x384xf32, #tpu.memory_space<vmem>>, vector<1x8x384xf32>
    %14 = vector.shape_cast %13 : vector<1x8x384xf32> to vector<8x384xf32>
    %15 = arith.truncf %11 : vector<8x128xf32> to vector<8x128xbf16>
    %c0_15 = arith.constant 0 : index
    %c0_16 = arith.constant 0 : index
    %16 = vector.load %arg4[%c0_15, %c0_16] : memref<128x384xbf16, #tpu.memory_space<vmem>>, vector<128x384xbf16>
    %cst_17 = arith.constant dense<0.000000e+00> : vector<8x384xf32>
    %17 = tpu.matmul %15, %16, %cst_17 {dimension_numbers = #tpu.dot_dimension_numbers<[1], [0], [0], [1], [0, 0, 1, 1], [], []>} : vector<8x128xbf16>, vector<128x384xbf16>, vector<8x384xf32> -> vector<8x384xf32>
    %c0_18 = arith.constant 0 : index
    %c0_19 = arith.constant 0 : index
    %18 = vector.load %arg6[%c0_18, %c0_19] : memref<1x384xf32, #tpu.memory_space<vmem>>, vector<1x384xf32>
    %19 = vector.broadcast %18 : vector<1x384xf32> to vector<8x384xf32>
    %20 = arith.addf %17, %19 : vector<8x384xf32>
    %21 = vector.extract_strided_slice %14 {offsets = [0, 0], sizes = [8, 128], strides = [1, 1]} : vector<8x384xf32> to vector<8x128xf32>
    %22 = vector.extract_strided_slice %20 {offsets = [0, 0], sizes = [8, 128], strides = [1, 1]} : vector<8x384xf32> to vector<8x128xf32>
    %23 = arith.addf %21, %22 : vector<8x128xf32>
    %24 = arith.negf %23 : vector<8x128xf32>
    %25 = math.exp %24 : vector<8x128xf32>
    %cst_20 = arith.constant 1.000000e+00 : f32
    %26 = vector.broadcast %cst_20 : f32 to vector<8x128xf32>
    %27 = arith.addf %26, %25 : vector<8x128xf32>
    %28 = arith.divf %26, %27 : vector<8x128xf32>
    %29 = vector.extract_strided_slice %14 {offsets = [0, 128], sizes = [8, 128], strides = [1, 1]} : vector<8x384xf32> to vector<8x128xf32>
    %30 = vector.extract_strided_slice %20 {offsets = [0, 128], sizes = [8, 128], strides = [1, 1]} : vector<8x384xf32> to vector<8x128xf32>
    %31 = arith.addf %29, %30 : vector<8x128xf32>
    %32 = arith.negf %31 : vector<8x128xf32>
    %33 = math.exp %32 : vector<8x128xf32>
    %cst_21 = arith.constant 1.000000e+00 : f32
    %34 = vector.broadcast %cst_21 : f32 to vector<8x128xf32>
    %35 = arith.addf %34, %33 : vector<8x128xf32>
    %36 = arith.divf %34, %35 : vector<8x128xf32>
    %37 = vector.extract_strided_slice %14 {offsets = [0, 256], sizes = [8, 128], strides = [1, 1]} : vector<8x384xf32> to vector<8x128xf32>
    %38 = vector.extract_strided_slice %20 {offsets = [0, 256], sizes = [8, 128], strides = [1, 1]} : vector<8x384xf32> to vector<8x128xf32>
    %39 = arith.mulf %28, %38 : vector<8x128xf32>
    %40 = arith.addf %37, %39 : vector<8x128xf32>
    %41 = math.tanh %40 : vector<8x128xf32>
    %cst_22 = arith.constant 1.000000e+00 : f32
    %42 = vector.broadcast %cst_22 : f32 to vector<8x128xf32>
    %43 = arith.subf %42, %36 : vector<8x128xf32>
    %44 = arith.mulf %43, %41 : vector<8x128xf32>
    %45 = arith.mulf %36, %11 : vector<8x128xf32>
    %46 = arith.addf %44, %45 : vector<8x128xf32>
    %47 = vector.broadcast %c0_i32 : i32 to vector<8x1xi32>
    %48 = arith.cmpi sgt, %10, %47 : vector<8x1xi32>
    %cst_23 = arith.constant 0.000000e+00 : f32
    %49 = vector.shape_cast %48 : vector<8x1xi1> to vector<8x1xi1>
    %50 = vector.broadcast %49 : vector<8x1xi1> to vector<8x128xi1>
    %51 = vector.broadcast %cst_23 : f32 to vector<8x128xf32>
    %52 = arith.select %50, %46, %51 : vector<8x128xi1>, vector<8x128xf32>
    %53 = arith.index_cast %c0_i32 : i32 to index
    %c0_24 = arith.constant 0 : index
    %c0_25 = arith.constant 0 : index
    %54 = vector.load %arg8[%53, %c0_24, %c0_25] : memref<8x8x128xf32, #tpu.memory_space<vmem>>, vector<1x8x128xf32>
    %55 = vector.shape_cast %54 : vector<1x8x128xf32> to vector<8x128xf32>
    %56 = vector.shape_cast %52 : vector<8x128xf32> to vector<1x8x128xf32>
    tpu.vector_store %arg8[%53, %c0_24, %c0_25], %56 {strides = array<i32>} : memref<8x8x128xf32, #tpu.memory_space<vmem>>, vector<1x8x128xf32>,
    %57 = vector.shape_cast %48 : vector<8x1xi1> to vector<8x1xi1>
    %58 = vector.broadcast %57 : vector<8x1xi1> to vector<8x128xi1>
    %59 = arith.select %58, %46, %11 : vector<8x128xi1>, vector<8x128xf32>
    %c1_i32 = arith.constant 1 : i32
    %60 = arith.index_cast %c1_i32 : i32 to index
    %c0_26 = arith.constant 0 : index
    %c0_27 = arith.constant 0 : index
    %61 = vector.load %arg10[%60, %c0_26, %c0_27] : memref<8x8x384xf32, #tpu.memory_space<vmem>>, vector<1x8x384xf32>
    %62 = vector.shape_cast %61 : vector<1x8x384xf32> to vector<8x384xf32>
    %63 = arith.truncf %59 : vector<8x128xf32> to vector<8x128xbf16>
    %c0_28 = arith.constant 0 : index
    %c0_29 = arith.constant 0 : index
    %64 = vector.load %arg4[%c0_28, %c0_29] : memref<128x384xbf16, #tpu.memory_space<vmem>>, vector<128x384xbf16>
    %cst_30 = arith.constant dense<0.000000e+00> : vector<8x384xf32>
    %65 = tpu.matmul %63, %64, %cst_30 {dimension_numbers = #tpu.dot_dimension_numbers<[1], [0], [0], [1], [0, 0, 1, 1], [], []>} : vector<8x128xbf16>, vector<128x384xbf16>, vector<8x384xf32> -> vector<8x384xf32>
    %c0_31 = arith.constant 0 : index
    %c0_32 = arith.constant 0 : index
    %66 = vector.load %arg6[%c0_31, %c0_32] : memref<1x384xf32, #tpu.memory_space<vmem>>, vector<1x384xf32>
    %67 = vector.broadcast %66 : vector<1x384xf32> to vector<8x384xf32>
    %68 = arith.addf %65, %67 : vector<8x384xf32>
    %69 = vector.extract_strided_slice %62 {offsets = [0, 0], sizes = [8, 128], strides = [1, 1]} : vector<8x384xf32> to vector<8x128xf32>
    %70 = vector.extract_strided_slice %68 {offsets = [0, 0], sizes = [8, 128], strides = [1, 1]} : vector<8x384xf32> to vector<8x128xf32>
    %71 = arith.addf %69, %70 : vector<8x128xf32>
    %72 = arith.negf %71 : vector<8x128xf32>
    %73 = math.exp %72 : vector<8x128xf32>
    %cst_33 = arith.constant 1.000000e+00 : f32
    %74 = vector.broadcast %cst_33 : f32 to vector<8x128xf32>
    %75 = arith.addf %74, %73 : vector<8x128xf32>
    %76 = arith.divf %74, %75 : vector<8x128xf32>
    %77 = vector.extract_strided_slice %62 {offsets = [0, 128], sizes = [8, 128], strides = [1, 1]} : vector<8x384xf32> to vector<8x128xf32>
    %78 = vector.extract_strided_slice %68 {offsets = [0, 128], sizes = [8, 128], strides = [1, 1]} : vector<8x384xf32> to vector<8x128xf32>
    %79 = arith.addf %77, %78 : vector<8x128xf32>
    %80 = arith.negf %79 : vector<8x128xf32>
    %81 = math.exp %80 : vector<8x128xf32>
    %cst_34 = arith.constant 1.000000e+00 : f32
    %82 = vector.broadcast %cst_34 : f32 to vector<8x128xf32>
    %83 = arith.addf %82, %81 : vector<8x128xf32>
    %84 = arith.divf %82, %83 : vector<8x128xf32>
    %85 = vector.extract_strided_slice %62 {offsets = [0, 256], sizes = [8, 128], strides = [1, 1]} : vector<8x384xf32> to vector<8x128xf32>
    %86 = vector.extract_strided_slice %68 {offsets = [0, 256], sizes = [8, 128], strides = [1, 1]} : vector<8x384xf32> to vector<8x128xf32>
    %87 = arith.mulf %76, %86 : vector<8x128xf32>
    %88 = arith.addf %85, %87 : vector<8x128xf32>
    %89 = math.tanh %88 : vector<8x128xf32>
    %cst_35 = arith.constant 1.000000e+00 : f32
    %90 = vector.broadcast %cst_35 : f32 to vector<8x128xf32>
    %91 = arith.subf %90, %84 : vector<8x128xf32>
    %92 = arith.mulf %91, %89 : vector<8x128xf32>
    %93 = arith.mulf %84, %59 : vector<8x128xf32>
    %94 = arith.addf %92, %93 : vector<8x128xf32>
    %95 = vector.broadcast %c1_i32 : i32 to vector<8x1xi32>
    %96 = arith.cmpi sgt, %10, %95 : vector<8x1xi32>
    %cst_36 = arith.constant 0.000000e+00 : f32
    %97 = vector.shape_cast %96 : vector<8x1xi1> to vector<8x1xi1>
    %98 = vector.broadcast %97 : vector<8x1xi1> to vector<8x128xi1>
    %99 = vector.broadcast %cst_36 : f32 to vector<8x128xf32>
    %100 = arith.select %98, %94, %99 : vector<8x128xi1>, vector<8x128xf32>
    %101 = arith.index_cast %c1_i32 : i32 to index
    %c0_37 = arith.constant 0 : index
    %c0_38 = arith.constant 0 : index
    %102 = vector.load %arg8[%101, %c0_37, %c0_38] : memref<8x8x128xf32, #tpu.memory_space<vmem>>, vector<1x8x128xf32>
    %103 = vector.shape_cast %102 : vector<1x8x128xf32> to vector<8x128xf32>
    %104 = vector.shape_cast %100 : vector<8x128xf32> to vector<1x8x128xf32>
    tpu.vector_store %arg8[%101, %c0_37, %c0_38], %104 {strides = array<i32>} : memref<8x8x128xf32, #tpu.memory_space<vmem>>, vector<1x8x128xf32>,
    %105 = vector.shape_cast %96 : vector<8x1xi1> to vector<8x1xi1>
    %106 = vector.broadcast %105 : vector<8x1xi1> to vector<8x128xi1>
    %107 = arith.select %106, %94, %59 : vector<8x128xi1>, vector<8x128xf32>
    %c2_i32 = arith.constant 2 : i32
    %108 = arith.index_cast %c2_i32 : i32 to index
    %c0_39 = arith.constant 0 : index
    %c0_40 = arith.constant 0 : index
    %109 = vector.load %arg10[%108, %c0_39, %c0_40] : memref<8x8x384xf32, #tpu.memory_space<vmem>>, vector<1x8x384xf32>
    %110 = vector.shape_cast %109 : vector<1x8x384xf32> to vector<8x384xf32>
    %111 = arith.truncf %107 : vector<8x128xf32> to vector<8x128xbf16>
    %c0_41 = arith.constant 0 : index
    %c0_42 = arith.constant 0 : index
    %112 = vector.load %arg4[%c0_41, %c0_42] : memref<128x384xbf16, #tpu.memory_space<vmem>>, vector<128x384xbf16>
    %cst_43 = arith.constant dense<0.000000e+00> : vector<8x384xf32>
    %113 = tpu.matmul %111, %112, %cst_43 {dimension_numbers = #tpu.dot_dimension_numbers<[1], [0], [0], [1], [0, 0, 1, 1], [], []>} : vector<8x128xbf16>, vector<128x384xbf16>, vector<8x384xf32> -> vector<8x384xf32>
    %c0_44 = arith.constant 0 : index
    %c0_45 = arith.constant 0 : index
    %114 = vector.load %arg6[%c0_44, %c0_45] : memref<1x384xf32, #tpu.memory_space<vmem>>, vector<1x384xf32>
    %115 = vector.broadcast %114 : vector<1x384xf32> to vector<8x384xf32>
    %116 = arith.addf %113, %115 : vector<8x384xf32>
    %117 = vector.extract_strided_slice %110 {offsets = [0, 0], sizes = [8, 128], strides = [1, 1]} : vector<8x384xf32> to vector<8x128xf32>
    %118 = vector.extract_strided_slice %116 {offsets = [0, 0], sizes = [8, 128], strides = [1, 1]} : vector<8x384xf32> to vector<8x128xf32>
    %119 = arith.addf %117, %118 : vector<8x128xf32>
    %120 = arith.negf %119 : vector<8x128xf32>
    %121 = math.exp %120 : vector<8x128xf32>
    %cst_46 = arith.constant 1.000000e+00 : f32
    %122 = vector.broadcast %cst_46 : f32 to vector<8x128xf32>
    %123 = arith.addf %122, %121 : vector<8x128xf32>
    %124 = arith.divf %122, %123 : vector<8x128xf32>
    %125 = vector.extract_strided_slice %110 {offsets = [0, 128], sizes = [8, 128], strides = [1, 1]} : vector<8x384xf32> to vector<8x128xf32>
    %126 = vector.extract_strided_slice %116 {offsets = [0, 128], sizes = [8, 128], strides = [1, 1]} : vector<8x384xf32> to vector<8x128xf32>
    %127 = arith.addf %125, %126 : vector<8x128xf32>
    %128 = arith.negf %127 : vector<8x128xf32>
    %129 = math.exp %128 : vector<8x128xf32>
    %cst_47 = arith.constant 1.000000e+00 : f32
    %130 = vector.broadcast %cst_47 : f32 to vector<8x128xf32>
    %131 = arith.addf %130, %129 : vector<8x128xf32>
    %132 = arith.divf %130, %131 : vector<8x128xf32>
    %133 = vector.extract_strided_slice %110 {offsets = [0, 256], sizes = [8, 128], strides = [1, 1]} : vector<8x384xf32> to vector<8x128xf32>
    %134 = vector.extract_strided_slice %116 {offsets = [0, 256], sizes = [8, 128], strides = [1, 1]} : vector<8x384xf32> to vector<8x128xf32>
    %135 = arith.mulf %124, %134 : vector<8x128xf32>
    %136 = arith.addf %133, %135 : vector<8x128xf32>
    %137 = math.tanh %136 : vector<8x128xf32>
    %cst_48 = arith.constant 1.000000e+00 : f32
    %138 = vector.broadcast %cst_48 : f32 to vector<8x128xf32>
    %139 = arith.subf %138, %132 : vector<8x128xf32>
    %140 = arith.mulf %139, %137 : vector<8x128xf32>
    %141 = arith.mulf %132, %107 : vector<8x128xf32>
    %142 = arith.addf %140, %141 : vector<8x128xf32>
    %143 = vector.broadcast %c2_i32 : i32 to vector<8x1xi32>
    %144 = arith.cmpi sgt, %10, %143 : vector<8x1xi32>
    %cst_49 = arith.constant 0.000000e+00 : f32
    %145 = vector.shape_cast %144 : vector<8x1xi1> to vector<8x1xi1>
    %146 = vector.broadcast %145 : vector<8x1xi1> to vector<8x128xi1>
    %147 = vector.broadcast %cst_49 : f32 to vector<8x128xf32>
    %148 = arith.select %146, %142, %147 : vector<8x128xi1>, vector<8x128xf32>
    %149 = arith.index_cast %c2_i32 : i32 to index
    %c0_50 = arith.constant 0 : index
    %c0_51 = arith.constant 0 : index
    %150 = vector.load %arg8[%149, %c0_50, %c0_51] : memref<8x8x128xf32, #tpu.memory_space<vmem>>, vector<1x8x128xf32>
    %151 = vector.shape_cast %150 : vector<1x8x128xf32> to vector<8x128xf32>
    %152 = vector.shape_cast %148 : vector<8x128xf32> to vector<1x8x128xf32>
    tpu.vector_store %arg8[%149, %c0_50, %c0_51], %152 {strides = array<i32>} : memref<8x8x128xf32, #tpu.memory_space<vmem>>, vector<1x8x128xf32>,
    %153 = vector.shape_cast %144 : vector<8x1xi1> to vector<8x1xi1>
    %154 = vector.broadcast %153 : vector<8x1xi1> to vector<8x128xi1>
    %155 = arith.select %154, %142, %107 : vector<8x128xi1>, vector<8x128xf32>
    %c3_i32 = arith.constant 3 : i32
    %156 = arith.index_cast %c3_i32 : i32 to index
    %c0_52 = arith.constant 0 : index
    %c0_53 = arith.constant 0 : index
    %157 = vector.load %arg10[%156, %c0_52, %c0_53] : memref<8x8x384xf32, #tpu.memory_space<vmem>>, vector<1x8x384xf32>
    %158 = vector.shape_cast %157 : vector<1x8x384xf32> to vector<8x384xf32>
    %159 = arith.truncf %155 : vector<8x128xf32> to vector<8x128xbf16>
    %c0_54 = arith.constant 0 : index
    %c0_55 = arith.constant 0 : index
    %160 = vector.load %arg4[%c0_54, %c0_55] : memref<128x384xbf16, #tpu.memory_space<vmem>>, vector<128x384xbf16>
    %cst_56 = arith.constant dense<0.000000e+00> : vector<8x384xf32>
    %161 = tpu.matmul %159, %160, %cst_56 {dimension_numbers = #tpu.dot_dimension_numbers<[1], [0], [0], [1], [0, 0, 1, 1], [], []>} : vector<8x128xbf16>, vector<128x384xbf16>, vector<8x384xf32> -> vector<8x384xf32>
    %c0_57 = arith.constant 0 : index
    %c0_58 = arith.constant 0 : index
    %162 = vector.load %arg6[%c0_57, %c0_58] : memref<1x384xf32, #tpu.memory_space<vmem>>, vector<1x384xf32>
    %163 = vector.broadcast %162 : vector<1x384xf32> to vector<8x384xf32>
    %164 = arith.addf %161, %163 : vector<8x384xf32>
    %165 = vector.extract_strided_slice %158 {offsets = [0, 0], sizes = [8, 128], strides = [1, 1]} : vector<8x384xf32> to vector<8x128xf32>
    %166 = vector.extract_strided_slice %164 {offsets = [0, 0], sizes = [8, 128], strides = [1, 1]} : vector<8x384xf32> to vector<8x128xf32>
    %167 = arith.addf %165, %166 : vector<8x128xf32>
    %168 = arith.negf %167 : vector<8x128xf32>
    %169 = math.exp %168 : vector<8x128xf32>
    %cst_59 = arith.constant 1.000000e+00 : f32
    %170 = vector.broadcast %cst_59 : f32 to vector<8x128xf32>
    %171 = arith.addf %170, %169 : vector<8x128xf32>
    %172 = arith.divf %170, %171 : vector<8x128xf32>
    %173 = vector.extract_strided_slice %158 {offsets = [0, 128], sizes = [8, 128], strides = [1, 1]} : vector<8x384xf32> to vector<8x128xf32>
    %174 = vector.extract_strided_slice %164 {offsets = [0, 128], sizes = [8, 128], strides = [1, 1]} : vector<8x384xf32> to vector<8x128xf32>
    %175 = arith.addf %173, %174 : vector<8x128xf32>
    %176 = arith.negf %175 : vector<8x128xf32>
    %177 = math.exp %176 : vector<8x128xf32>
    %cst_60 = arith.constant 1.000000e+00 : f32
    %178 = vector.broadcast %cst_60 : f32 to vector<8x128xf32>
    %179 = arith.addf %178, %177 : vector<8x128xf32>
    %180 = arith.divf %178, %179 : vector<8x128xf32>
    %181 = vector.extract_strided_slice %158 {offsets = [0, 256], sizes = [8, 128], strides = [1, 1]} : vector<8x384xf32> to vector<8x128xf32>
    %182 = vector.extract_strided_slice %164 {offsets = [0, 256], sizes = [8, 128], strides = [1, 1]} : vector<8x384xf32> to vector<8x128xf32>
    %183 = arith.mulf %172, %182 : vector<8x128xf32>
    %184 = arith.addf %181, %183 : vector<8x128xf32>
    %185 = math.tanh %184 : vector<8x128xf32>
    %cst_61 = arith.constant 1.000000e+00 : f32
    %186 = vector.broadcast %cst_61 : f32 to vector<8x128xf32>
    %187 = arith.subf %186, %180 : vector<8x128xf32>
    %188 = arith.mulf %187, %185 : vector<8x128xf32>
    %189 = arith.mulf %180, %155 : vector<8x128xf32>
    %190 = arith.addf %188, %189 : vector<8x128xf32>
    %191 = vector.broadcast %c3_i32 : i32 to vector<8x1xi32>
    %192 = arith.cmpi sgt, %10, %191 : vector<8x1xi32>
    %cst_62 = arith.constant 0.000000e+00 : f32
    %193 = vector.shape_cast %192 : vector<8x1xi1> to vector<8x1xi1>
    %194 = vector.broadcast %193 : vector<8x1xi1> to vector<8x128xi1>
    %195 = vector.broadcast %cst_62 : f32 to vector<8x128xf32>
    %196 = arith.select %194, %190, %195 : vector<8x128xi1>, vector<8x128xf32>
    %197 = arith.index_cast %c3_i32 : i32 to index
    %c0_63 = arith.constant 0 : index
    %c0_64 = arith.constant 0 : index
    %198 = vector.load %arg8[%197, %c0_63, %c0_64] : memref<8x8x128xf32, #tpu.memory_space<vmem>>, vector<1x8x128xf32>
    %199 = vector.shape_cast %198 : vector<1x8x128xf32> to vector<8x128xf32>
    %200 = vector.shape_cast %196 : vector<8x128xf32> to vector<1x8x128xf32>
    tpu.vector_store %arg8[%197, %c0_63, %c0_64], %200 {strides = array<i32>} : memref<8x8x128xf32, #tpu.memory_space<vmem>>, vector<1x8x128xf32>,
    %201 = vector.shape_cast %192 : vector<8x1xi1> to vector<8x1xi1>
    %202 = vector.broadcast %201 : vector<8x1xi1> to vector<8x128xi1>
    %203 = arith.select %202, %190, %155 : vector<8x128xi1>, vector<8x128xf32>
    %c4_i32 = arith.constant 4 : i32
    %204 = arith.index_cast %c4_i32 : i32 to index
    %c0_65 = arith.constant 0 : index
    %c0_66 = arith.constant 0 : index
    %205 = vector.load %arg10[%204, %c0_65, %c0_66] : memref<8x8x384xf32, #tpu.memory_space<vmem>>, vector<1x8x384xf32>
    %206 = vector.shape_cast %205 : vector<1x8x384xf32> to vector<8x384xf32>
    %207 = arith.truncf %203 : vector<8x128xf32> to vector<8x128xbf16>
    %c0_67 = arith.constant 0 : index
    %c0_68 = arith.constant 0 : index
    %208 = vector.load %arg4[%c0_67, %c0_68] : memref<128x384xbf16, #tpu.memory_space<vmem>>, vector<128x384xbf16>
    %cst_69 = arith.constant dense<0.000000e+00> : vector<8x384xf32>
    %209 = tpu.matmul %207, %208, %cst_69 {dimension_numbers = #tpu.dot_dimension_numbers<[1], [0], [0], [1], [0, 0, 1, 1], [], []>} : vector<8x128xbf16>, vector<128x384xbf16>, vector<8x384xf32> -> vector<8x384xf32>
    %c0_70 = arith.constant 0 : index
    %c0_71 = arith.constant 0 : index
    %210 = vector.load %arg6[%c0_70, %c0_71] : memref<1x384xf32, #tpu.memory_space<vmem>>, vector<1x384xf32>
    %211 = vector.broadcast %210 : vector<1x384xf32> to vector<8x384xf32>
    %212 = arith.addf %209, %211 : vector<8x384xf32>
    %213 = vector.extract_strided_slice %206 {offsets = [0, 0], sizes = [8, 128], strides = [1, 1]} : vector<8x384xf32> to vector<8x128xf32>
    %214 = vector.extract_strided_slice %212 {offsets = [0, 0], sizes = [8, 128], strides = [1, 1]} : vector<8x384xf32> to vector<8x128xf32>
    %215 = arith.addf %213, %214 : vector<8x128xf32>
    %216 = arith.negf %215 : vector<8x128xf32>
    %217 = math.exp %216 : vector<8x128xf32>
    %cst_72 = arith.constant 1.000000e+00 : f32
    %218 = vector.broadcast %cst_72 : f32 to vector<8x128xf32>
    %219 = arith.addf %218, %217 : vector<8x128xf32>
    %220 = arith.divf %218, %219 : vector<8x128xf32>
    %221 = vector.extract_strided_slice %206 {offsets = [0, 128], sizes = [8, 128], strides = [1, 1]} : vector<8x384xf32> to vector<8x128xf32>
    %222 = vector.extract_strided_slice %212 {offsets = [0, 128], sizes = [8, 128], strides = [1, 1]} : vector<8x384xf32> to vector<8x128xf32>
    %223 = arith.addf %221, %222 : vector<8x128xf32>
    %224 = arith.negf %223 : vector<8x128xf32>
    %225 = math.exp %224 : vector<8x128xf32>
    %cst_73 = arith.constant 1.000000e+00 : f32
    %226 = vector.broadcast %cst_73 : f32 to vector<8x128xf32>
    %227 = arith.addf %226, %225 : vector<8x128xf32>
    %228 = arith.divf %226, %227 : vector<8x128xf32>
    %229 = vector.extract_strided_slice %206 {offsets = [0, 256], sizes = [8, 128], strides = [1, 1]} : vector<8x384xf32> to vector<8x128xf32>
    %230 = vector.extract_strided_slice %212 {offsets = [0, 256], sizes = [8, 128], strides = [1, 1]} : vector<8x384xf32> to vector<8x128xf32>
    %231 = arith.mulf %220, %230 : vector<8x128xf32>
    %232 = arith.addf %229, %231 : vector<8x128xf32>
    %233 = math.tanh %232 : vector<8x128xf32>
    %cst_74 = arith.constant 1.000000e+00 : f32
    %234 = vector.broadcast %cst_74 : f32 to vector<8x128xf32>
    %235 = arith.subf %234, %228 : vector<8x128xf32>
    %236 = arith.mulf %235, %233 : vector<8x128xf32>
    %237 = arith.mulf %228, %203 : vector<8x128xf32>
    %238 = arith.addf %236, %237 : vector<8x128xf32>
    %239 = vector.broadcast %c4_i32 : i32 to vector<8x1xi32>
    %240 = arith.cmpi sgt, %10, %239 : vector<8x1xi32>
    %cst_75 = arith.constant 0.000000e+00 : f32
    %241 = vector.shape_cast %240 : vector<8x1xi1> to vector<8x1xi1>
    %242 = vector.broadcast %241 : vector<8x1xi1> to vector<8x128xi1>
    %243 = vector.broadcast %cst_75 : f32 to vector<8x128xf32>
    %244 = arith.select %242, %238, %243 : vector<8x128xi1>, vector<8x128xf32>
    %245 = arith.index_cast %c4_i32 : i32 to index
    %c0_76 = arith.constant 0 : index
    %c0_77 = arith.constant 0 : index
    %246 = vector.load %arg8[%245, %c0_76, %c0_77] : memref<8x8x128xf32, #tpu.memory_space<vmem>>, vector<1x8x128xf32>
    %247 = vector.shape_cast %246 : vector<1x8x128xf32> to vector<8x128xf32>
    %248 = vector.shape_cast %244 : vector<8x128xf32> to vector<1x8x128xf32>
    tpu.vector_store %arg8[%245, %c0_76, %c0_77], %248 {strides = array<i32>} : memref<8x8x128xf32, #tpu.memory_space<vmem>>, vector<1x8x128xf32>,
    %249 = vector.shape_cast %240 : vector<8x1xi1> to vector<8x1xi1>
    %250 = vector.broadcast %249 : vector<8x1xi1> to vector<8x128xi1>
    %251 = arith.select %250, %238, %203 : vector<8x128xi1>, vector<8x128xf32>
    %c5_i32 = arith.constant 5 : i32
    %252 = arith.index_cast %c5_i32 : i32 to index
    %c0_78 = arith.constant 0 : index
    %c0_79 = arith.constant 0 : index
    %253 = vector.load %arg10[%252, %c0_78, %c0_79] : memref<8x8x384xf32, #tpu.memory_space<vmem>>, vector<1x8x384xf32>
    %254 = vector.shape_cast %253 : vector<1x8x384xf32> to vector<8x384xf32>
    %255 = arith.truncf %251 : vector<8x128xf32> to vector<8x128xbf16>
    %c0_80 = arith.constant 0 : index
    %c0_81 = arith.constant 0 : index
    %256 = vector.load %arg4[%c0_80, %c0_81] : memref<128x384xbf16, #tpu.memory_space<vmem>>, vector<128x384xbf16>
    %cst_82 = arith.constant dense<0.000000e+00> : vector<8x384xf32>
    %257 = tpu.matmul %255, %256, %cst_82 {dimension_numbers = #tpu.dot_dimension_numbers<[1], [0], [0], [1], [0, 0, 1, 1], [], []>} : vector<8x128xbf16>, vector<128x384xbf16>, vector<8x384xf32> -> vector<8x384xf32>
    %c0_83 = arith.constant 0 : index
    %c0_84 = arith.constant 0 : index
    %258 = vector.load %arg6[%c0_83, %c0_84] : memref<1x384xf32, #tpu.memory_space<vmem>>, vector<1x384xf32>
    %259 = vector.broadcast %258 : vector<1x384xf32> to vector<8x384xf32>
    %260 = arith.addf %257, %259 : vector<8x384xf32>
    %261 = vector.extract_strided_slice %254 {offsets = [0, 0], sizes = [8, 128], strides = [1, 1]} : vector<8x384xf32> to vector<8x128xf32>
    %262 = vector.extract_strided_slice %260 {offsets = [0, 0], sizes = [8, 128], strides = [1, 1]} : vector<8x384xf32> to vector<8x128xf32>
    %263 = arith.addf %261, %262 : vector<8x128xf32>
    %264 = arith.negf %263 : vector<8x128xf32>
    %265 = math.exp %264 : vector<8x128xf32>
    %cst_85 = arith.constant 1.000000e+00 : f32
    %266 = vector.broadcast %cst_85 : f32 to vector<8x128xf32>
    %267 = arith.addf %266, %265 : vector<8x128xf32>
    %268 = arith.divf %266, %267 : vector<8x128xf32>
    %269 = vector.extract_strided_slice %254 {offsets = [0, 128], sizes = [8, 128], strides = [1, 1]} : vector<8x384xf32> to vector<8x128xf32>
    %270 = vector.extract_strided_slice %260 {offsets = [0, 128], sizes = [8, 128], strides = [1, 1]} : vector<8x384xf32> to vector<8x128xf32>
    %271 = arith.addf %269, %270 : vector<8x128xf32>
    %272 = arith.negf %271 : vector<8x128xf32>
    %273 = math.exp %272 : vector<8x128xf32>
    %cst_86 = arith.constant 1.000000e+00 : f32
    %274 = vector.broadcast %cst_86 : f32 to vector<8x128xf32>
    %275 = arith.addf %274, %273 : vector<8x128xf32>
    %276 = arith.divf %274, %275 : vector<8x128xf32>
    %277 = vector.extract_strided_slice %254 {offsets = [0, 256], sizes = [8, 128], strides = [1, 1]} : vector<8x384xf32> to vector<8x128xf32>
    %278 = vector.extract_strided_slice %260 {offsets = [0, 256], sizes = [8, 128], strides = [1, 1]} : vector<8x384xf32> to vector<8x128xf32>
    %279 = arith.mulf %268, %278 : vector<8x128xf32>
    %280 = arith.addf %277, %279 : vector<8x128xf32>
    %281 = math.tanh %280 : vector<8x128xf32>
    %cst_87 = arith.constant 1.000000e+00 : f32
    %282 = vector.broadcast %cst_87 : f32 to vector<8x128xf32>
    %283 = arith.subf %282, %276 : vector<8x128xf32>
    %284 = arith.mulf %283, %281 : vector<8x128xf32>
    %285 = arith.mulf %276, %251 : vector<8x128xf32>
    %286 = arith.addf %284, %285 : vector<8x128xf32>
    %287 = vector.broadcast %c5_i32 : i32 to vector<8x1xi32>
    %288 = arith.cmpi sgt, %10, %287 : vector<8x1xi32>
    %cst_88 = arith.constant 0.000000e+00 : f32
    %289 = vector.shape_cast %288 : vector<8x1xi1> to vector<8x1xi1>
    %290 = vector.broadcast %289 : vector<8x1xi1> to vector<8x128xi1>
    %291 = vector.broadcast %cst_88 : f32 to vector<8x128xf32>
    %292 = arith.select %290, %286, %291 : vector<8x128xi1>, vector<8x128xf32>
    %293 = arith.index_cast %c5_i32 : i32 to index
    %c0_89 = arith.constant 0 : index
    %c0_90 = arith.constant 0 : index
    %294 = vector.load %arg8[%293, %c0_89, %c0_90] : memref<8x8x128xf32, #tpu.memory_space<vmem>>, vector<1x8x128xf32>
    %295 = vector.shape_cast %294 : vector<1x8x128xf32> to vector<8x128xf32>
    %296 = vector.shape_cast %292 : vector<8x128xf32> to vector<1x8x128xf32>
    tpu.vector_store %arg8[%293, %c0_89, %c0_90], %296 {strides = array<i32>} : memref<8x8x128xf32, #tpu.memory_space<vmem>>, vector<1x8x128xf32>,
    %297 = vector.shape_cast %288 : vector<8x1xi1> to vector<8x1xi1>
    %298 = vector.broadcast %297 : vector<8x1xi1> to vector<8x128xi1>
    %299 = arith.select %298, %286, %251 : vector<8x128xi1>, vector<8x128xf32>
    %c6_i32 = arith.constant 6 : i32
    %300 = arith.index_cast %c6_i32 : i32 to index
    %c0_91 = arith.constant 0 : index
    %c0_92 = arith.constant 0 : index
    %301 = vector.load %arg10[%300, %c0_91, %c0_92] : memref<8x8x384xf32, #tpu.memory_space<vmem>>, vector<1x8x384xf32>
    %302 = vector.shape_cast %301 : vector<1x8x384xf32> to vector<8x384xf32>
    %303 = arith.truncf %299 : vector<8x128xf32> to vector<8x128xbf16>
    %c0_93 = arith.constant 0 : index
    %c0_94 = arith.constant 0 : index
    %304 = vector.load %arg4[%c0_93, %c0_94] : memref<128x384xbf16, #tpu.memory_space<vmem>>, vector<128x384xbf16>
    %cst_95 = arith.constant dense<0.000000e+00> : vector<8x384xf32>
    %305 = tpu.matmul %303, %304, %cst_95 {dimension_numbers = #tpu.dot_dimension_numbers<[1], [0], [0], [1], [0, 0, 1, 1], [], []>} : vector<8x128xbf16>, vector<128x384xbf16>, vector<8x384xf32> -> vector<8x384xf32>
    %c0_96 = arith.constant 0 : index
    %c0_97 = arith.constant 0 : index
    %306 = vector.load %arg6[%c0_96, %c0_97] : memref<1x384xf32, #tpu.memory_space<vmem>>, vector<1x384xf32>
    %307 = vector.broadcast %306 : vector<1x384xf32> to vector<8x384xf32>
    %308 = arith.addf %305, %307 : vector<8x384xf32>
    %309 = vector.extract_strided_slice %302 {offsets = [0, 0], sizes = [8, 128], strides = [1, 1]} : vector<8x384xf32> to vector<8x128xf32>
    %310 = vector.extract_strided_slice %308 {offsets = [0, 0], sizes = [8, 128], strides = [1, 1]} : vector<8x384xf32> to vector<8x128xf32>
    %311 = arith.addf %309, %310 : vector<8x128xf32>
    %312 = arith.negf %311 : vector<8x128xf32>
    %313 = math.exp %312 : vector<8x128xf32>
    %cst_98 = arith.constant 1.000000e+00 : f32
    %314 = vector.broadcast %cst_98 : f32 to vector<8x128xf32>
    %315 = arith.addf %314, %313 : vector<8x128xf32>
    %316 = arith.divf %314, %315 : vector<8x128xf32>
    %317 = vector.extract_strided_slice %302 {offsets = [0, 128], sizes = [8, 128], strides = [1, 1]} : vector<8x384xf32> to vector<8x128xf32>
    %318 = vector.extract_strided_slice %308 {offsets = [0, 128], sizes = [8, 128], strides = [1, 1]} : vector<8x384xf32> to vector<8x128xf32>
    %319 = arith.addf %317, %318 : vector<8x128xf32>
    %320 = arith.negf %319 : vector<8x128xf32>
    %321 = math.exp %320 : vector<8x128xf32>
    %cst_99 = arith.constant 1.000000e+00 : f32
    %322 = vector.broadcast %cst_99 : f32 to vector<8x128xf32>
    %323 = arith.addf %322, %321 : vector<8x128xf32>
    %324 = arith.divf %322, %323 : vector<8x128xf32>
    %325 = vector.extract_strided_slice %302 {offsets = [0, 256], sizes = [8, 128], strides = [1, 1]} : vector<8x384xf32> to vector<8x128xf32>
    %326 = vector.extract_strided_slice %308 {offsets = [0, 256], sizes = [8, 128], strides = [1, 1]} : vector<8x384xf32> to vector<8x128xf32>
    %327 = arith.mulf %316, %326 : vector<8x128xf32>
    %328 = arith.addf %325, %327 : vector<8x128xf32>
    %329 = math.tanh %328 : vector<8x128xf32>
    %cst_100 = arith.constant 1.000000e+00 : f32
    %330 = vector.broadcast %cst_100 : f32 to vector<8x128xf32>
    %331 = arith.subf %330, %324 : vector<8x128xf32>
    %332 = arith.mulf %331, %329 : vector<8x128xf32>
    %333 = arith.mulf %324, %299 : vector<8x128xf32>
    %334 = arith.addf %332, %333 : vector<8x128xf32>
    %335 = vector.broadcast %c6_i32 : i32 to vector<8x1xi32>
    %336 = arith.cmpi sgt, %10, %335 : vector<8x1xi32>
    %cst_101 = arith.constant 0.000000e+00 : f32
    %337 = vector.shape_cast %336 : vector<8x1xi1> to vector<8x1xi1>
    %338 = vector.broadcast %337 : vector<8x1xi1> to vector<8x128xi1>
    %339 = vector.broadcast %cst_101 : f32 to vector<8x128xf32>
    %340 = arith.select %338, %334, %339 : vector<8x128xi1>, vector<8x128xf32>
    %341 = arith.index_cast %c6_i32 : i32 to index
    %c0_102 = arith.constant 0 : index
    %c0_103 = arith.constant 0 : index
    %342 = vector.load %arg8[%341, %c0_102, %c0_103] : memref<8x8x128xf32, #tpu.memory_space<vmem>>, vector<1x8x128xf32>
    %343 = vector.shape_cast %342 : vector<1x8x128xf32> to vector<8x128xf32>
    %344 = vector.shape_cast %340 : vector<8x128xf32> to vector<1x8x128xf32>
    tpu.vector_store %arg8[%341, %c0_102, %c0_103], %344 {strides = array<i32>} : memref<8x8x128xf32, #tpu.memory_space<vmem>>, vector<1x8x128xf32>,
    %345 = vector.shape_cast %336 : vector<8x1xi1> to vector<8x1xi1>
    %346 = vector.broadcast %345 : vector<8x1xi1> to vector<8x128xi1>
    %347 = arith.select %346, %334, %299 : vector<8x128xi1>, vector<8x128xf32>
    %c7_i32 = arith.constant 7 : i32
    %348 = arith.index_cast %c7_i32 : i32 to index
    %c0_104 = arith.constant 0 : index
    %c0_105 = arith.constant 0 : index
    %349 = vector.load %arg10[%348, %c0_104, %c0_105] : memref<8x8x384xf32, #tpu.memory_space<vmem>>, vector<1x8x384xf32>
    %350 = vector.shape_cast %349 : vector<1x8x384xf32> to vector<8x384xf32>
    %351 = arith.truncf %347 : vector<8x128xf32> to vector<8x128xbf16>
    %c0_106 = arith.constant 0 : index
    %c0_107 = arith.constant 0 : index
    %352 = vector.load %arg4[%c0_106, %c0_107] : memref<128x384xbf16, #tpu.memory_space<vmem>>, vector<128x384xbf16>
    %cst_108 = arith.constant dense<0.000000e+00> : vector<8x384xf32>
    %353 = tpu.matmul %351, %352, %cst_108 {dimension_numbers = #tpu.dot_dimension_numbers<[1], [0], [0], [1], [0, 0, 1, 1], [], []>} : vector<8x128xbf16>, vector<128x384xbf16>, vector<8x384xf32> -> vector<8x384xf32>
    %c0_109 = arith.constant 0 : index
    %c0_110 = arith.constant 0 : index
    %354 = vector.load %arg6[%c0_109, %c0_110] : memref<1x384xf32, #tpu.memory_space<vmem>>, vector<1x384xf32>
    %355 = vector.broadcast %354 : vector<1x384xf32> to vector<8x384xf32>
    %356 = arith.addf %353, %355 : vector<8x384xf32>
    %357 = vector.extract_strided_slice %350 {offsets = [0, 0], sizes = [8, 128], strides = [1, 1]} : vector<8x384xf32> to vector<8x128xf32>
    %358 = vector.extract_strided_slice %356 {offsets = [0, 0], sizes = [8, 128], strides = [1, 1]} : vector<8x384xf32> to vector<8x128xf32>
    %359 = arith.addf %357, %358 : vector<8x128xf32>
    %360 = arith.negf %359 : vector<8x128xf32>
    %361 = math.exp %360 : vector<8x128xf32>
    %cst_111 = arith.constant 1.000000e+00 : f32
    %362 = vector.broadcast %cst_111 : f32 to vector<8x128xf32>
    %363 = arith.addf %362, %361 : vector<8x128xf32>
    %364 = arith.divf %362, %363 : vector<8x128xf32>
    %365 = vector.extract_strided_slice %350 {offsets = [0, 128], sizes = [8, 128], strides = [1, 1]} : vector<8x384xf32> to vector<8x128xf32>
    %366 = vector.extract_strided_slice %356 {offsets = [0, 128], sizes = [8, 128], strides = [1, 1]} : vector<8x384xf32> to vector<8x128xf32>
    %367 = arith.addf %365, %366 : vector<8x128xf32>
    %368 = arith.negf %367 : vector<8x128xf32>
    %369 = math.exp %368 : vector<8x128xf32>
    %cst_112 = arith.constant 1.000000e+00 : f32
    %370 = vector.broadcast %cst_112 : f32 to vector<8x128xf32>
    %371 = arith.addf %370, %369 : vector<8x128xf32>
    %372 = arith.divf %370, %371 : vector<8x128xf32>
    %373 = vector.extract_strided_slice %350 {offsets = [0, 256], sizes = [8, 128], strides = [1, 1]} : vector<8x384xf32> to vector<8x128xf32>
    %374 = vector.extract_strided_slice %356 {offsets = [0, 256], sizes = [8, 128], strides = [1, 1]} : vector<8x384xf32> to vector<8x128xf32>
    %375 = arith.mulf %364, %374 : vector<8x128xf32>
    %376 = arith.addf %373, %375 : vector<8x128xf32>
    %377 = math.tanh %376 : vector<8x128xf32>
    %cst_113 = arith.constant 1.000000e+00 : f32
    %378 = vector.broadcast %cst_113 : f32 to vector<8x128xf32>
    %379 = arith.subf %378, %372 : vector<8x128xf32>
    %380 = arith.mulf %379, %377 : vector<8x128xf32>
    %381 = arith.mulf %372, %347 : vector<8x128xf32>
    %382 = arith.addf %380, %381 : vector<8x128xf32>
    %383 = vector.broadcast %c7_i32 : i32 to vector<8x1xi32>
    %384 = arith.cmpi sgt, %10, %383 : vector<8x1xi32>
    %cst_114 = arith.constant 0.000000e+00 : f32
    %385 = vector.shape_cast %384 : vector<8x1xi1> to vector<8x1xi1>
    %386 = vector.broadcast %385 : vector<8x1xi1> to vector<8x128xi1>
    %387 = vector.broadcast %cst_114 : f32 to vector<8x128xf32>
    %388 = arith.select %386, %382, %387 : vector<8x128xi1>, vector<8x128xf32>
    %389 = arith.index_cast %c7_i32 : i32 to index
    %c0_115 = arith.constant 0 : index
    %c0_116 = arith.constant 0 : index
    %390 = vector.load %arg8[%389, %c0_115, %c0_116] : memref<8x8x128xf32, #tpu.memory_space<vmem>>, vector<1x8x128xf32>
    %391 = vector.shape_cast %390 : vector<1x8x128xf32> to vector<8x128xf32>
    %392 = vector.shape_cast %388 : vector<8x128xf32> to vector<1x8x128xf32>
    tpu.vector_store %arg8[%389, %c0_115, %c0_116], %392 {strides = array<i32>} : memref<8x8x128xf32, #tpu.memory_space<vmem>>, vector<1x8x128xf32>,
    %393 = vector.shape_cast %384 : vector<8x1xi1> to vector<8x1xi1>
    %394 = vector.broadcast %393 : vector<8x1xi1> to vector<8x128xi1>
    %395 = arith.select %394, %382, %347 : vector<8x128xi1>, vector<8x128xf32>
    %c8_i32 = arith.constant 8 : i32
    %c0_117 = arith.constant 0 : index
    %c0_118 = arith.constant 0 : index
    %396 = vector.load %arg9[%c0_117, %c0_118] : memref<8x128xf32, #tpu.memory_space<vmem>>, vector<8x128xf32>
    tpu.vector_store %arg9[%c0_117, %c0_118], %395 {strides = array<i32>} : memref<8x128xf32, #tpu.memory_space<vmem>>, vector<8x128xf32>,
    return
  }
  func.func @transform_0(%arg0: i32) -> (i32, i32) {
    %c0_i32 = arith.constant 0 : i32
    %c0_i32_0 = arith.constant 0 : i32
    %c0_i32_1 = arith.constant 0 : i32
    return %c0_i32, %c0_i32_0 : i32, i32
  }
  func.func @transform_1(%arg0: i32) -> (i32, i32, i32) {
    %c0_i32 = arith.constant 0 : i32
    %c0_i32_0 = arith.constant 0 : i32
    %c0_i32_1 = arith.constant 0 : i32
    %c0_i32_2 = arith.constant 0 : i32
    return %c0_i32, %c0_i32_0, %c0_i32_1 : i32, i32, i32
  }
  func.func @transform_2(%arg0: i32) -> (i32, i32) {
    %c0_i32 = arith.constant 0 : i32
    %c0_i32_0 = arith.constant 0 : i32
    %c0_i32_1 = arith.constant 0 : i32
    return %c0_i32, %c0_i32_0 : i32, i32
  }
  func.func @transform_3(%arg0: i32) -> (i32, i32) {
    %c0_i32 = arith.constant 0 : i32
    %c0_i32_0 = arith.constant 0 : i32
    %c0_i32_1 = arith.constant 0 : i32
    return %c0_i32, %c0_i32_0 : i32, i32
  }
  func.func @transform_4(%arg0: i32) -> (i32, i32) {
    %c0_i32 = arith.constant 0 : i32
    %c0_i32_0 = arith.constant 0 : i32
    %c0_i32_1 = arith.constant 0 : i32
    return %c0_i32, %c0_i32_0 : i32, i32
  }
  func.func @transform_5(%arg0: i32) -> (i32, i32) {
    %c0_i32 = arith.constant 0 : i32
    %c0_i32_0 = arith.constant 0 : i32
    %c0_i32_1 = arith.constant 0 : i32
    return %c0_i32, %c0_i32_0 : i32, i32
  }
  func.func @transform_6(%arg0: i32) -> (i32, i32) {
    %c0_i32 = arith.constant 0 : i32
    %c0_i32_0 = arith.constant 0 : i32
    %c0_i32_1 = arith.constant 0 : i32
    return %c0_i32, %c0_i32_0 : i32, i32
  }
  func.func @transform_7(%arg0: i32) -> (i32, i32, i32) {
    %c0_i32 = arith.constant 0 : i32
    %c0_i32_0 = arith.constant 0 : i32
    %c0_i32_1 = arith.constant 0 : i32
    %c0_i32_2 = arith.constant 0 : i32
    return %c0_i32, %c0_i32_0, %c0_i32_1 : i32, i32, i32
  }
  func.func @transform_8(%arg0: i32) -> (i32, i32) {
    %c0_i32 = arith.constant 0 : i32
    %c0_i32_0 = arith.constant 0 : i32
    %c0_i32_1 = arith.constant 0 : i32
    return %c0_i32, %c0_i32_0 : i32, i32
  }
}

</mosaic_0001>

<bundles_post_ra>
// kernel: tpu_custom_call.1
= control target key start
LH: loop header
LB: loop body
LE: loop exit
PB: predicated region body
PF: predicated region fallthrough
CT: control target
= control target key end

     0   :  { %14 = vsyncpa [#allocation4], 0  ;;  %s4234_s0 = inlined_call_operand.vmem [shape: s32[8,1], index: 0, kind: input, shape index: {}]   ;;  %s4235_s1 = inlined_call_operand.hbm [shape: f32[8,8,128], index: 1, kind: input, shape index: {}]   ;;  %s4236_s2 = inlined_call_operand.hbm [shape: bf16[128,384], index: 2, kind: input, shape index: {}]   ;;  %s4237_s3 = inlined_call_operand.hbm [shape: bf16[128,384], index: 3, kind: input, shape index: {}]   ;;  %s4238_s4 = inlined_call_operand.vmem [shape: f32[1,384], index: 4, kind: input, shape index: {}]   ;;  %s4239_s5 = inlined_call_operand.vmem [shape: f32[1,384], index: 5, kind: input, shape index: {}]   ;;  %s4240_s6 = inlined_call_operand.vmem [shape: f32[8,128], index: 6, kind: input, shape index: {}]   ;;  %s4241_s7 = inlined_call_operand.hbm [shape: f32[8,8,128], index: 7, kind: output, shape index: {0}]   ;;  %s4242_s8 = inlined_call_operand.hbm [shape: f32[8,128], index: 8, kind: output, shape index: {1}]  }
   0x1   :  { %15 = vsyncpa [#allocation7], 0 }
   0x2   :  { %16 = vsyncpa [#allocation5], 0  ;;  %s37_s29 = sshll.u32 %s4236_s2, 4  ;;  %s38_s29 = int_to_ptr.hbm [resolvable:$true] %s37_s29 }
   0x3   :  { %17 = vsyncpa [#allocation11], 0  ;;  %s3875_s30 = smov [#allocation6]   ;;  %s24_s12 = sshll.u32 %s4235_s1, 4  ;;  %s25_s12 = int_to_ptr.hbm [resolvable:$true] %s24_s12 }
   0x4   :  { %s39_s9 = sshll.u32 %s3875_s30, 4  ;;  %s3876_s13 = smov 192   ;;  %s40_s9 = int_to_ptr.vmem [resolvable:$true] %s39_s9 }
   0x5   :  { %s3877_s14 = smov 12   ;;  %s3878_s15 = smov [#allocation3]  }
   0x6   :  { %45 = dma.hbm_to_vmem [thread:$0]  %s38_s29, 3072, %s40_s9, [#allocation7], %s3876_s13, %s3876_s13, %s3877_s14  }
   0x7   :  { %s26_s16 = sshll.u32 %s3878_s15, 4  ;;  %s3879_s17 = smov 128   ;;  %s27_s16 = int_to_ptr.vmem [resolvable:$true] %s26_s16 }
   0x8   :  { %s3880_s18 = smov 8   ;;  %s50_s20 = sshll.u32 %s4237_s3, 4  ;;  %s51_s20 = int_to_ptr.hbm [resolvable:$true] %s50_s20 }
   0x9   :  { %32 = dma.hbm_to_vmem [thread:$0]  %s25_s12, 1024, %s27_s16, [#allocation4], %s3879_s17, %s3879_s17, %s3880_s18  }
   0xa   :  { %s3881_s21 = smov [#allocation8]  }
   0xb   :  { %s52_s1 = sshll.u32 %s3881_s21, 4  ;;  %s53_s1 = int_to_ptr.vmem [resolvable:$true] %s52_s1 }
   0xc   :  { %58 = dma.hbm_to_vmem [thread:$0]  %s51_s20, 3072, %s53_s1, [#allocation7], %s3876_s13, %s3876_s13, %s3877_s14  }
   0xd   :  { %3867 = dma.done.wait [#allocation4], 1024  }
   0xe   :  { %3868 = vsyncadd [#allocation4], 4294966272 }
   0xf   :  { %3869 = dma.done.wait [#allocation7], 6144  }
  0x10   :  { %3870 = vsyncadd [#allocation7], 4294961152  ;;  %v2643_v0 = vld [vmem:[#allocation6 + $0xa8] sm:$0xf]  ;;  %v3459_v1 = vld [vmem:[#allocation6 + $0xb0] sm:$0xf0] }
  0x11   :  { %v2739_v2 = vld [vmem:[#allocation8 + $0xa8] sm:$0xf]  ;;  %v2644_v3 = vor.u32 %v3459_v1, %v2643_v0  ;;  %v3483_v4 = vld [vmem:[#allocation8 + $0xb0] sm:$0xf0]  ;;  %v2631_v5 = vld [vmem:[#allocation6 + $0x90] sm:$0xf] }
  0x12   :  { %v3456_v6 = vld [vmem:[#allocation6 + $0x98] sm:$0xf0]  ;;  %v2740_v7 = vor.u32 %v3483_v4, %v2739_v2  ;;  %v2727_v8 = vld [vmem:[#allocation8 + $0x90] sm:$0xf]  ;;  %v2619_v12 = vld [vmem:[#allocation6 + $0x78] sm:$0xf] }
  0x13   :  { %v3480_v9 = vld [vmem:[#allocation8 + $0x98] sm:$0xf0]  ;;  %257 = vmatpush.bf16.msra.mxu0 %v2644_v3  ;;  %v2632_v10 = vor.u32 %v3456_v6, %v2631_v5  ;;  %v3453_v13 = vld [vmem:[#allocation6 + $0x80] sm:$0xf0]  ;;  %v2715_v14 = vld [vmem:[#allocation8 + $0x78] sm:$0xf] }
  0x14   :  { %542 = vmatpush.bf16.msra.mxu3 %v2740_v7  ;;  %v2728_v11 = vor.u32 %v3480_v9, %v2727_v8  ;;  %v3477_v15 = vld [vmem:[#allocation8 + $0x80] sm:$0xf0]  ;;  %v2620_v16 = vor.u32 %v3453_v13, %v2619_v12  ;;  %v2607_v18 = vld [vmem:[#allocation6 + $0x60] sm:$0xf]  ;;  %v3450_v19 = vld [vmem:[#allocation6 + $0x68] sm:$0xf0] }
  0x15   :  { %v2716_v17 = vor.u32 %v3477_v15, %v2715_v14  ;;  %v2703_v20 = vld [vmem:[#allocation8 + $0x60] sm:$0xf]  ;;  %v3474_v21 = vld [vmem:[#allocation8 + $0x68] sm:$0xf0]  ;;  %v2608_v22 = vor.u32 %v3450_v19, %v2607_v18  ;;  %v2595_v24 = vld [vmem:[#allocation6 + $0x48] sm:$0xf] }
  0x16   :  { %v2704_v23 = vor.u32 %v3474_v21, %v2703_v20  ;;  %v3447_v25 = vld [vmem:[#allocation6 + $0x50] sm:$0xf0]  ;;  %v2691_v26 = vld [vmem:[#allocation8 + $0x48] sm:$0xf]  ;;  %v3458_v28 = vld [vmem:[#allocation6 + $0xac] sm:$0xf] }
  0x17   :  { %258 = vmatpush.bf16.msra.mxu0 %v2632_v10  ;;  %v3471_v27 = vld [vmem:[#allocation8 + $0x50] sm:$0xf0]  ;;  %v2645_v29 = vld [vmem:[#allocation6 + $0xb4] sm:$0xf0]  ;;  %v2596_v30 = vor.u32 %v3447_v25, %v2595_v24  ;;  %v2633_v33 = vld [vmem:[#allocation6 + $0x9c] sm:$0xf0] }
  0x18   :  { %543 = vmatpush.bf16.msra.mxu3 %v2728_v11  ;;  %v2648_v31 = vor.u32 %v3458_v28, %v2645_v29  ;;  %v3455_v32 = vld [vmem:[#allocation6 + $0x94] sm:$0xf]  ;;  %v2692_v34 = vor.u32 %v3471_v27, %v2691_v26  ;;  %v2583_v35 = vld [vmem:[#allocation6 + $0x30] sm:$0xf]  ;;  %v3444_v36 = vld [vmem:[#allocation6 + $0x38] sm:$0xf0] }
  0x19   :  { %v2679_v37 = vld [vmem:[#allocation8 + $0x30] sm:$0xf]  ;;  %v3468_v38 = vld [vmem:[#allocation8 + $0x38] sm:$0xf0]  ;;  %v2636_v39 = vor.u32 %v3455_v32, %v2633_v33  ;;  %v2621_v41 = vld [vmem:[#allocation6 + $0x84] sm:$0xf0]  ;;  %v2584_v42 = vor.u32 %v3444_v36, %v2583_v35 }
  0x1a   :  { %286 = vmatpush.bf16.msra.mxu1 %v2648_v31  ;;  %v3452_v40 = vld [vmem:[#allocation6 + $0x7c] sm:$0xf]  ;;  %v2680_v43 = vor.u32 %v3468_v38, %v2679_v37  ;;  %v2571_v44 = vld [vmem:[#allocation6 + $0x18] sm:$0xf]  ;;  %v3441_v45 = vld [vmem:[#allocation6 + $0x20] sm:$0xf0] }
  0x1b   :  { %259 = vmatpush.bf16.msra.mxu0 %v2620_v16  ;;  %v2667_v46 = vld [vmem:[#allocation8 + $0x18] sm:$0xf]  ;;  %v3465_v47 = vld [vmem:[#allocation8 + $0x20] sm:$0xf0]  ;;  %v2624_v48 = vor.u32 %v3452_v40, %v2621_v41  ;;  %v2651_v49 = vld [vmem:[#allocation6 + $0xb0] sm:$0xf]  ;;  %v2572_v53 = vor.u32 %v3441_v45, %v2571_v44 }
  0x1c   :  { %544 = vmatpush.bf16.msra.mxu3 %v2716_v17  ;;  %v3449_v50 = vld [vmem:[#allocation6 + $0x64] sm:$0xf]  ;;  %v2609_v51 = vld [vmem:[#allocation6 + $0x6c] sm:$0xf0]  ;;  %v3460_v52 = vld [vmem:[#allocation6 + $0xb8] sm:$0xf0]  ;;  %v2668_v58 = vor.u32 %v3465_v47, %v2667_v46 }
  0x1d   :  { %v2559_v54 = vld [vmem:[#allocation6] sm:$0xf]  ;;  %v3438_v55 = vld [vmem:[#allocation6 + $0x8] sm:$0xf0]  ;;  %v2652_v57 = vor.u32 %v3460_v52, %v2651_v49  ;;  %v2741_v61 = vld [vmem:[#allocation8 + $0xb4] sm:$0xf0]  ;;  %v2612_v0 = vor.u32 %v3449_v50, %v2609_v51 }
  0x1e   :  { %287 = vmatpush.bf16.msra.mxu1 %v2636_v39  ;;  %v2655_v56 = vld [vmem:[#allocation8] sm:$0xf]  ;;  %v3462_v59 = vld [vmem:[#allocation8 + $0x8] sm:$0xf0]  ;;  %v2747_v62 = vld [vmem:[#allocation8 + $0xb0] sm:$0xf]  ;;  %v2560_v5 = vor.u32 %v3438_v55, %v2559_v54 }
  0x1f   :  { %260 = vmatpush.bf16.msra.mxu0 %v2608_v22  ;;  %v3482_v60 = vld [vmem:[#allocation8 + $0xac] sm:$0xf]  ;;  %v3484_v63 = vld [vmem:[#allocation8 + $0xb8] sm:$0xf0]  ;;  %315 = vmatpush.bf16.msra.mxu2 %v2652_v57  ;;  %v2639_v1 = vld [vmem:[#allocation6 + $0x98] sm:$0xf]  ;;  %v2656_v9 = vor.u32 %v3462_v59, %v2655_v56 }
  0x20   :  { %545 = vmatpush.bf16.msra.mxu3 %v2704_v23  ;;  %v3446_v2 = vld [vmem:[#allocation6 + $0x4c] sm:$0xf]  ;;  %v2597_v3 = vld [vmem:[#allocation6 + $0x54] sm:$0xf0]  ;;  %v3457_v4 = vld [vmem:[#allocation6 + $0xa0] sm:$0xf0]  ;;  %v2748_v11 = vor.u32 %v3484_v63, %v2747_v62  ;;  %v2744_v14 = vor.u32 %v3482_v60, %v2741_v61 }
  0x21   :  { %v77_v6 = vld [vmem:[#allocation3] sm:$0xff]  ;;  %v78_v7 = vld [vmem:[#allocation3 + $0x8] sm:$0xff]  ;;  %v2640_v8 = vor.u32 %v3457_v4, %v2639_v1  ;;  %v3479_v12 = vld [vmem:[#allocation8 + $0x94] sm:$0xf]  ;;  %v2600_v16 = vor.u32 %v3446_v2, %v2597_v3  ;;  %s2527_s22 = sshll.u32 %s4241_s7, 4  ;;  %s2541_s26 = sshll.u32 %s4242_s8, 4  ;;  %s2528_s22 = int_to_ptr.hbm [resolvable:$true] %s2527_s22  ;;  %s2542_s26 = int_to_ptr.hbm [resolvable:$true] %s2541_s26 }
  0x22   :  { %288 = vmatpush.bf16.msra.mxu1 %v2624_v48  ;;  %v3945_v10 = vld [vmem:[%s4240_s6] sm:$0xff]  ;;  %v2735_v13 = vld [vmem:[#allocation8 + $0x98] sm:$0xf]  ;;  %v3454_v18 = vld [vmem:[#allocation6 + $0x88] sm:$0xf0]  ;;  %v3947_v19 = vpack.c.bf16 %v78_v7, %v77_v6  ;;  %s3884_s6 = smov [#allocation10]  }
  0x23   :  { %261 = vmatpush.bf16.msra.mxu0 %v2596_v30  ;;  %v3481_v15 = vld [vmem:[#allocation8 + $0xa0] sm:$0xf0]  ;;  %316 = vmatpush.bf16.msra.mxu2 %v2640_v8  ;;  %v2627_v17 = vld [vmem:[#allocation6 + $0x80] sm:$0xf]  ;;  %v3443_v21 = vld [vmem:[#allocation6 + $0x34] sm:$0xf]  ;;  %v3951_v24 = vpack.c.bf16 %v3945_v10, %v3945_v10 }
  0x24   :  { %546 = vmatpush.bf16.msra.mxu3 %v2692_v34  ;;  %v2729_v20 = vld [vmem:[#allocation8 + $0x9c] sm:$0xf0]  ;;  %v2628_v23 = vor.u32 %v3454_v18, %v2627_v17  ;;  %v3476_v25 = vld [vmem:[#allocation8 + $0x7c] sm:$0xf]  ;;  %v2736_v26 = vor.u32 %v3481_v15, %v2735_v13  ;;  %v3478_v29 = vld [vmem:[#allocation8 + $0x88] sm:$0xf0] }
  0x25   :  { %v2585_v22 = vld [vmem:[#allocation6 + $0x3c] sm:$0xf0]  ;;  %v2732_v28 = vor.u32 %v3479_v12, %v2729_v20  ;;  %v2615_v31 = vld [vmem:[#allocation6 + $0x68] sm:$0xf]  ;;  %v3451_v32 = vld [vmem:[#allocation6 + $0x70] sm:$0xf0] }
  0x26   :  { %289 = vmatpush.bf16.msra.mxu1 %v2612_v0  ;;  %v2723_v27 = vld [vmem:[#allocation8 + $0x80] sm:$0xf]  ;;  %v2588_v30 = vor.u32 %v3443_v21, %v2585_v22  ;;  %v2717_v33 = vld [vmem:[#allocation8 + $0x84] sm:$0xf0]  ;;  %v3440_v34 = vld [vmem:[#allocation6 + $0x1c] sm:$0xf]  ;;  %v2616_v36 = vor.u32 %v3451_v32, %v2615_v31 }
  0x27   :  { %262 = vmatpush.bf16.msra.mxu0 %v2584_v42  ;;  %v2573_v35 = vld [vmem:[#allocation6 + $0x24] sm:$0xf0]  ;;  %317 = vmatpush.bf16.msra.mxu2 %v2628_v23  ;;  %v2603_v37 = vld [vmem:[#allocation6 + $0x50] sm:$0xf]  ;;  %v3448_v38 = vld [vmem:[#allocation6 + $0x58] sm:$0xf0]  ;;  %v2724_v39 = vor.u32 %v3478_v29, %v2723_v27  ;;  %v2720_v40 = vor.u32 %v3476_v25, %v2717_v33 }
  0x28   :  { %547 = vmatpush.bf16.msra.mxu3 %v2680_v43  ;;  %v3473_v41 = vld [vmem:[#allocation8 + $0x64] sm:$0xf]  ;;  %v2711_v42 = vld [vmem:[#allocation8 + $0x68] sm:$0xf]  ;;  %v3475_v43 = vld [vmem:[#allocation8 + $0x70] sm:$0xf0]  ;;  %v2576_v44 = vor.u32 %v3440_v34, %v2573_v35  ;;  %v2604_v48 = vor.u32 %v3448_v38, %v2603_v37 }
  0x29   :  { %v2705_v45 = vld [vmem:[#allocation8 + $0x6c] sm:$0xf0]  ;;  %v3437_v46 = vld [vmem:[#allocation6 + $0x4] sm:$0xf]  ;;  %v2591_v49 = vld [vmem:[#allocation6 + $0x38] sm:$0xf]  ;;  %v2712_v51 = vor.u32 %v3475_v43, %v2711_v42 }
  0x2a   :  { %290 = vmatpush.bf16.msra.mxu1 %v2600_v16  ;;  %v2561_v47 = vld [vmem:[#allocation6 + $0xc] sm:$0xf0]  ;;  %v3445_v50 = vld [vmem:[#allocation6 + $0x40] sm:$0xf0]  ;;  %v2708_v52 = vor.u32 %v3473_v41, %v2705_v45  ;;  %v3472_v55 = vld [vmem:[#allocation8 + $0x58] sm:$0xf0] }
  0x2b   :  { %263 = vmatpush.bf16.msra.mxu0 %v2572_v53  ;;  %318 = vmatpush.bf16.msra.mxu2 %v2616_v36  ;;  %v2564_v53 = vor.u32 %v3437_v46, %v2561_v47  ;;  %v2699_v54 = vld [vmem:[#allocation8 + $0x50] sm:$0xf]  ;;  %v3470_v56 = vld [vmem:[#allocation8 + $0x4c] sm:$0xf]  ;;  %v2693_v57 = vld [vmem:[#allocation8 + $0x54] sm:$0xf0]  ;;  %v2592_v59 = vor.u32 %v3445_v50, %v2591_v49 }
  0x2c   :  { %548 = vmatpush.bf16.msra.mxu3 %v2668_v58  ;;  %v79_v58 = vld [vmem:[#allocation3 + $0x10] sm:$0xff]  ;;  %v80_v60 = vld [vmem:[#allocation3 + $0x18] sm:$0xff]  ;;  %v2579_v61 = vld [vmem:[#allocation6 + $0x20] sm:$0xf]  ;;  %v2700_v63 = vor.u32 %v3472_v55, %v2699_v54  ;;  %v2696_v0 = vor.u32 %v3470_v56, %v2693_v57  ;;  %v3882_v31 = vmov 0   ;;  %s2539_s23 = sshll.u32 %s3884_s6, 4  ;;  %s2540_s23 = int_to_ptr.vmem [resolvable:$true] %s2539_s23 }
  0x2d   :  { %v3442_v62 = vld [vmem:[#allocation6 + $0x28] sm:$0xf0]  ;;  %v2687_v1 = vld [vmem:[#allocation8 + $0x38] sm:$0xf]  ;;  %v3469_v2 = vld [vmem:[#allocation8 + $0x40] sm:$0xf0]  ;;  %v86_v3 = vpack.c.bf16 %v80_v60, %v79_v58  ;;  %3663 = vset.pattern.permute.xlu0 %v3882_v31  ;;  %3664 = vset.pattern.permute.xlu1 %v3882_v31 }
  0x2e   :  { %291 = vmatpush.bf16.msra.mxu1 %v2588_v30  ;;  %v3467_v4 = vld [vmem:[#allocation8 + $0x34] sm:$0xf]  ;;  %v2580_v6 = vor.u32 %v3442_v62, %v2579_v61  ;;  %v2688_v7 = vor.u32 %v3469_v2, %v2687_v1  ;;  %v2669_v13 = vld [vmem:[#allocation8 + $0x24] sm:$0xf0]  ;;  %v3466_v15 = vld [vmem:[#allocation8 + $0x28] sm:$0xf0]  ;;  %3665 = vset.pattern.permute.xlu2 %v3882_v31 }
  0x2f   :  { %264 = vmatpush.bf16.msra.mxu0 %v2560_v5  ;;  %319 = vmatpush.bf16.msra.mxu2 %v2604_v48  ;;  %v2681_v5 = vld [vmem:[#allocation8 + $0x3c] sm:$0xf0]  ;;  %v3439_v12 = vld [vmem:[#allocation6 + $0x10] sm:$0xf0]  ;;  %v2663_v20 = vld [vmem:[#allocation8 + $0x8] sm:$0xf] }
  0x30   :  { %549 = vmatpush.bf16.msra.mxu3 %v2656_v9  ;;  %v2684_v8 = vor.u32 %v3467_v4, %v2681_v5  ;;  %v3464_v9 = vld [vmem:[#allocation8 + $0x1c] sm:$0xf]  ;;  %v3463_v21 = vld [vmem:[#allocation8 + $0x10] sm:$0xf0]  ;;  %v3461_v22 = vld [vmem:[#allocation8 + $0x4] sm:$0xf] }
  0x31   :  { %v2672_v18 = vor.u32 %v3464_v9, %v2669_v13  ;;  %v2657_v23 = vld [vmem:[#allocation8 + $0xc] sm:$0xf0]  ;;  %v2664_v25 = vor.u32 %v3463_v21, %v2663_v20  ;;  %v81_v27 = vld [vmem:[#allocation3 + $0x20] sm:$0xff]  ;;  %v84_v34 = vld [vmem:[#allocation3 + $0x38] sm:$0xff] }
  0x32   :  { %265 = vmatmul.bf16.vlgmr.msra.gmra.mxu0 %v3947_v19  ;;  %292 = vmatpush.bf16.msra.mxu1 %v2576_v44  ;;  %v3961_v30 = vld [vmem:[%s4234_s0] sm:$0xff]  ;;  %v83_v33 = vld [vmem:[#allocation3 + $0x30] sm:$0xff]  ;;  %v2837_v37 = vld [vmem:[#allocation8 + $0xa8] sm:$0xf] }
  0x33   :  { %568 = vmatpush.bf16.msrb.mxu0 %v2748_v11  ;;  %550 = vmatmul.bf16.vlgmr.msra.gmra.mxu3 %v3951_v24  ;;  %v2567_v11 = vld [vmem:[#allocation6 + $0x8] sm:$0xf]  ;;  %vm628_vm0 = vcmp.gt.s32.totalorder %v3961_v30, 0  ;;  %vm896_vm1 = vcmp.gt.s32.totalorder %v3961_v30, 1  ;;  %v88_v35 = vpack.c.bf16 %v84_v34, %v83_v33  ;;  %vm2241_vm2 = vcmp.gt.s32.totalorder %v3961_v30, 6 }
  0x34   :  { %555 = vmatpush.bf16.msrb.mxu3 %v2744_v14  ;;  %320 = vmatpush.bf16.msra.mxu2 %v2592_v59  ;;  %v2675_v14 = vld [vmem:[#allocation8 + $0x20] sm:$0xf]  ;;  %v2568_v16 = vor.u32 %v3439_v12, %v2567_v11  ;;  %v897_v32 = vsel %vm896_vm1, 1, %v3882_v31  ;;  %v2242_v36 = vsel %vm2241_vm2, 1, %v3882_v31  ;;  %v3507_v38 = vld [vmem:[#allocation8 + $0xb0] sm:$0xf0] }
  0x35   :  { %v2676_v17 = vor.u32 %v3466_v15, %v2675_v14  ;;  %v2839_v41 = vld [vmem:[#allocation8 + $0xb4] sm:$0xf0]  ;;  %v2825_v42 = vld [vmem:[#allocation8 + $0x90] sm:$0xf]  ;;  %v3504_v44 = vld [vmem:[#allocation8 + $0x98] sm:$0xf0] }
  0x36   :  { %293 = vmatpush.bf16.msra.mxu1 %v2564_v53  ;;  %v2826_v45 = vor.u32 %v3504_v44, %v2825_v42  ;;  %v3503_v47 = vld [vmem:[#allocation8 + $0x94] sm:$0xf]  ;;  %v2827_v48 = vld [vmem:[#allocation8 + $0x9c] sm:$0xf0]  ;;  %v2845_v62 = vld [vmem:[#allocation8 + $0xb0] sm:$0xf] }
  0x37   :  { %569 = vmatpush.bf16.msrb.mxu0 %v2736_v26  ;;  %v2660_v26 = vor.u32 %v3461_v22, %v2657_v23  ;;  %v2830_v49 = vor.u32 %v3503_v47, %v2827_v48  ;;  %v3979_v50 = vld [vmem:[%s4239_s5] sm:$0x7]  ;;  %v3505_v4 = vld [vmem:[#allocation8 + $0xa0] sm:$0xf0]  ;;  %v3500_v9 = vld [vmem:[#allocation8 + $0x7c] sm:$0xf] }
  0x38   :  { %556 = vmatpush.bf16.msrb.mxu3 %v2732_v28  ;;  %321 = vmatpush.bf16.msra.mxu2 %v2580_v6  ;;  %v82_v28 = vld [vmem:[#allocation3 + $0x28] sm:$0xff]  ;;  %v408_v54 = vperm.slane %v3979_v50, 0  ;;  %v2821_v14 = vld [vmem:[#allocation8 + $0x80] sm:$0xf]  ;;  %v3497_v23 = vld [vmem:[#allocation8 + $0x64] sm:$0xf] }
  0x39   :  { %294 = vmatmul.bf16.vlgmr.msra.gmra.mxu1 %v3947_v19  ;;  %v87_v29 = vpack.c.bf16 %v82_v28, %v81_v27  ;;  %v2815_v12 = vld [vmem:[#allocation8 + $0x84] sm:$0xf0]  ;;  %v3502_v15 = vld [vmem:[#allocation8 + $0x88] sm:$0xf0]  ;;  %v2801_v21 = vld [vmem:[#allocation8 + $0x60] sm:$0xf] }
  0x3a   :  { %v3498_v22 = vld [vmem:[#allocation8 + $0x68] sm:$0xf0]  ;;  %v2803_v28 = vld [vmem:[#allocation8 + $0x6c] sm:$0xf0]  ;;  %v409_v33 = vperm.slane %v3979_v50, 1  ;;  %vm1165_vm12 = vcmp.gt.s32.totalorder %v3961_v30, 2 }
  0x3b   :  { %570 = vmatpush.bf16.msrb.mxu0 %v2724_v39  ;;  %v2838_v39 = vor.u32 %v3507_v38, %v2837_v37  ;;  %v2802_v27 = vor.u32 %v3498_v22, %v2801_v21  ;;  %v2806_v34 = vor.u32 %v3497_v23, %v2803_v28  ;;  %v3499_v42 = vld [vmem:[#allocation8 + $0x70] sm:$0xf0]  ;;  %v2773_v21 = vld [vmem:[#allocation8 + $0x20] sm:$0xf]  ;;  %v3490_v22 = vld [vmem:[#allocation8 + $0x28] sm:$0xf0] }
  0x3c   :  { %557 = vmatpush.bf16.msrb.mxu3 %v2720_v40  ;;  %322 = vmatpush.bf16.msra.mxu2 %v2568_v16  ;;  %v3506_v40 = vld [vmem:[#allocation8 + $0xac] sm:$0xf]  ;;  %v3485_v28 = vld [vmem:[#allocation8 + $0x4] sm:$0xf]  ;;  %vm1434_vm13 = vcmp.gt.s32.totalorder %v3961_v30, 3  ;;  %vm2510_vm2 = vcmp.gt.s32.totalorder %v3961_v30, 7 }
  0x3d   :  { %810 = vmatpush.bf16.msrb.mxu1 %v2838_v39  ;;  %v2842_v43 = vor.u32 %v3506_v40, %v2839_v41  ;;  %v2809_v41 = vld [vmem:[#allocation8 + $0x68] sm:$0xf] }
  0x3e   :  { %v2810_v47 = vor.u32 %v3499_v42, %v2809_v41 }
  0x3f   :  { %571 = vmatpush.bf16.msrb.mxu0 %v2712_v51  ;;  %323 = vmatmul.bf16.vlgmr.msra.gmra.mxu2 %v3947_v19  ;;  %v629_v19 = vsel %vm628_vm0, 1, %v3882_v31 }
  0x40   :  { %558 = vmatpush.bf16.msrb.mxu3 %v2708_v52  ;;  %631 = vperm.xlu0 %3663, %v629_v19   ;;  %v3495_v19 = vld [vmem:[#allocation8 + $0x50] sm:$0xf0] }
  0x41   :  { %823 = vmatpush.bf16.msrb.mxu2 %v2842_v43  ;;  %811 = vmatpush.bf16.msrb.mxu1 %v2826_v45  ;;  %v2777_v45 = vld [vmem:[#allocation8 + $0x30] sm:$0xf] }
  0x42   :  { %270 = vmatmul.bf16.gmra.mxu0 %v86_v3 }
  0x43   :  { %572 = vmatpush.bf16.msrb.mxu0 %v2700_v63  ;;  %v3508_v63 = vld [vmem:[#allocation8 + $0xb8] sm:$0xf0] }
  0x44   :  { %559 = vmatpush.bf16.msrb.mxu3 %v2696_v0  ;;  %v2846_v1 = vor.u32 %v3508_v63, %v2845_v62  ;;  %v3491_v62 = vld [vmem:[#allocation8 + $0x34] sm:$0xf]  ;;  %v2779_v63 = vld [vmem:[#allocation8 + $0x3c] sm:$0xf0] }
  0x45   :  { %824 = vmatpush.bf16.msrb.mxu2 %v2830_v49 }
  0x47   :  { %573 = vmatpush.bf16.msrb.mxu0 %v2688_v7  ;;  %v2813_v7 = vld [vmem:[#allocation8 + $0x78] sm:$0xf] }
  0x48   :  { %560 = vmatpush.bf16.msrb.mxu3 %v2684_v8  ;;  %899 = vperm.xlu0 %3663, %v897_v32   ;;  %v3501_v8 = vld [vmem:[#allocation8 + $0x80] sm:$0xf0] }
  0x49   :  { %299 = vmatmul.bf16.gmra.mxu1 %v86_v3  ;;  %v2814_v11 = vor.u32 %v3501_v8, %v2813_v7  ;;  %v2765_v7 = vld [vmem:[#allocation8 + $0x18] sm:$0xf]  ;;  %v3489_v8 = vld [vmem:[#allocation8 + $0x20] sm:$0xf0] }
  0x4b   :  { %574 = vmatpush.bf16.msrb.mxu0 %v2676_v17  ;;  %v2818_v17 = vor.u32 %v3500_v9, %v2815_v12  ;;  %812 = vmatpush.bf16.msrb.mxu1 %v2814_v11  ;;  %v2766_v11 = vor.u32 %v3489_v8, %v2765_v7  ;;  %v3488_v12 = vld [vmem:[#allocation8 + $0x1c] sm:$0xf] }
  0x4c   :  { %561 = vmatpush.bf16.msrb.mxu3 %v2672_v18  ;;  %v2822_v18 = vor.u32 %v3502_v15, %v2821_v14  ;;  %v2767_v14 = vld [vmem:[#allocation8 + $0x24] sm:$0xf0]  ;;  %v2753_v15 = vld [vmem:[#allocation8] sm:$0xf] }
  0x4d   :  { %825 = vmatpush.bf16.msrb.mxu2 %v2818_v17 }
  0x4f   :  { %575 = vmatpush.bf16.msrb.mxu0 %v2664_v25  ;;  %328 = vmatmul.bf16.gmra.mxu2 %v86_v3  ;;  %v2833_v3 = vld [vmem:[#allocation8 + $0x98] sm:$0xf] }
  0x50   :  { %562 = vmatpush.bf16.msrb.mxu3 %v2660_v26  ;;  %2244 = vperm.xlu0 %3663, %v2242_v36   ;;  %v2834_v6 = vor.u32 %v3505_v4, %v2833_v3  ;;  %v2791_v36 = vld [vmem:[#allocation8 + $0x54] sm:$0xf0]  ;;  %v2782_v3 = vor.u32 %v3491_v62, %v2779_v63  ;;  %v3493_v4 = vld [vmem:[#allocation8 + $0x40] sm:$0xf0] }
  0x51   :  { %813 = vmatpush.bf16.msrb.mxu1 %v2802_v27  ;;  %826 = vmatpush.bf16.msrb.mxu2 %v2806_v34  ;;  %v2774_v27 = vor.u32 %v3490_v22, %v2773_v21 }
  0x52   :  { %275 = vmatmul.bf16.gmra.mxu0 %v87_v29 }
  0x53   :  { %563 = vmatmul.bf16.vlgmr.msrb.gmra.mxu3 %v3951_v24 }
  0x54   :  { %836 = vmatpush.bf16.msra.mxu3 %v2846_v1 }
  0x58   :  { %837 = vmatpush.bf16.msra.mxu3 %v2834_v6 }
  0x59   :  { %304 = vmatmul.bf16.gmra.mxu1 %v87_v29 }
  0x5c   :  { %838 = vmatpush.bf16.msra.mxu3 %v2822_v18  ;;  %v2770_v18 = vor.u32 %v3488_v12, %v2767_v14 }
  0x5f   :  { %333 = vmatmul.bf16.gmra.mxu2 %v87_v29  ;;  %v2789_v29 = vld [vmem:[#allocation8 + $0x48] sm:$0xf] }
  0x60   :  { %v2790_v39 = vor.u32 %v3495_v19, %v2789_v29  ;;  %839 = vmatpush.bf16.msra.mxu3 %v2810_v47  ;;  %v2755_v29 = vld [vmem:[#allocation8 + $0xc] sm:$0xf0]  ;;  %v2761_v19 = vld [vmem:[#allocation8 + $0x8] sm:$0xf] }
  0x61   :  { %v2758_v34 = vor.u32 %v3485_v28, %v2755_v29 }
  0x62   :  { %280 = vmatmul.bf16.gmra.mxu0 %v88_v35  ;;  %814 = vmatpush.bf16.msrb.mxu1 %v2790_v39 }
  0x69   :  { %309 = vmatmul.bf16.gmra.mxu1 %v88_v35 }
  0x6f   :  { %338 = vmatmul.bf16.gmra.mxu2 %v88_v35  ;;  %v3494_v35 = vld [vmem:[#allocation8 + $0x4c] sm:$0xf] }
  0x70   :  { %v2794_v44 = vor.u32 %v3494_v35, %v2791_v36  ;;  %v3487_v35 = vld [vmem:[#allocation8 + $0x10] sm:$0xf0] }
  0x72   :  { %576 = vmatmul.bf16.vlgmr.msrb.gmra.mxu0 %v3951_v24  ;;  %v121_v24 = vld [vmem:[%s4238_s4] sm:$0x7]  ;;  %827 = vmatpush.bf16.msrb.mxu2 %v2794_v44 }
  0x73   :  { %v3981_v51 = vperm.slane %v121_v24, 0  ;;  %v3996_v16 = vperm.slane %v121_v24, 1  ;;  %v4005_v40 = vperm.slane %v121_v24, 2  ;;  %v2797_v24 = vld [vmem:[#allocation8 + $0x50] sm:$0xf] }
  0x76   :  { %828 = vmatpush.bf16.msrb.mxu2 %v2782_v3 }
  0x7a   :  { %829 = vmatpush.bf16.msrb.mxu2 %v2770_v18 }
  0x7e   :  { %830 = vmatpush.bf16.msrb.mxu2 %v2758_v34 }
  0xaf   :  { %v266_v46 = vpop.f32.mrf.mxu0 }
  0xb0   :  { %v267_v57 = vadd.f32 %v266_v46, %v3981_v51  ;;  %v3492_v46 = vld [vmem:[#allocation8 + $0x38] sm:$0xf0] }
  0xb2   :  { %v632_v14 = vpop.permute.xlu0 %631 }
  0xb3   :  { %vm633_vm11 = vcmp.eq.s32.totalorder %v632_v14, 1 }
  0xb6   :  { %v551_v52 = vpop.f32.mrf.mxu3  ;;  %v295_v26 = vpop.f32.mrf.mxu1 }
  0xb7   :  { %v268_v53 = vpop.f32.mrf.mxu0  ;;  %v552_v56 = vadd.f32 %v551_v52, %v408_v54  ;;  %v296_v38 = vadd.f32 %v295_v26, %v3996_v16 }
  0xb8   :  { %v3985_v55 = vadd.f32 %v268_v53, %v3981_v51  ;;  %v2778_v53 = vor.u32 %v3492_v46, %v2777_v45 }
  0xb9   :  { %v581_v60 = vadd.f32 %v552_v56, %v267_v57  ;;  %v3496_v56 = vld [vmem:[#allocation8 + $0x58] sm:$0xf0] }
  0xba   :  { %815 = vmatpush.bf16.msrb.mxu1 %v2778_v53 }
  0xbb   :  { %v2749_v0 = vmul.f32 -1.442695, %v581_v60 }
  0xbd   :  { %3666 = vpow2.f32 %v2749_v0  ;;  %v2785_v0 = vld [vmem:[#allocation8 + $0x38] sm:$0xf] }
  0xbe   :  { %v553_v58 = vpop.f32.mrf.mxu3  ;;  %v2786_v6 = vor.u32 %v3493_v4, %v2785_v0  ;;  %816 = vmatpush.bf16.msrb.mxu1 %v2766_v11  ;;  %v4055_v29 = vpop.f32.mrf.mxu1 }
  0xbf   :  { %v271_v59 = vpop.f32.mrf.mxu0  ;;  %v2798_v58 = vor.u32 %v3496_v56, %v2797_v24 }
  0xc0   :  { %v3989_v61 = vadd.f32 %v271_v59, %v3981_v51 }
  0xc1   :  { %840 = vmatpush.bf16.msra.mxu3 %v2798_v58 }
  0xc2   :  { %v3994_v13 = vpop.f32.mrf.mxu2 }
  0xc3   :  { %v3667_v20 = vpop.eup %3666  ;;  %v325_v62 = vadd.f32 %v3994_v13, %v4005_v40 }
  0xc4   :  { %v4002_v37 = vadd.f32 1.0, %v3667_v20  ;;  %v3486_v20 = vld [vmem:[#allocation8 + $0x8] sm:$0xf0] }
  0xc5   :  { %841 = vmatpush.bf16.msra.mxu3 %v2786_v6  ;;  %v2754_v26 = vor.u32 %v3486_v20, %v2753_v15 }
  0xc6   :  { %3668 = vrcp.f32 %v4002_v37  ;;  %vm591_vm4 = vweird.f32 %v4002_v37  ;;  %v595_v53 = vand.u32 2147483647, %v4002_v37 }
  0xc7   :  { %v273_v2 = vpop.f32.mrf.mxu0  ;;  %817 = vmatpush.bf16.msrb.mxu1 %v2754_v26 }
  0xc8   :  { %v3992_v5 = vadd.f32 %v273_v2, %v3981_v51  ;;  %vm596_vm6 = vcmp.eq.f32.partialorder %v595_v53, 8.507059e+37  ;;  %v2923_v53 = vld [vmem:[#allocation8 + $0x90] sm:$0xf] }
  0xc9   :  { %842 = vmatpush.bf16.msra.mxu3 %v2774_v27 }
  0xca   :  { %v326_v49 = vpop.f32.mrf.mxu2 }
  0xcb   :  { %v4009_v54 = vadd.f32 %v326_v49, %v4005_v40 }
  0xcc   :  { %v4014_v1 = vpop.eup %3668 }
  0xcd   :  { %v587_v9 = vmul.f32 %v4014_v1, %v4002_v37  ;;  %vm592_vm3 = vweird.f32 %v4014_v1 }
  0xce   :  { %vm593_vm5 = vmor %vm591_vm4, %vm592_vm3 }
  0xcf   :  { %v276_v25 = vpop.f32.mrf.mxu0  ;;  %v588_v36 = vsub.f32 1.0, %v587_v9 }
  0xd0   :  { %v3999_v32 = vadd.f32 %v276_v25, %v3981_v51 }
  0xd1   :  { %v589_v41 = vmul.f32 %v4014_v1, %v588_v36  ;;  %v2935_v36 = vld [vmem:[#allocation8 + $0xa8] sm:$0xf] }
  0xd2   :  { %v329_v39 = vpop.f32.mrf.mxu2 }
  0xd3   :  { %v4023_v42 = vadd.f32 %v329_v39, %v4005_v40  ;;  %v590_v47 = vadd.f32 %v4014_v1, %v589_v41  ;;  %v3530_v39 = vld [vmem:[#allocation8 + $0xac] sm:$0xf] }
  0xd6   :  { %v564_v43 = vpop.f32.mrf.mxu3 }
  0xd7   :  { %v565_v48 = vadd.f32 %v564_v43, %v409_v33  ;;  %v278_v57 = vpop.f32.mrf.mxu0 }
  0xd8   :  { %v4012_v60 = vadd.f32 %v278_v57, %v3981_v51 }
  0xd9   :  { %v601_v52 = vadd.f32 %v565_v48, %v296_v38  ;;  %v2762_v38 = vor.u32 %v3487_v35, %v2761_v19  ;;  %v597_v48 = vand.u32 2147483648, %v4002_v37  ;;  %v4057_v19 = vpop.f32.mrf.mxu1 }
  0xda   :  { %v331_v24 = vpop.f32.mrf.mxu2 }
  0xdb   :  { %v2750_v59 = vmul.f32 -1.442695, %v601_v52  ;;  %843 = vmatpush.bf16.msra.mxu3 %v2762_v38  ;;  %v410_v52 = vperm.slane %v3979_v50, 2  ;;  %v4036_v57 = vadd.f32 %v331_v24, %v4005_v40  ;;  %v3531_v38 = vld [vmem:[#allocation8 + $0xb0] sm:$0xf0] }
  0xdc   :  { %v2936_v41 = vor.u32 %v3531_v38, %v2935_v36  ;;  %v3528_v24 = vld [vmem:[#allocation8 + $0x98] sm:$0xf0] }
  0xdd   :  { %3670 = vpow2.f32 %v2750_v59  ;;  %v598_v59 = vor.u32 1.1754944e-38, %v597_v48 }
  0xde   :  { %v566_v2 = vpop.f32.mrf.mxu3  ;;  %1079 = vmatpush.bf16.msra.mxu0 %v2936_v41 }
  0xdf   :  { %v281_v17 = vpop.f32.mrf.mxu0 }
  0xe0   :  { %v4019_v25 = vadd.f32 %v281_v17, %v3981_v51 }
  0xe2   :  { %v334_v6 = vpop.f32.mrf.mxu2 }
  0xe3   :  { %v3671_v23 = vpop.eup %3670  ;;  %v4041_v8 = vadd.f32 %v334_v6, %v4005_v40  ;;  %v2913_v6 = vld [vmem:[#allocation8 + $0x84] sm:$0xf0] }
  0xe4   :  { %v605_v33 = vadd.f32 1.0, %v3671_v23 }
  0xe6   :  { %3672 = vrcp.f32 %v605_v33  ;;  %vm611_vm7 = vweird.f32 %v605_v33  ;;  %v617_v37 = vand.u32 2147483648, %v605_v33  ;;  %v615_v3 = vand.u32 2147483647, %v605_v33 }
  0xe7   :  { %v283_v43 = vpop.f32.mrf.mxu0 }
  0xe8   :  { %v4026_v44 = vadd.f32 %v283_v43, %v3981_v51  ;;  %v594_v51 = vsel %vm593_vm5, %v4014_v1, %v590_v47  ;;  %v618_v7 = vor.u32 1.1754944e-38, %v617_v37  ;;  %vm616_vm10 = vcmp.eq.f32.partialorder %v615_v3, 8.507059e+37  ;;  %v2937_v43 = vld [vmem:[#allocation8 + $0xb4] sm:$0xf0]  ;;  %v3524_v3 = vld [vmem:[#allocation8 + $0x7c] sm:$0xf] }
  0xe9   :  { %v599_v50 = vsel %vm596_vm6, %v598_v59, %v594_v51  ;;  %v2940_v47 = vor.u32 %v3530_v39, %v2937_v43  ;;  %v2924_v51 = vor.u32 %v3528_v24, %v2923_v53  ;;  %v2931_v59 = vld [vmem:[#allocation8 + $0x98] sm:$0xf]  ;;  %v3518_v53 = vld [vmem:[#allocation8 + $0x4c] sm:$0xf] }
  0xea   :  { %v336_v18 = vpop.f32.mrf.mxu2  ;;  %v2911_v37 = vld [vmem:[#allocation8 + $0x78] sm:$0xf] }
  0xeb   :  { %v4045_v20 = vadd.f32 %v336_v18, %v4005_v40  ;;  %1092 = vmatpush.bf16.msra.mxu1 %v2940_v47  ;;  %1080 = vmatpush.bf16.msra.mxu0 %v2924_v51  ;;  %v3521_v18 = vld [vmem:[#allocation8 + $0x64] sm:$0xf]  ;;  %v2889_v24 = vld [vmem:[#allocation8 + $0x54] sm:$0xf0]  ;;  %v298_v51 = vadd.f32 %v4055_v29, %v3996_v16 }
  0xec   :  { %v3673_v45 = vpop.eup %3672 }
  0xed   :  { %v607_v46 = vmul.f32 %v3673_v45, %v605_v33  ;;  %vm612_vm8 = vweird.f32 %v3673_v45  ;;  %v4059_v33 = vpop.f32.mrf.mxu1 }
  0xee   :  { %vm613_vm9 = vmor %vm611_vm7, %vm612_vm8 }
  0xef   :  { %v608_v49 = vsub.f32 1.0, %v607_v46  ;;  %v577_v58 = vpop.f32.mrf.mxu0  ;;  %v3532_v46 = vld [vmem:[#allocation8 + $0xb8] sm:$0xf0] }
  0xf0   :  { %v578_v63 = vadd.f32 %v577_v58, %v410_v52  ;;  %v4072_v52 = vld [vmem:[%s4239_s5] sm:$0x7] }
  0xf1   :  { %v609_v56 = vmul.f32 %v3673_v45, %v608_v49  ;;  %v2925_v58 = vld [vmem:[#allocation8 + $0x9c] sm:$0xf0]  ;;  %v677_v38 = vperm.slane %v4072_v52, 1 }
  0xf2   :  { %v621_v2 = vmul.f32 %v599_v50, %v578_v63  ;;  %v339_v27 = vpop.f32.mrf.mxu2 }
  0xf3   :  { %v610_v0 = vadd.f32 %v3673_v45, %v609_v56  ;;  %v4053_v28 = vadd.f32 %v339_v27, %v4005_v40  ;;  %v3527_v56 = vld [vmem:[#allocation8 + $0x94] sm:$0xf] }
  0xf4   :  { %v622_v4 = vadd.f32 %v621_v2, %v325_v62  ;;  %v3529_v62 = vld [vmem:[#allocation8 + $0xa0] sm:$0xf0]  ;;  %v2928_v63 = vor.u32 %v3527_v56, %v2925_v58  ;;  %v3523_v27 = vld [vmem:[#allocation8 + $0x70] sm:$0xf0]  ;;  %v2895_v56 = vld [vmem:[#allocation8 + $0x50] sm:$0xf] }
  0xf5   :  { %v614_v1 = vsel %vm613_vm9, %v3673_v45, %v610_v0  ;;  %v4061_v34 = vpop.f32.mrf.mxu1  ;;  %v2943_v45 = vld [vmem:[#allocation8 + $0xb0] sm:$0xf]  ;;  %v2932_v50 = vor.u32 %v3529_v62, %v2931_v59  ;;  %v676_v0 = vperm.slane %v4072_v52, 0  ;;  %v3525_v2 = vld [vmem:[#allocation8 + $0x80] sm:$0xf0]  ;;  %v2892_v59 = vor.u32 %v3518_v53, %v2889_v24 }
  0xf6   :  { %3674 = vtanh.f32 %v622_v4  ;;  %v619_v9 = vsel %vm616_vm10, %v618_v7, %v614_v1  ;;  %v2944_v48 = vor.u32 %v3532_v46, %v2943_v45  ;;  %1093 = vmatpush.bf16.msra.mxu1 %v2928_v63  ;;  %v2912_v1 = vor.u32 %v3525_v2, %v2911_v37  ;;  %v2919_v7 = vld [vmem:[#allocation8 + $0x80] sm:$0xf]  ;;  %v2887_v45 = vld [vmem:[#allocation8 + $0x48] sm:$0xf]  ;;  %v3519_v46 = vld [vmem:[#allocation8 + $0x50] sm:$0xf0] }
  0xf7   :  { %v579_v13 = vpop.f32.mrf.mxu0  ;;  %v624_v11 = vsub.f32 1.0, %v619_v9  ;;  %v626_v17 = vmul.f32 %v619_v9, %v3945_v10  ;;  %v2916_v9 = vor.u32 %v3524_v3, %v2913_v6  ;;  %v3520_v62 = vld [vmem:[#allocation8 + $0x58] sm:$0xf0]  ;;  %v2875_v37 = vld [vmem:[#allocation8 + $0x30] sm:$0xf] }
  0xf8   :  { %1105 = vmatpush.bf16.msra.mxu2 %v2944_v48  ;;  %v3526_v13 = vld [vmem:[#allocation8 + $0x88] sm:$0xf0]  ;;  %1081 = vmatpush.bf16.msra.mxu0 %v2912_v1  ;;  %v2888_v48 = vor.u32 %v3519_v46, %v2887_v45  ;;  %v3516_v2 = vld [vmem:[#allocation8 + $0x38] sm:$0xf0]  ;;  %v3515_v3 = vld [vmem:[#allocation8 + $0x34] sm:$0xf] }
  0xf9   :  { %v2876_v1 = vor.u32 %v3516_v2, %v2875_v37  ;;  %v2877_v6 = vld [vmem:[#allocation8 + $0x3c] sm:$0xf0]  ;;  %v3510_v45 = vld [vmem:[#allocation8 + $0x8] sm:$0xf0]  ;;  %v3509_v46 = vld [vmem:[#allocation8 + $0x4] sm:$0xf] }
  0xfa   :  { %v4075_v4 = vpop.f32.mrf.mxu2  ;;  %1094 = vmatpush.bf16.msra.mxu1 %v2916_v9  ;;  %v2880_v9 = vor.u32 %v3515_v3, %v2877_v6  ;;  %v2859_v53 = vld [vmem:[#allocation8 + $0x8] sm:$0xf]  ;;  %v678_v37 = vperm.slane %v4072_v52, 2  ;;  %v1435_v6 = vsel %vm1434_vm13, 1, %v3882_v31 }
  0xfc   :  { %v3675_v12 = vpop.eup %3674  ;;  %1106 = vmatpush.bf16.msra.mxu2 %v2932_v50  ;;  %v2896_v50 = vor.u32 %v3520_v62, %v2895_v56  ;;  %v1166_v62 = vsel %vm1165_vm12, 1, %v3882_v31 }
  0xfd   :  { %v625_v15 = vmul.f32 %v3675_v12, %v624_v11  ;;  %v2920_v11 = vor.u32 %v3526_v13, %v2919_v7  ;;  %v2883_v7 = vld [vmem:[#allocation8 + $0x38] sm:$0xf]  ;;  %v3517_v13 = vld [vmem:[#allocation8 + $0x40] sm:$0xf0]  ;;  %1168 = vperm.xlu1 %3664, %v1166_v62   ;;  %v3556_v62 = vld [vmem:[#allocation8 + $0xb8] sm:$0xf0] }
  0xff   :  { %v627_v21 = vadd.f32 %v626_v17, %v625_v15  ;;  %v2899_v15 = vld [vmem:[#allocation8 + $0x60] sm:$0xf]  ;;  %v3522_v17 = vld [vmem:[#allocation8 + $0x68] sm:$0xf0] }
 0x100   :  { %1107 = vmatpush.bf16.msra.mxu2 %v2920_v11  ;;  %v2884_v11 = vor.u32 %v3517_v13, %v2883_v7 }
 0x101   :  { %v634_v22 = vsel %vm633_vm11, %v627_v21, 0.0  ;;  %v4048_v23 = vsel %vm633_vm11, %v627_v21, %v3945_v10  ;;  %v4063_v10 = vpop.f32.mrf.mxu1  ;;  %v2900_v21 = vor.u32 %v3522_v17, %v2899_v15  ;;  %v3513_v15 = vld [vmem:[#allocation8 + $0x20] sm:$0xf0]  ;;  %v3512_v17 = vld [vmem:[#allocation8 + $0x1c] sm:$0xf] }
 0x102   :  { %635 = vst [vmem:[#allocation9] sm:$0xff] %v634_v22  ;;  %v641_v26 = vpack.c.bf16 %v4048_v23, %v4048_v23  ;;  %v2901_v22 = vld [vmem:[#allocation8 + $0x6c] sm:$0xf0] }
 0x103   :  { %v2904_v39 = vor.u32 %v3521_v18, %v2901_v22  ;;  %1082 = vmatpush.bf16.msra.mxu0 %v2900_v21 }
 0x104   :  { %818 = vmatmul.bf16.vlgmr.msrb.gmra.mxu1 %v641_v26  ;;  %831 = vmatmul.bf16.vlgmr.msrb.gmra.mxu2 %v641_v26 }
 0x105   :  { %844 = vmatmul.bf16.vlgmr.msra.gmra.mxu3 %v641_v26  ;;  %v2907_v26 = vld [vmem:[#allocation8 + $0x68] sm:$0xf]  ;;  %1095 = vmatpush.bf16.msra.mxu1 %v2904_v39  ;;  %v3514_v39 = vld [vmem:[#allocation8 + $0x28] sm:$0xf0] }
 0x106   :  { %v2908_v41 = vor.u32 %v3523_v27, %v2907_v26  ;;  %v2865_v26 = vld [vmem:[#allocation8 + $0x24] sm:$0xf0]  ;;  %v2871_v27 = vld [vmem:[#allocation8 + $0x20] sm:$0xf]  ;;  %1437 = vperm.xlu1 %3664, %v1435_v6   ;;  %v3029_v6 = vld [vmem:[#allocation8 + $0x98] sm:$0xf] }
 0x107   :  { %1083 = vmatpush.bf16.msra.mxu0 %v2888_v48  ;;  %v2853_v48 = vld [vmem:[#allocation8 + $0xc] sm:$0xf0] }
 0x108   :  { %1108 = vmatpush.bf16.msra.mxu2 %v2908_v41  ;;  %v2872_v41 = vor.u32 %v3514_v39, %v2871_v27  ;;  %v2856_v56 = vor.u32 %v3509_v46, %v2853_v48  ;;  %v2511_v27 = vsel %vm2510_vm2, 1, %v3882_v31 }
 0x109   :  { %v4065_v35 = vpop.f32.mrf.mxu1  ;;  %1096 = vmatpush.bf16.msra.mxu1 %v2892_v59 }
 0x10b   :  { %1084 = vmatpush.bf16.msra.mxu0 %v2876_v1 }
 0x10c   :  { %1109 = vmatpush.bf16.msra.mxu2 %v2896_v50 }
 0x10d   :  { %1097 = vmatpush.bf16.msra.mxu1 %v2880_v9 }
 0x10e   :  { %2513 = vperm.xlu1 %3664, %v2511_v27  }
 0x110   :  { %1110 = vmatpush.bf16.msra.mxu2 %v2884_v11 }
 0x111   :  { %v4067_v49 = vpop.f32.mrf.mxu1 }
 0x114   :  { %1111 = vmatpush.bf16.msra.mxu2 %v2872_v41 }
 0x181   :  { %v819_v12 = vpop.f32.mrf.mxu1 }
 0x182   :  { %v820_v14 = vadd.f32 %v819_v12, %v676_v0 }
 0x184   :  { %v849_v36 = vadd.f32 %v820_v14, %v3985_v55  ;;  %v2863_v14 = vld [vmem:[#allocation8 + $0x18] sm:$0xf] }
 0x185   :  { %v2864_v22 = vor.u32 %v3513_v15, %v2863_v14 }
 0x186   :  { %v2847_v43 = vmul.f32 -1.442695, %v849_v36 }
 0x187   :  { %v832_v47 = vpop.f32.mrf.mxu2  ;;  %1085 = vmatpush.bf16.msra.mxu0 %v2864_v22 }
 0x188   :  { %3676 = vpow2.f32 %v2847_v43  ;;  %v833_v55 = vadd.f32 %v832_v47, %v677_v38  ;;  %v4081_v58 = vpop.f32.mrf.mxu3  ;;  %v2868_v38 = vor.u32 %v3512_v17, %v2865_v26  ;;  %v2851_v43 = vld [vmem:[#allocation8] sm:$0xf] }
 0x189   :  { %v821_v63 = vpop.f32.mrf.mxu1  ;;  %v2852_v47 = vor.u32 %v3510_v45, %v2851_v43  ;;  %v900_v45 = vpop.permute.xlu0 %899 }
 0x18a   :  { %v869_v0 = vadd.f32 %v833_v55, %v298_v51  ;;  %1098 = vmatpush.bf16.msra.mxu1 %v2868_v38  ;;  %v3511_v51 = vld [vmem:[#allocation8 + $0x10] sm:$0xf0]  ;;  %vm901_vm7 = vcmp.eq.s32.totalorder %v900_v45, 1 }
 0x18b   :  { %1086 = vmatpush.bf16.msra.mxu0 %v2852_v47  ;;  %v2860_v59 = vor.u32 %v3511_v51, %v2859_v53  ;;  %v3033_v53 = vld [vmem:[#allocation8 + $0xa8] sm:$0xf] }
 0x18c   :  { %v2848_v29 = vmul.f32 -1.442695, %v869_v0 }
 0x18d   :  { %1112 = vmatpush.bf16.msra.mxu2 %v2860_v59  ;;  %v3041_v59 = vld [vmem:[#allocation8 + $0xb0] sm:$0xf] }
 0x18e   :  { %v3677_v12 = vpop.eup %3676  ;;  %3678 = vpow2.f32 %v2848_v29  ;;  %1099 = vmatpush.bf16.msra.mxu1 %v2856_v56  ;;  %v3554_v56 = vld [vmem:[#allocation8 + $0xac] sm:$0xf] }
 0x18f   :  { %v853_v18 = vadd.f32 1.0, %v3677_v12  ;;  %v834_v21 = vpop.f32.mrf.mxu2  ;;  %v846_v12 = vadd.f32 %v4081_v58, %v678_v37  ;;  %v3552_v37 = vld [vmem:[#allocation8 + $0x98] sm:$0xf0] }
 0x190   :  { %v847_v36 = vpop.f32.mrf.mxu3 }
 0x191   :  { %3680 = vrcp.f32 %v853_v18  ;;  %v865_v2 = vand.u32 2147483648, %v853_v18  ;;  %v863_v1 = vand.u32 2147483647, %v853_v18  ;;  %vm859_vm15 = vweird.f32 %v853_v18 }
 0x193   :  { %v866_v9 = vor.u32 1.1754944e-38, %v865_v2  ;;  %vm864_vm1 = vcmp.eq.f32.partialorder %v863_v1, 8.507059e+37  ;;  %v3551_v2 = vld [vmem:[#allocation8 + $0x94] sm:$0xf]  ;;  %v3023_v1 = vld [vmem:[#allocation8 + $0x9c] sm:$0xf0] }
 0x194   :  { %v3679_v24 = vpop.eup %3678 }
 0x195   :  { %v873_v55 = vadd.f32 1.0, %v3679_v24  ;;  %v3555_v24 = vld [vmem:[#allocation8 + $0xb0] sm:$0xf0] }
 0x196   :  { %v3034_v51 = vor.u32 %v3555_v24, %v3033_v53 }
 0x197   :  { %v3681_v63 = vpop.eup %3680  ;;  %3682 = vrcp.f32 %v873_v55  ;;  %v885_v17 = vand.u32 2147483648, %v873_v55  ;;  %v883_v22 = vand.u32 2147483647, %v873_v55  ;;  %vm879_vm4 = vweird.f32 %v873_v55 }
 0x198   :  { %v855_v50 = vmul.f32 %v3681_v63, %v853_v18  ;;  %vm860_vm14 = vweird.f32 %v3681_v63  ;;  %1348 = vmatpush.bf16.msrb.mxu3 %v3034_v51 }
 0x199   :  { %vm861_vm0 = vmor %vm859_vm15, %vm860_vm14  ;;  %v886_v36 = vor.u32 1.1754944e-38, %v885_v17  ;;  %vm884_vm6 = vcmp.eq.f32.partialorder %v883_v22, 8.507059e+37  ;;  %v3011_v17 = vld [vmem:[#allocation8 + $0x84] sm:$0xf0]  ;;  %v3550_v22 = vld [vmem:[#allocation8 + $0x88] sm:$0xf0] }
 0x19a   :  { %v856_v0 = vsub.f32 1.0, %v855_v50  ;;  %v3042_v50 = vor.u32 %v3556_v62, %v3041_v59  ;;  %v3543_v62 = vld [vmem:[#allocation8 + $0x50] sm:$0xf0] }
 0x19c   :  { %v857_v3 = vmul.f32 %v3681_v63, %v856_v0  ;;  %1374 = vmatpush.bf16.msrb.mxu1 %v3042_v50  ;;  %v3021_v0 = vld [vmem:[#allocation8 + $0x90] sm:$0xf]  ;;  %v2987_v50 = vld [vmem:[#allocation8 + $0x54] sm:$0xf0] }
 0x19d   :  { %v3683_v7 = vpop.eup %3682 }
 0x19e   :  { %v875_v13 = vmul.f32 %v3683_v7, %v873_v55  ;;  %v858_v29 = vadd.f32 %v3681_v63, %v857_v3  ;;  %vm880_vm3 = vweird.f32 %v3683_v7  ;;  %v3035_v55 = vld [vmem:[#allocation8 + $0xb4] sm:$0xf0]  ;;  %v3022_v3 = vor.u32 %v3552_v37, %v3021_v0 }
 0x19f   :  { %vm881_vm5 = vmor %vm879_vm4, %vm880_vm3 }
 0x1a0   :  { %v876_v11 = vsub.f32 1.0, %v875_v13  ;;  %v862_v14 = vsel %vm861_vm0, %v3681_v63, %v858_v29  ;;  %v3038_v63 = vor.u32 %v3554_v56, %v3035_v55  ;;  %v3026_v13 = vor.u32 %v3551_v2, %v3023_v1  ;;  %1349 = vmatpush.bf16.msrb.mxu3 %v3022_v3  ;;  %v2993_v3 = vld [vmem:[#allocation8 + $0x50] sm:$0xf]  ;;  %v3544_v1 = vld [vmem:[#allocation8 + $0x58] sm:$0xf0] }
 0x1a1   :  { %v867_v15 = vsel %vm864_vm1, %v866_v9, %v862_v14  ;;  %v3549_v14 = vld [vmem:[#allocation8 + $0x80] sm:$0xf0] }
 0x1a2   :  { %v877_v52 = vmul.f32 %v3683_v7, %v876_v11  ;;  %v889_v21 = vmul.f32 %v867_v15, %v846_v12  ;;  %1361 = vmatpush.bf16.msrb.mxu0 %v3038_v63  ;;  %v3009_v12 = vld [vmem:[#allocation8 + $0x78] sm:$0xf]  ;;  %v3548_v15 = vld [vmem:[#allocation8 + $0x7c] sm:$0xf]  ;;  %v3542_v63 = vld [vmem:[#allocation8 + $0x4c] sm:$0xf] }
 0x1a3   :  { %v2990_v2 = vor.u32 %v3542_v63, %v2987_v50 }
 0x1a4   :  { %v878_v26 = vadd.f32 %v3683_v7, %v877_v52  ;;  %v890_v18 = vadd.f32 %v889_v21, %v4009_v54  ;;  %v3010_v52 = vor.u32 %v3549_v14, %v3009_v12  ;;  %v3017_v21 = vld [vmem:[#allocation8 + $0x80] sm:$0xf]  ;;  %v2981_v14 = vld [vmem:[#allocation8 + $0x38] sm:$0xf] }
 0x1a5   :  { %v2975_v12 = vld [vmem:[#allocation8 + $0x3c] sm:$0xf0] }
 0x1a6   :  { %v882_v38 = vsel %vm881_vm5, %v3683_v7, %v878_v26  ;;  %3684 = vtanh.f32 %v890_v18  ;;  %v3553_v7 = vld [vmem:[#allocation8 + $0xa0] sm:$0xf0]  ;;  %1362 = vmatpush.bf16.msrb.mxu0 %v3026_v13  ;;  %v3014_v26 = vor.u32 %v3548_v15, %v3011_v17  ;;  %v3018_v18 = vor.u32 %v3550_v22, %v3017_v21  ;;  %1350 = vmatpush.bf16.msrb.mxu3 %v3010_v52  ;;  %v2973_v13 = vld [vmem:[#allocation8 + $0x30] sm:$0xf]  ;;  %v2961_v22 = vld [vmem:[#allocation8 + $0x18] sm:$0xf] }
 0x1a7   :  { %v887_v58 = vsel %vm884_vm6, %v886_v36, %v882_v38  ;;  %v3030_v29 = vor.u32 %v3553_v7, %v3029_v6  ;;  %v301_v38 = vadd.f32 %v4057_v19, %v3996_v16  ;;  %v2985_v19 = vld [vmem:[#allocation8 + $0x48] sm:$0xf]  ;;  %v2994_v7 = vor.u32 %v3544_v1, %v2993_v3  ;;  %v3541_v15 = vld [vmem:[#allocation8 + $0x40] sm:$0xf0] }
 0x1a8   :  { %v892_v39 = vsub.f32 1.0, %v887_v58  ;;  %v894_v43 = vmul.f32 %v887_v58, %v4048_v23  ;;  %v2986_v37 = vor.u32 %v3543_v62, %v2985_v19  ;;  %v2982_v17 = vor.u32 %v3541_v15, %v2981_v14 }
 0x1a9   :  { %1375 = vmatpush.bf16.msrb.mxu1 %v3030_v29  ;;  %v3540_v29 = vld [vmem:[#allocation8 + $0x38] sm:$0xf0] }
 0x1aa   :  { %1363 = vmatpush.bf16.msrb.mxu0 %v3014_v26  ;;  %v3537_v26 = vld [vmem:[#allocation8 + $0x20] sm:$0xf0] }
 0x1ac   :  { %v3685_v30 = vpop.eup %3684 }
 0x1ad   :  { %v893_v41 = vmul.f32 %v3685_v30, %v892_v39  ;;  %1376 = vmatpush.bf16.msrb.mxu1 %v3018_v18  ;;  %v2997_v30 = vld [vmem:[#allocation8 + $0x60] sm:$0xf]  ;;  %v3536_v18 = vld [vmem:[#allocation8 + $0x1c] sm:$0xf] }
 0x1af   :  { %v895_v46 = vadd.f32 %v894_v43, %v893_v41  ;;  %v3546_v41 = vld [vmem:[#allocation8 + $0x68] sm:$0xf0]  ;;  %v3545_v43 = vld [vmem:[#allocation8 + $0x64] sm:$0xf] }
 0x1b0   :  { %v2998_v45 = vor.u32 %v3546_v41, %v2997_v30 }
 0x1b1   :  { %v902_v47 = vsel %vm901_vm7, %v895_v46, 0.0  ;;  %v4094_v54 = vsel %vm901_vm7, %v895_v46, %v4048_v23  ;;  %v4101_v23 = vld [vmem:[%s4239_s5] sm:$0x7]  ;;  %v2999_v46 = vld [vmem:[#allocation8 + $0x6c] sm:$0xf0] }
 0x1b2   :  { %904 = vst [vmem:[#allocation9 + $0x8] sm:$0xff] %v902_v47  ;;  %v910_v48 = vpack.c.bf16 %v4094_v54, %v4094_v54  ;;  %v945_v9 = vperm.slane %v4101_v23, 0  ;;  %v946_v11 = vperm.slane %v4101_v23, 1  ;;  %v3005_v47 = vld [vmem:[#allocation8 + $0x68] sm:$0xf]  ;;  %v3002_v56 = vor.u32 %v3545_v43, %v2999_v46  ;;  %1351 = vmatpush.bf16.msrb.mxu3 %v2998_v45 }
 0x1b3   :  { %v2969_v43 = vld [vmem:[#allocation8 + $0x20] sm:$0xf]  ;;  %v3538_v45 = vld [vmem:[#allocation8 + $0x28] sm:$0xf0] }
 0x1b4   :  { %1087 = vmatmul.bf16.vlgmr.msra.gmra.mxu0 %v910_v48  ;;  %1100 = vmatmul.bf16.vlgmr.msra.gmra.mxu1 %v910_v48  ;;  %v2949_v46 = vld [vmem:[#allocation8] sm:$0xf] }
 0x1b5   :  { %1113 = vmatmul.bf16.vlgmr.msra.gmra.mxu2 %v910_v48  ;;  %v3547_v48 = vld [vmem:[#allocation8 + $0x70] sm:$0xf0]  ;;  %1364 = vmatpush.bf16.msrb.mxu0 %v3002_v56  ;;  %v2951_v56 = vld [vmem:[#allocation8 + $0xc] sm:$0xf0] }
 0x1b6   :  { %v3006_v51 = vor.u32 %v3547_v48, %v3005_v47  ;;  %1352 = vmatpush.bf16.msrb.mxu3 %v2986_v37  ;;  %v2970_v47 = vor.u32 %v3538_v45, %v2969_v43  ;;  %v3534_v48 = vld [vmem:[#allocation8 + $0x8] sm:$0xf0]  ;;  %v3131_v45 = vld [vmem:[#allocation8 + $0xa8] sm:$0xf] }
 0x1b8   :  { %1377 = vmatpush.bf16.msrb.mxu1 %v3006_v51  ;;  %v2957_v51 = vld [vmem:[#allocation8 + $0x8] sm:$0xf] }
 0x1b9   :  { %1365 = vmatpush.bf16.msrb.mxu0 %v2990_v2 }
 0x1bc   :  { %1378 = vmatpush.bf16.msrb.mxu1 %v2994_v7 }
 0x1c0   :  { %1379 = vmatpush.bf16.msrb.mxu1 %v2982_v17 }
 0x1c4   :  { %1380 = vmatpush.bf16.msrb.mxu1 %v2970_v47  ;;  %v3578_v47 = vld [vmem:[#allocation8 + $0xac] sm:$0xf] }
 0x231   :  { %v1088_v27 = vpop.f32.mrf.mxu0  ;;  %v1101_v36 = vpop.f32.mrf.mxu1 }
 0x232   :  { %v1089_v58 = vadd.f32 %v1088_v27, %v945_v9  ;;  %v1102_v39 = vadd.f32 %v1101_v36, %v946_v11  ;;  %v3539_v9 = vld [vmem:[#allocation8 + $0x34] sm:$0xf]  ;;  %v2974_v11 = vor.u32 %v3540_v29, %v2973_v13 }
 0x233   :  { %v2978_v52 = vor.u32 %v3539_v9, %v2975_v12 }
 0x234   :  { %v1118_v53 = vadd.f32 %v1089_v58, %v3989_v61  ;;  %v1138_v24 = vadd.f32 %v1102_v39, %v301_v38  ;;  %1353 = vmatpush.bf16.msrb.mxu3 %v2974_v11  ;;  %v2962_v38 = vor.u32 %v3537_v26, %v2961_v22  ;;  %v2963_v58 = vld [vmem:[#allocation8 + $0x24] sm:$0xf0] }
 0x235   :  { %1366 = vmatpush.bf16.msrb.mxu0 %v2978_v52  ;;  %v2966_v41 = vor.u32 %v3536_v18, %v2963_v58 }
 0x236   :  { %v2945_v55 = vmul.f32 -1.442695, %v1118_v53  ;;  %v2946_v59 = vmul.f32 -1.442695, %v1138_v24  ;;  %v2950_v53 = vor.u32 %v3534_v48, %v2949_v46  ;;  %v3533_v24 = vld [vmem:[#allocation8 + $0x4] sm:$0xf] }
 0x237   :  { %v3579_v46 = vld [vmem:[#allocation8 + $0xb0] sm:$0xf0] }
 0x238   :  { %3686 = vpow2.f32 %v2945_v55  ;;  %v4108_v0 = vpop.f32.mrf.mxu2  ;;  %1354 = vmatpush.bf16.msrb.mxu3 %v2962_v38  ;;  %v3535_v55 = vld [vmem:[#allocation8 + $0x10] sm:$0xf0]  ;;  %v3132_v48 = vor.u32 %v3579_v46, %v3131_v45 }
 0x239   :  { %3688 = vpow2.f32 %v2946_v59  ;;  %v1090_v61 = vpop.f32.mrf.mxu0  ;;  %v1103_v6 = vpop.f32.mrf.mxu1  ;;  %1367 = vmatpush.bf16.msrb.mxu0 %v2966_v41  ;;  %v2954_v59 = vor.u32 %v3533_v24, %v2951_v56  ;;  %v2958_v19 = vor.u32 %v3535_v55, %v2957_v51  ;;  %v3139_v24 = vld [vmem:[#allocation8 + $0xb0] sm:$0xf] }
 0x23a   :  { %v947_v61 = vperm.slane %v4101_v23, 2  ;;  %1617 = vmatpush.bf16.msrb.mxu2 %v3132_v48 }
 0x23b   :  { %1381 = vmatpush.bf16.msrb.mxu1 %v2958_v19  ;;  %v3576_v19 = vld [vmem:[#allocation8 + $0x98] sm:$0xf0] }
 0x23c   :  { %1355 = vmatpush.bf16.msrb.mxu3 %v2950_v53  ;;  %v1115_v11 = vadd.f32 %v4108_v0, %v947_v61  ;;  %v1169_v0 = vpop.permute.xlu1 %1168  ;;  %v3133_v53 = vld [vmem:[#allocation8 + $0xb4] sm:$0xf0] }
 0x23d   :  { %1368 = vmatpush.bf16.msrb.mxu0 %v2954_v59  ;;  %vm1170_vm0 = vcmp.eq.s32.totalorder %v1169_v0, 1  ;;  %v3136_v51 = vor.u32 %v3578_v47, %v3133_v53  ;;  %v3119_v59 = vld [vmem:[#allocation8 + $0x90] sm:$0xf]  ;;  %v3569_v0 = vld [vmem:[#allocation8 + $0x64] sm:$0xf] }
 0x23e   :  { %v3687_v21 = vpop.eup %3686  ;;  %v3083_v53 = vld [vmem:[#allocation8 + $0x48] sm:$0xf] }
 0x23f   :  { %v3689_v27 = vpop.eup %3688  ;;  %v1122_v36 = vadd.f32 1.0, %v3687_v21 }
 0x240   :  { %v1142_v39 = vadd.f32 1.0, %v3689_v27  ;;  %v1116_v30 = vpop.f32.mrf.mxu2  ;;  %1630 = vmatpush.bf16.msra.mxu3 %v3136_v51  ;;  %v3085_v51 = vld [vmem:[#allocation8 + $0x54] sm:$0xf0] }
 0x241   :  { %3690 = vrcp.f32 %v1122_v36  ;;  %v1134_v3 = vand.u32 2147483648, %v1122_v36  ;;  %v1132_v7 = vand.u32 2147483647, %v1122_v36  ;;  %vm1128_vm9 = vweird.f32 %v1122_v36 }
 0x242   :  { %3692 = vrcp.f32 %v1142_v39  ;;  %v1154_v17 = vand.u32 2147483648, %v1142_v39  ;;  %vm1148_vm13 = vweird.f32 %v1142_v39  ;;  %v1152_v21 = vand.u32 2147483647, %v1142_v39 }
 0x243   :  { %v1135_v9 = vor.u32 1.1754944e-38, %v1134_v3  ;;  %vm1133_vm11 = vcmp.eq.f32.partialorder %v1132_v7, 8.507059e+37  ;;  %v3577_v3 = vld [vmem:[#allocation8 + $0xa0] sm:$0xf0] }
 0x244   :  { %v1155_v26 = vor.u32 1.1754944e-38, %v1154_v17  ;;  %vm1153_vm15 = vcmp.eq.f32.partialorder %v1152_v21, 8.507059e+37  ;;  %v3115_v17 = vld [vmem:[#allocation8 + $0x80] sm:$0xf]  ;;  %v3574_v21 = vld [vmem:[#allocation8 + $0x88] sm:$0xf0] }
 0x247   :  { %v3691_v62 = vpop.eup %3690 }
 0x248   :  { %v3693_v63 = vpop.eup %3692  ;;  %v1124_v50 = vmul.f32 %v3691_v62, %v1122_v36  ;;  %vm1129_vm8 = vweird.f32 %v3691_v62 }
 0x249   :  { %v1144_v37 = vmul.f32 %v3693_v63, %v1142_v39  ;;  %vm1130_vm10 = vmor %vm1128_vm9, %vm1129_vm8  ;;  %vm1149_vm12 = vweird.f32 %v3693_v63  ;;  %v4122_v39 = vld [vmem:[%s4239_s5] sm:$0x7] }
 0x24a   :  { %v1125_v2 = vsub.f32 1.0, %v1124_v50  ;;  %vm1150_vm14 = vmor %vm1148_vm13, %vm1149_vm12  ;;  %v1215_v56 = vperm.slane %v4122_v39, 1  ;;  %v3120_v50 = vor.u32 %v3576_v19, %v3119_v59  ;;  %v3568_v59 = vld [vmem:[#allocation8 + $0x58] sm:$0xf0] }
 0x24b   :  { %v1145_v1 = vsub.f32 1.0, %v1144_v37  ;;  %v3121_v37 = vld [vmem:[#allocation8 + $0x9c] sm:$0xf0] }
 0x24c   :  { %v1126_v6 = vmul.f32 %v3691_v62, %v1125_v2  ;;  %v3127_v2 = vld [vmem:[#allocation8 + $0x98] sm:$0xf]  ;;  %1618 = vmatpush.bf16.msrb.mxu2 %v3120_v50  ;;  %v3071_v50 = vld [vmem:[#allocation8 + $0x30] sm:$0xf] }
 0x24d   :  { %v1146_v13 = vmul.f32 %v3693_v63, %v1145_v1  ;;  %v303_v1 = vadd.f32 %v4059_v33, %v3996_v16 }
 0x24e   :  { %v1127_v29 = vadd.f32 %v3691_v62, %v1126_v6 }
 0x24f   :  { %v1147_v15 = vadd.f32 %v3693_v63, %v1146_v13  ;;  %v3128_v13 = vor.u32 %v3577_v3, %v3127_v2  ;;  %v3563_v2 = vld [vmem:[#allocation8 + $0x34] sm:$0xf]  ;;  %v3079_v3 = vld [vmem:[#allocation8 + $0x38] sm:$0xf] }
 0x250   :  { %v1131_v12 = vsel %vm1130_vm10, %v3691_v62, %v1127_v29  ;;  %v3575_v62 = vld [vmem:[#allocation8 + $0x94] sm:$0xf]  ;;  %v1214_v29 = vperm.slane %v4122_v39, 0 }
 0x251   :  { %v1136_v14 = vsel %vm1133_vm11, %v1135_v9, %v1131_v12  ;;  %v1151_v22 = vsel %vm1150_vm14, %v3693_v63, %v1147_v15  ;;  %v3124_v7 = vor.u32 %v3575_v62, %v3121_v37  ;;  %v3573_v12 = vld [vmem:[#allocation8 + $0x80] sm:$0xf0]  ;;  %v3564_v37 = vld [vmem:[#allocation8 + $0x38] sm:$0xf0] }
 0x252   :  { %v1158_v52 = vmul.f32 %v1136_v14, %v1115_v11  ;;  %v1156_v18 = vsel %vm1153_vm15, %v1155_v26, %v1151_v22  ;;  %v3107_v11 = vld [vmem:[#allocation8 + $0x78] sm:$0xf]  ;;  %v3572_v14 = vld [vmem:[#allocation8 + $0x7c] sm:$0xf]  ;;  %v3116_v22 = vor.u32 %v3574_v21, %v3115_v17  ;;  %v3067_v17 = vld [vmem:[#allocation8 + $0x20] sm:$0xf] }
 0x253   :  { %v1161_v27 = vsub.f32 1.0, %v1156_v18  ;;  %v1163_v58 = vmul.f32 %v1156_v18, %v4094_v54  ;;  %1631 = vmatpush.bf16.msra.mxu3 %v3124_v7  ;;  %v3108_v15 = vor.u32 %v3573_v12, %v3107_v11  ;;  %v3059_v12 = vld [vmem:[#allocation8 + $0x18] sm:$0xf]  ;;  %v3562_v21 = vld [vmem:[#allocation8 + $0x28] sm:$0xf0] }
 0x254   :  { %v1159_v23 = vadd.f32 %v1158_v52, %v4023_v42  ;;  %v3109_v52 = vld [vmem:[#allocation8 + $0x84] sm:$0xf0] }
 0x255   :  { %v3112_v33 = vor.u32 %v3572_v14, %v3109_v52  ;;  %1619 = vmatpush.bf16.msrb.mxu2 %v3108_v15  ;;  %v3561_v14 = vld [vmem:[#allocation8 + $0x20] sm:$0xf0]  ;;  %v3560_v15 = vld [vmem:[#allocation8 + $0x1c] sm:$0xf]  ;;  %v3061_v52 = vld [vmem:[#allocation8 + $0x24] sm:$0xf0] }
 0x256   :  { %3694 = vtanh.f32 %v1159_v23 }
 0x257   :  { %1632 = vmatpush.bf16.msra.mxu3 %v3112_v33  ;;  %v3047_v33 = vld [vmem:[#allocation8] sm:$0xf] }
 0x25c   :  { %v3695_v36 = vpop.eup %3694 }
 0x25d   :  { %v1162_v38 = vmul.f32 %v3695_v36, %v1161_v27  ;;  %v3095_v27 = vld [vmem:[#allocation8 + $0x60] sm:$0xf]  ;;  %v3570_v36 = vld [vmem:[#allocation8 + $0x68] sm:$0xf0] }
 0x25f   :  { %v1164_v30 = vadd.f32 %v1163_v58, %v1162_v38  ;;  %v3096_v58 = vor.u32 %v3570_v36, %v3095_v27  ;;  %v3558_v27 = vld [vmem:[#allocation8 + $0x8] sm:$0xf0]  ;;  %v3557_v36 = vld [vmem:[#allocation8 + $0x4] sm:$0xf] }
 0x261   :  { %v1171_v41 = vsel %vm1170_vm0, %v1164_v30, 0.0  ;;  %v4115_v43 = vsel %vm1170_vm0, %v1164_v30, %v4094_v54  ;;  %v3580_v54 = vld [vmem:[#allocation8 + $0xb8] sm:$0xf0]  ;;  %v3097_v30 = vld [vmem:[#allocation8 + $0x6c] sm:$0xf0]  ;;  %1620 = vmatpush.bf16.msrb.mxu2 %v3096_v58 }
 0x262   :  { %1173 = vst [vmem:[#allocation9 + $0x10] sm:$0xff] %v1171_v41  ;;  %v1179_v42 = vpack.c.bf16 %v4115_v43, %v4115_v43  ;;  %v3140_v55 = vor.u32 %v3580_v54, %v3139_v24  ;;  %v3103_v41 = vld [vmem:[#allocation8 + $0x68] sm:$0xf]  ;;  %v3100_v47 = vor.u32 %v3569_v0, %v3097_v30  ;;  %v3567_v24 = vld [vmem:[#allocation8 + $0x50] sm:$0xf0] }
 0x263   :  { %v3566_v54 = vld [vmem:[#allocation8 + $0x4c] sm:$0xf]  ;;  %v3049_v0 = vld [vmem:[#allocation8 + $0xc] sm:$0xf0]  ;;  %v3055_v58 = vld [vmem:[#allocation8 + $0x8] sm:$0xf] }
 0x264   :  { %1356 = vmatmul.bf16.vlgmr.msrb.gmra.mxu3 %v1179_v42  ;;  %1369 = vmatmul.bf16.vlgmr.msrb.gmra.mxu0 %v1179_v42  ;;  %v3088_v62 = vor.u32 %v3566_v54, %v3085_v51  ;;  %v3559_v30 = vld [vmem:[#allocation8 + $0x10] sm:$0xf0] }
 0x265   :  { %1382 = vmatmul.bf16.vlgmr.msrb.gmra.mxu1 %v1179_v42  ;;  %1643 = vmatpush.bf16.msra.mxu0 %v3140_v55  ;;  %v3571_v42 = vld [vmem:[#allocation8 + $0x70] sm:$0xf0]  ;;  %v3091_v55 = vld [vmem:[#allocation8 + $0x50] sm:$0xf] }
 0x266   :  { %v3104_v48 = vor.u32 %v3571_v42, %v3103_v41  ;;  %1633 = vmatpush.bf16.msra.mxu3 %v3100_v47  ;;  %v3048_v41 = vor.u32 %v3558_v27, %v3047_v33  ;;  %v3231_v27 = vld [vmem:[#allocation8 + $0xb4] sm:$0xf0] }
 0x269   :  { %1644 = vmatpush.bf16.msra.mxu0 %v3128_v13 }
 0x26a   :  { %1634 = vmatpush.bf16.msra.mxu3 %v3088_v62 }
 0x26d   :  { %1645 = vmatpush.bf16.msra.mxu0 %v3116_v22 }
 0x271   :  { %1646 = vmatpush.bf16.msra.mxu0 %v3104_v48  ;;  %v3746_v48 = vld [vmem:[%s4234_s0] sm:$0xff] }
 0x272   :  { %vm1703_vm1 = vcmp.gt.s32.totalorder %v3746_v48, 4  ;;  %vm1972_vm2 = vcmp.gt.s32.totalorder %v3746_v48, 5  ;;  %v4155_v48 = vld [vmem:[%s4239_s5] sm:$0x7] }
 0x2e1   :  { %v1370_v63 = vpop.f32.mrf.mxu0 }
 0x2e2   :  { %v1371_v61 = vadd.f32 %v1370_v63, %v1215_v56  ;;  %v4127_v6 = vpop.f32.mrf.mxu1  ;;  %v3084_v56 = vor.u32 %v3567_v24, %v3083_v53  ;;  %v3092_v63 = vor.u32 %v3568_v59, %v3091_v55  ;;  %v1704_v53 = vsel %vm1703_vm1, 1, %v3882_v31 }
 0x2e3   :  { %1706 = vperm.xlu2 %3665, %v1704_v53   ;;  %v1216_v55 = vperm.slane %v4122_v39, 2 }
 0x2e4   :  { %v1407_v9 = vadd.f32 %v1371_v61, %v303_v1  ;;  %v3565_v61 = vld [vmem:[#allocation8 + $0x40] sm:$0xf0]  ;;  %1621 = vmatpush.bf16.msrb.mxu2 %v3084_v56  ;;  %1647 = vmatpush.bf16.msra.mxu0 %v3092_v63  ;;  %v1973_v63 = vsel %vm1972_vm2, 1, %v3882_v31 }
 0x2e5   :  { %v3080_v11 = vor.u32 %v3565_v61, %v3079_v3 }
 0x2e6   :  { %v3044_v23 = vmul.f32 -1.442695, %v1407_v9 }
 0x2e7   :  { %v1357_v26 = vpop.f32.mrf.mxu3 }
 0x2e8   :  { %3696 = vpow2.f32 %v3044_v23  ;;  %v1358_v18 = vadd.f32 %v1357_v26, %v1214_v29  ;;  %v3072_v29 = vor.u32 %v3564_v37, %v3071_v50  ;;  %v3060_v23 = vor.u32 %v3561_v14, %v3059_v12  ;;  %1648 = vmatpush.bf16.msra.mxu0 %v3080_v11 }
 0x2e9   :  { %v1372_v38 = vpop.f32.mrf.mxu0  ;;  %v3064_v26 = vor.u32 %v3560_v15, %v3061_v52 }
 0x2ea   :  { %v1387_v45 = vadd.f32 %v1358_v18, %v3992_v5  ;;  %v1385_v46 = vpop.f32.mrf.mxu1  ;;  %v3073_v5 = vld [vmem:[#allocation8 + $0x3c] sm:$0xf0]  ;;  %1622 = vmatpush.bf16.msrb.mxu2 %v3072_v29  ;;  %v3068_v18 = vor.u32 %v3562_v21, %v3067_v17  ;;  %v1438_v17 = vpop.permute.xlu1 %1437 }
 0x2eb   :  { %v3076_v9 = vor.u32 %v3563_v2, %v3073_v5  ;;  %v3056_v46 = vor.u32 %v3559_v30, %v3055_v58  ;;  %1975 = vperm.xlu2 %3665, %v1973_v63   ;;  %v1384_v5 = vadd.f32 %v4127_v6, %v1216_v55  ;;  %vm1439_vm11 = vcmp.eq.s32.totalorder %v1438_v17, 1  ;;  %v3600_v30 = vld [vmem:[#allocation8 + $0x98] sm:$0xf0]  ;;  %v3205_v55 = vld [vmem:[#allocation8 + $0x78] sm:$0xf] }
 0x2ec   :  { %v3043_v19 = vmul.f32 -1.442695, %v1387_v45  ;;  %1649 = vmatpush.bf16.msra.mxu0 %v3068_v18  ;;  %v3052_v45 = vor.u32 %v3557_v36, %v3049_v0  ;;  %v3237_v36 = vld [vmem:[#allocation8 + $0xb0] sm:$0xf]  ;;  %v3604_v0 = vld [vmem:[#allocation8 + $0xb8] sm:$0xf0] }
 0x2ed   :  { %1635 = vmatpush.bf16.msra.mxu3 %v3076_v9  ;;  %v3238_v58 = vor.u32 %v3604_v0, %v3237_v36  ;;  %v3207_v63 = vld [vmem:[#allocation8 + $0x84] sm:$0xf0]  ;;  %v3591_v17 = vld [vmem:[#allocation8 + $0x50] sm:$0xf0] }
 0x2ee   :  { %v3697_v1 = vpop.eup %3696  ;;  %3698 = vpow2.f32 %v3043_v19  ;;  %1623 = vmatpush.bf16.msrb.mxu2 %v3060_v23 }
 0x2ef   :  { %v4131_v7 = vadd.f32 1.0, %v3697_v1  ;;  %v1359_v13 = vpop.f32.mrf.mxu3 }
 0x2f0   :  { %1650 = vmatpush.bf16.msra.mxu0 %v3056_v46  ;;  %v3225_v46 = vld [vmem:[#allocation8 + $0x98] sm:$0xf] }
 0x2f1   :  { %3700 = vrcp.f32 %v4131_v7  ;;  %1636 = vmatpush.bf16.msra.mxu3 %v3064_v26  ;;  %v1423_v39 = vand.u32 2147483648, %v4131_v7  ;;  %vm1417_vm8 = vweird.f32 %v4131_v7  ;;  %v1421_v31 = vand.u32 2147483647, %v4131_v7  ;;  %v3602_v26 = vld [vmem:[#allocation8 + $0xac] sm:$0xf] }
 0x2f2   :  { %1624 = vmatpush.bf16.msrb.mxu2 %v3048_v41  ;;  %v3599_v41 = vld [vmem:[#allocation8 + $0x94] sm:$0xf] }
 0x2f3   :  { %v1424_v11 = vor.u32 1.1754944e-38, %v1423_v39  ;;  %vm1422_vm10 = vcmp.eq.f32.partialorder %v1421_v31, 8.507059e+37  ;;  %v306_v39 = vadd.f32 %v4061_v34, %v3996_v16 }
 0x2f4   :  { %v3699_v22 = vpop.eup %3698 }
 0x2f5   :  { %v1391_v38 = vadd.f32 1.0, %v3699_v22  ;;  %1637 = vmatpush.bf16.msra.mxu3 %v3052_v45  ;;  %v3603_v22 = vld [vmem:[#allocation8 + $0xb0] sm:$0xf0]  ;;  %v3219_v45 = vld [vmem:[#allocation8 + $0x9c] sm:$0xf0] }
 0x2f7   :  { %3702 = vrcp.f32 %v1391_v38  ;;  %v3701_v42 = vpop.eup %3700  ;;  %v1403_v59 = vand.u32 2147483648, %v1391_v38  ;;  %v1401_v62 = vand.u32 2147483647, %v1391_v38  ;;  %vm1397_vm4 = vweird.f32 %v1391_v38 }
 0x2f8   :  { %v1413_v47 = vmul.f32 %v3701_v42, %v4131_v7  ;;  %vm1418_vm7 = vweird.f32 %v3701_v42  ;;  %v3229_v7 = vld [vmem:[#allocation8 + $0xa8] sm:$0xf] }
 0x2f9   :  { %v1404_v2 = vor.u32 1.1754944e-38, %v1403_v59  ;;  %vm1402_vm6 = vcmp.eq.f32.partialorder %v1401_v62, 8.507059e+37  ;;  %vm1419_vm9 = vmor %vm1417_vm8, %vm1418_vm7  ;;  %v3230_v18 = vor.u32 %v3603_v22, %v3229_v7  ;;  %1912 = vmatpush.bf16.msrb.mxu3 %v3238_v58  ;;  %v3597_v59 = vld [vmem:[#allocation8 + $0x80] sm:$0xf0]  ;;  %v3189_v7 = vld [vmem:[#allocation8 + $0x50] sm:$0xf] }
 0x2fa   :  { %v1414_v56 = vsub.f32 1.0, %v1413_v47  ;;  %v3601_v47 = vld [vmem:[#allocation8 + $0xa0] sm:$0xf0]  ;;  %v3206_v62 = vor.u32 %v3597_v59, %v3205_v55  ;;  %v3592_v22 = vld [vmem:[#allocation8 + $0x58] sm:$0xf0] }
 0x2fb   :  { %1886 = vmatpush.bf16.msra.mxu1 %v3230_v18  ;;  %v3190_v58 = vor.u32 %v3592_v22, %v3189_v7  ;;  %v3157_v55 = vld [vmem:[#allocation8 + $0x18] sm:$0xf]  ;;  %v3585_v59 = vld [vmem:[#allocation8 + $0x20] sm:$0xf0]  ;;  %v1485_v22 = vperm.slane %v4155_v48, 2 }
 0x2fc   :  { %v1415_v50 = vmul.f32 %v3701_v42, %v1414_v56  ;;  %v1483_v56 = vperm.slane %v4155_v48, 0 }
 0x2fd   :  { %v3703_v24 = vpop.eup %3702 }
 0x2fe   :  { %v1393_v54 = vmul.f32 %v3703_v24, %v1391_v38  ;;  %vm1398_vm3 = vweird.f32 %v3703_v24  ;;  %v1416_v1 = vadd.f32 %v3701_v42, %v1415_v50  ;;  %v3234_v38 = vor.u32 %v3602_v26, %v3231_v27  ;;  %v3213_v50 = vld [vmem:[#allocation8 + $0x80] sm:$0xf] }
 0x2ff   :  { %vm1399_vm5 = vmor %vm1397_vm4, %vm1398_vm3 }
 0x300   :  { %v1394_v51 = vsub.f32 1.0, %v1393_v54  ;;  %v1420_v9 = vsel %vm1419_vm9, %v3701_v42, %v1416_v1  ;;  %1899 = vmatpush.bf16.msra.mxu2 %v3234_v38  ;;  %v3226_v54 = vor.u32 %v3601_v47, %v3225_v46  ;;  %v3594_v1 = vld [vmem:[#allocation8 + $0x68] sm:$0xf0]  ;;  %v3171_v46 = vld [vmem:[#allocation8 + $0x3c] sm:$0xf0] }
 0x301   :  { %v1425_v6 = vsel %vm1422_vm10, %v1424_v11, %v1420_v9  ;;  %v3195_v9 = vld [vmem:[#allocation8 + $0x6c] sm:$0xf0]  ;;  %v3201_v11 = vld [vmem:[#allocation8 + $0x68] sm:$0xf]  ;;  %v3177_v47 = vld [vmem:[#allocation8 + $0x38] sm:$0xf] }
 0x302   :  { %v1395_v19 = vmul.f32 %v3703_v24, %v1394_v51  ;;  %v1430_v12 = vsub.f32 1.0, %v1425_v6  ;;  %v1432_v52 = vmul.f32 %v1425_v6, %v4115_v43  ;;  %v1484_v51 = vperm.slane %v4155_v48, 1  ;;  %1913 = vmatpush.bf16.msrb.mxu3 %v3226_v54  ;;  %v3595_v6 = vld [vmem:[#allocation8 + $0x70] sm:$0xf0] }
 0x304   :  { %v1396_v37 = vadd.f32 %v3703_v24, %v1395_v19  ;;  %v3596_v19 = vld [vmem:[#allocation8 + $0x7c] sm:$0xf] }
 0x306   :  { %v1400_v3 = vsel %vm1399_vm5, %v3703_v24, %v1396_v37  ;;  %v3222_v24 = vor.u32 %v3599_v41, %v3219_v45  ;;  %v3598_v37 = vld [vmem:[#allocation8 + $0x88] sm:$0xf0]  ;;  %v3169_v41 = vld [vmem:[#allocation8 + $0x30] sm:$0xf] }
 0x307   :  { %v1405_v61 = vsel %vm1402_vm6, %v1404_v2, %v1400_v3  ;;  %v3210_v2 = vor.u32 %v3596_v19, %v3207_v63  ;;  %v3193_v3 = vld [vmem:[#allocation8 + $0x60] sm:$0xf]  ;;  %v3584_v19 = vld [vmem:[#allocation8 + $0x1c] sm:$0xf] }
 0x308   :  { %v1427_v13 = vmul.f32 %v1405_v61, %v1384_v5  ;;  %1900 = vmatpush.bf16.msra.mxu2 %v3222_v24  ;;  %v3214_v5 = vor.u32 %v3598_v37, %v3213_v50  ;;  %v3593_v61 = vld [vmem:[#allocation8 + $0x64] sm:$0xf]  ;;  %v3158_v50 = vor.u32 %v3585_v59, %v3157_v55  ;;  %v3159_v37 = vld [vmem:[#allocation8 + $0x24] sm:$0xf0] }
 0x309   :  { %v3589_v24 = vld [vmem:[#allocation8 + $0x40] sm:$0xf0] }
 0x30a   :  { %v1428_v29 = vadd.f32 %v1427_v13, %v4036_v57  ;;  %1914 = vmatpush.bf16.msrb.mxu3 %v3214_v5  ;;  %v3162_v5 = vor.u32 %v3584_v19, %v3159_v37  ;;  %v3327_v19 = vld [vmem:[#allocation8 + $0xa8] sm:$0xf]  ;;  %v3329_v37 = vld [vmem:[#allocation8 + $0xb4] sm:$0xf0] }
 0x30c   :  { %3704 = vtanh.f32 %v1428_v29  ;;  %v3194_v29 = vor.u32 %v3594_v1, %v3193_v3  ;;  %1901 = vmatpush.bf16.msra.mxu2 %v3210_v2  ;;  %v3165_v3 = vld [vmem:[#allocation8 + $0x20] sm:$0xf]  ;;  %v3586_v1 = vld [vmem:[#allocation8 + $0x28] sm:$0xf0] }
 0x312   :  { %v3705_v14 = vpop.eup %3704 }
 0x313   :  { %v1431_v15 = vmul.f32 %v3705_v14, %v1430_v12 }
 0x315   :  { %v1433_v21 = vadd.f32 %v1432_v52, %v1431_v15  ;;  %v3198_v15 = vor.u32 %v3593_v61, %v3195_v9  ;;  %v3181_v52 = vld [vmem:[#allocation8 + $0x48] sm:$0xf]  ;;  %v3145_v61 = vld [vmem:[#allocation8] sm:$0xf]  ;;  %v3147_v9 = vld [vmem:[#allocation8 + $0xc] sm:$0xf0] }
 0x316   :  { %v3182_v27 = vor.u32 %v3591_v17, %v3181_v52 }
 0x317   :  { %v1440_v23 = vsel %vm1439_vm11, %v1433_v21, 0.0  ;;  %v4148_v33 = vsel %vm1439_vm11, %v1433_v21, %v4115_v43  ;;  %v3217_v43 = vld [vmem:[#allocation8 + $0x90] sm:$0xf]  ;;  %v3590_v21 = vld [vmem:[#allocation8 + $0x4c] sm:$0xf]  ;;  %1902 = vmatpush.bf16.msra.mxu2 %v3198_v15 }
 0x318   :  { %1442 = vst [vmem:[#allocation9 + $0x18] sm:$0xff] %v1440_v23  ;;  %v1448_v57 = vpack.c.bf16 %v4148_v33, %v4148_v33  ;;  %v3218_v42 = vor.u32 %v3600_v30, %v3217_v43  ;;  %v3202_v23 = vor.u32 %v3595_v6, %v3201_v11  ;;  %v3153_v6 = vld [vmem:[#allocation8 + $0x8] sm:$0xf] }
 0x31a   :  { %1625 = vmatmul.bf16.vlgmr.msrb.gmra.mxu2 %v1448_v57  ;;  %1638 = vmatmul.bf16.vlgmr.msra.gmra.mxu3 %v1448_v57 }
 0x31b   :  { %1651 = vmatmul.bf16.vlgmr.msra.gmra.mxu0 %v1448_v57  ;;  %1887 = vmatpush.bf16.msra.mxu1 %v3218_v42  ;;  %v3183_v57 = vld [vmem:[#allocation8 + $0x54] sm:$0xf0]  ;;  %v3588_v42 = vld [vmem:[#allocation8 + $0x38] sm:$0xf0] }
 0x31c   :  { %1915 = vmatpush.bf16.msrb.mxu3 %v3202_v23  ;;  %v3186_v38 = vor.u32 %v3590_v21, %v3183_v57  ;;  %v3170_v45 = vor.u32 %v3588_v42, %v3169_v41 }
 0x31e   :  { %1903 = vmatpush.bf16.msra.mxu2 %v3186_v38 }
 0x31f   :  { %1888 = vmatpush.bf16.msra.mxu1 %v3206_v62 }
 0x320   :  { %1916 = vmatpush.bf16.msrb.mxu3 %v3190_v58 }
 0x323   :  { %1889 = vmatpush.bf16.msra.mxu1 %v3194_v29  ;;  %v3581_v29 = vld [vmem:[#allocation8 + $0x4] sm:$0xf] }
 0x324   :  { %v3150_v11 = vor.u32 %v3581_v29, %v3147_v9  ;;  %v3317_v29 = vld [vmem:[#allocation8 + $0x9c] sm:$0xf0]  ;;  %v3323_v9 = vld [vmem:[#allocation8 + $0x98] sm:$0xf] }
 0x327   :  { %1890 = vmatpush.bf16.msra.mxu1 %v3182_v27 }
 0x32b   :  { %1891 = vmatpush.bf16.msra.mxu1 %v3170_v45 }
 0x32f   :  { %1892 = vmatpush.bf16.msra.mxu1 %v3158_v50 }
 0x398   :  { %v4157_v53 = vpop.f32.mrf.mxu0 }
 0x39d   :  { %v1626_v13 = vpop.f32.mrf.mxu2  ;;  %v1639_v31 = vpop.f32.mrf.mxu3 }
 0x39e   :  { %v1627_v12 = vadd.f32 %v1626_v13, %v1483_v56  ;;  %v1640_v14 = vadd.f32 %v1639_v31, %v1484_v51  ;;  %v3178_v56 = vor.u32 %v3589_v24, %v3177_v47  ;;  %v3582_v13 = vld [vmem:[#allocation8 + $0x8] sm:$0xf0] }
 0x39f   :  { %v3146_v31 = vor.u32 %v3582_v13, %v3145_v61  ;;  %v3315_v61 = vld [vmem:[#allocation8 + $0x90] sm:$0xf]  ;;  %v3623_v13 = vld [vmem:[#allocation8 + $0x94] sm:$0xf] }
 0x3a0   :  { %v1656_v34 = vadd.f32 %v1627_v12, %v3999_v32  ;;  %v1676_v26 = vadd.f32 %v1640_v14, %v306_v39  ;;  %v1654_v18 = vpop.f32.mrf.mxu0  ;;  %v3587_v32 = vld [vmem:[#allocation8 + $0x34] sm:$0xf]  ;;  %1917 = vmatpush.bf16.msrb.mxu3 %v3178_v56  ;;  %v3166_v39 = vor.u32 %v3586_v1, %v3165_v3 }
 0x3a1   :  { %v3174_v54 = vor.u32 %v3587_v32, %v3171_v46  ;;  %v3583_v12 = vld [vmem:[#allocation8 + $0x10] sm:$0xf0]  ;;  %1893 = vmatpush.bf16.msra.mxu1 %v3146_v31 }
 0x3a2   :  { %v3141_v36 = vmul.f32 -1.442695, %v1656_v34  ;;  %v3142_v0 = vmul.f32 -1.442695, %v1676_v26  ;;  %v3154_v14 = vor.u32 %v3583_v12, %v3153_v6  ;;  %v3320_v6 = vor.u32 %v3623_v13, %v3317_v29  ;;  %v3613_v13 = vld [vmem:[#allocation8 + $0x40] sm:$0xf0] }
 0x3a3   :  { %1904 = vmatpush.bf16.msra.mxu2 %v3174_v54 }
 0x3a4   :  { %3706 = vpow2.f32 %v3141_v36  ;;  %1918 = vmatpush.bf16.msrb.mxu3 %v3166_v39  ;;  %v3624_v39 = vld [vmem:[#allocation8 + $0x98] sm:$0xf0] }
 0x3a5   :  { %3708 = vpow2.f32 %v3142_v0  ;;  %v1628_v43 = vpop.f32.mrf.mxu2  ;;  %v1641_v30 = vpop.f32.mrf.mxu3  ;;  %v1653_v0 = vadd.f32 %v4157_v53, %v1485_v22  ;;  %v3316_v31 = vor.u32 %v3624_v39, %v3315_v61  ;;  %v3269_v61 = vld [vmem:[#allocation8 + $0x3c] sm:$0xf0]  ;;  %v3275_v39 = vld [vmem:[#allocation8 + $0x38] sm:$0xf] }
 0x3a6   :  { %v1707_v53 = vpop.permute.xlu2 %1706  ;;  %v3276_v29 = vor.u32 %v3613_v13, %v3275_v39 }
 0x3a7   :  { %1905 = vmatpush.bf16.msra.mxu2 %v3162_v5  ;;  %vm1708_vm4 = vcmp.eq.s32.totalorder %v1707_v53, 1  ;;  %v3628_v5 = vld [vmem:[#allocation8 + $0xb8] sm:$0xf0] }
 0x3a8   :  { %1919 = vmatpush.bf16.msrb.mxu3 %v3154_v14 }
 0x3aa   :  { %v3707_v51 = vpop.eup %3706 }
 0x3ab   :  { %v3709_v62 = vpop.eup %3708  ;;  %v1660_v63 = vadd.f32 1.0, %v3707_v51  ;;  %1906 = vmatpush.bf16.msra.mxu2 %v3150_v11  ;;  %v3625_v11 = vld [vmem:[#allocation8 + $0xa0] sm:$0xf0] }
 0x3ac   :  { %v1680_v2 = vadd.f32 1.0, %v3709_v62  ;;  %v3627_v62 = vld [vmem:[#allocation8 + $0xb0] sm:$0xf0]  ;;  %v3324_v12 = vor.u32 %v3625_v11, %v3323_v9  ;;  %v3255_v11 = vld [vmem:[#allocation8 + $0x18] sm:$0xf] }
 0x3ad   :  { %3710 = vrcp.f32 %v1660_v63  ;;  %v1672_v57 = vand.u32 2147483648, %v1660_v63  ;;  %v1670_v26 = vand.u32 2147483647, %v1660_v63  ;;  %vm1666_vm13 = vweird.f32 %v1660_v63 }
 0x3ae   :  { %3712 = vrcp.f32 %v1680_v2  ;;  %v1692_v30 = vand.u32 2147483648, %v1680_v2  ;;  %vm1686_vm1 = vweird.f32 %v1680_v2  ;;  %v1690_v42 = vand.u32 2147483647, %v1680_v2  ;;  %v1976_v13 = vpop.permute.xlu2 %1975 }
 0x3af   :  { %v1673_v36 = vor.u32 1.1754944e-38, %v1672_v57  ;;  %vm1671_vm15 = vcmp.eq.f32.partialorder %v1670_v26, 8.507059e+37  ;;  %v3328_v50 = vor.u32 %v3627_v62, %v3327_v19  ;;  %v3311_v57 = vld [vmem:[#allocation8 + $0x80] sm:$0xf]  ;;  %v3616_v62 = vld [vmem:[#allocation8 + $0x58] sm:$0xf0] }
 0x3b0   :  { %v1693_v45 = vor.u32 1.1754944e-38, %v1692_v30  ;;  %vm1691_vm3 = vcmp.eq.f32.partialorder %v1690_v42, 8.507059e+37  ;;  %v3619_v30 = vld [vmem:[#allocation8 + $0x70] sm:$0xf0] }
 0x3b1   :  { %2155 = vmatpush.bf16.msrb.mxu0 %v3328_v50 }
 0x3b3   :  { %v3711_v15 = vpop.eup %3710 }
 0x3b4   :  { %v3713_v52 = vpop.eup %3712  ;;  %v1662_v17 = vmul.f32 %v3711_v15, %v1660_v63  ;;  %vm1667_vm12 = vweird.f32 %v3711_v15  ;;  %v3626_v63 = vld [vmem:[#allocation8 + $0xac] sm:$0xf] }
 0x3b5   :  { %v1682_v21 = vmul.f32 %v3713_v52, %v1680_v2  ;;  %vm1668_vm14 = vmor %vm1666_vm13, %vm1667_vm12  ;;  %vm1687_vm0 = vweird.f32 %v3713_v52  ;;  %v3335_v2 = vld [vmem:[#allocation8 + $0xb0] sm:$0xf]  ;;  %v3332_v3 = vor.u32 %v3626_v63, %v3329_v37  ;;  %2156 = vmatpush.bf16.msrb.mxu0 %v3316_v31  ;;  %vm1977_vm13 = vcmp.eq.s32.totalorder %v1976_v13, 1  ;;  %v3638_v13 = vld [vmem:[#allocation8 + $0x4c] sm:$0xf] }
 0x3b6   :  { %v1663_v23 = vsub.f32 1.0, %v1662_v17  ;;  %vm1688_vm2 = vmor %vm1686_vm1, %vm1687_vm0  ;;  %v3336_v1 = vor.u32 %v3628_v5, %v3335_v2  ;;  %v3620_v17 = vld [vmem:[#allocation8 + $0x7c] sm:$0xf]  ;;  %v3267_v2 = vld [vmem:[#allocation8 + $0x30] sm:$0xf] }
 0x3b7   :  { %v1683_v7 = vsub.f32 1.0, %v1682_v21  ;;  %2168 = vmatpush.bf16.msrb.mxu1 %v3332_v3  ;;  %v3612_v5 = vld [vmem:[#allocation8 + $0x38] sm:$0xf0]  ;;  %v3611_v3 = vld [vmem:[#allocation8 + $0x34] sm:$0xf] }
 0x3b8   :  { %v1664_v34 = vmul.f32 %v3711_v15, %v1663_v23  ;;  %2181 = vmatpush.bf16.msrb.mxu2 %v3336_v1  ;;  %v3305_v23 = vld [vmem:[#allocation8 + $0x84] sm:$0xf0]  ;;  %v3268_v1 = vor.u32 %v3612_v5, %v3267_v2  ;;  %v3272_v31 = vor.u32 %v3611_v3, %v3269_v61 }
 0x3b9   :  { %v1684_v18 = vmul.f32 %v3713_v52, %v1683_v7  ;;  %v3622_v7 = vld [vmem:[#allocation8 + $0x88] sm:$0xf0]  ;;  %v3308_v22 = vor.u32 %v3620_v17, %v3305_v23  ;;  %v3257_v17 = vld [vmem:[#allocation8 + $0x24] sm:$0xf0] }
 0x3ba   :  { %v1665_v27 = vadd.f32 %v3711_v15, %v1664_v34  ;;  %v3312_v34 = vor.u32 %v3622_v7, %v3311_v57  ;;  %v3610_v7 = vld [vmem:[#allocation8 + $0x28] sm:$0xf0] }
 0x3bb   :  { %v1685_v43 = vadd.f32 %v3713_v52, %v1684_v18  ;;  %2169 = vmatpush.bf16.msrb.mxu1 %v3320_v6  ;;  %v3609_v6 = vld [vmem:[#allocation8 + $0x20] sm:$0xf0] }
 0x3bc   :  { %v1669_v38 = vsel %vm1668_vm14, %v3711_v15, %v1665_v27  ;;  %2182 = vmatpush.bf16.msrb.mxu2 %v3324_v12  ;;  %v3303_v15 = vld [vmem:[#allocation8 + $0x78] sm:$0xf]  ;;  %v3291_v27 = vld [vmem:[#allocation8 + $0x60] sm:$0xf]  ;;  %v3608_v12 = vld [vmem:[#allocation8 + $0x1c] sm:$0xf] }
 0x3bd   :  { %v1674_v58 = vsel %vm1671_vm15, %v1673_v36, %v1669_v38  ;;  %v1689_v32 = vsel %vm1688_vm2, %v3713_v52, %v1685_v43  ;;  %v3621_v52 = vld [vmem:[#allocation8 + $0x80] sm:$0xf0]  ;;  %v3618_v36 = vld [vmem:[#allocation8 + $0x68] sm:$0xf0]  ;;  %v3299_v43 = vld [vmem:[#allocation8 + $0x68] sm:$0xf]  ;;  %v3260_v57 = vor.u32 %v3608_v12, %v3257_v17 }
 0x3be   :  { %v1696_v41 = vmul.f32 %v1674_v58, %v1653_v0  ;;  %v1694_v46 = vsel %vm1691_vm3, %v1693_v45, %v1689_v32  ;;  %v3304_v21 = vor.u32 %v3621_v52, %v3303_v15  ;;  %v3617_v0 = vld [vmem:[#allocation8 + $0x64] sm:$0xf]  ;;  %v3292_v38 = vor.u32 %v3618_v36, %v3291_v27  ;;  %v3293_v58 = vld [vmem:[#allocation8 + $0x6c] sm:$0xf0]  ;;  %v3651_v12 = vld [vmem:[#allocation8 + $0xb0] sm:$0xf0] }
 0x3bf   :  { %v1699_v47 = vsub.f32 1.0, %v1694_v46  ;;  %v1701_v56 = vmul.f32 %v1694_v46, %v4148_v33  ;;  %2170 = vmatpush.bf16.msrb.mxu1 %v3308_v22  ;;  %v3300_v32 = vor.u32 %v3619_v30, %v3299_v43  ;;  %v3279_v46 = vld [vmem:[#allocation8 + $0x48] sm:$0xf]  ;;  %v3256_v52 = vor.u32 %v3609_v6, %v3255_v11  ;;  %v3245_v36 = vld [vmem:[#allocation8 + $0xc] sm:$0xf0] }
 0x3c0   :  { %v1697_v48 = vadd.f32 %v1696_v41, %v4041_v8  ;;  %2157 = vmatpush.bf16.msrb.mxu0 %v3304_v21  ;;  %2183 = vmatpush.bf16.msrb.mxu2 %v3312_v34  ;;  %v3263_v21 = vld [vmem:[#allocation8 + $0x20] sm:$0xf]  ;;  %v3607_v43 = vld [vmem:[#allocation8 + $0x10] sm:$0xf0]  ;;  %v3425_v6 = vld [vmem:[#allocation8 + $0xa8] sm:$0xf] }
 0x3c1   :  { %v3264_v22 = vor.u32 %v3610_v7, %v3263_v21  ;;  %v3243_v34 = vld [vmem:[#allocation8] sm:$0xf]  ;;  %v3433_v17 = vld [vmem:[#allocation8 + $0xb0] sm:$0xf]  ;;  %v3652_v21 = vld [vmem:[#allocation8 + $0xb8] sm:$0xf0] }
 0x3c2   :  { %3714 = vtanh.f32 %v1697_v48  ;;  %v3296_v48 = vor.u32 %v3617_v0, %v3293_v58  ;;  %v3251_v0 = vld [vmem:[#allocation8 + $0x8] sm:$0xf]  ;;  %v3413_v7 = vld [vmem:[#allocation8 + $0x90] sm:$0xf] }
 0x3c4   :  { %2158 = vmatpush.bf16.msrb.mxu0 %v3292_v38  ;;  %2171 = vmatpush.bf16.msrb.mxu1 %v3296_v48 }
 0x3c5   :  { %2184 = vmatpush.bf16.msrb.mxu2 %v3300_v32 }
 0x3c8   :  { %v3715_v24 = vpop.eup %3714 }
 0x3c9   :  { %v1700_v54 = vmul.f32 %v3715_v24, %v1699_v47  ;;  %v3615_v47 = vld [vmem:[#allocation8 + $0x50] sm:$0xf0] }
 0x3ca   :  { %v3280_v53 = vor.u32 %v3615_v47, %v3279_v46 }
 0x3cb   :  { %v1702_v51 = vadd.f32 %v1701_v56, %v1700_v54  ;;  %v3614_v54 = vld [vmem:[#allocation8 + $0x4c] sm:$0xf]  ;;  %v3281_v56 = vld [vmem:[#allocation8 + $0x54] sm:$0xf0] }
 0x3cc   :  { %v3284_v19 = vor.u32 %v3614_v54, %v3281_v56  ;;  %2159 = vmatpush.bf16.msrb.mxu0 %v3280_v53 }
 0x3cd   :  { %v1709_v55 = vsel %vm1708_vm4, %v1702_v51, 0.0  ;;  %v4169_v59 = vsel %vm1708_vm4, %v1702_v51, %v4148_v33  ;;  %v4176_v33 = vld [vmem:[%s4239_s5] sm:$0x7]  ;;  %v3287_v51 = vld [vmem:[#allocation8 + $0x50] sm:$0xf] }
 0x3ce   :  { %1711 = vst [vmem:[#allocation9 + $0x20] sm:$0xff] %v1709_v55  ;;  %v1717_v8 = vpack.c.bf16 %v4169_v59, %v4169_v59  ;;  %v1752_v14 = vperm.slane %v4176_v33, 0  ;;  %v1753_v42 = vperm.slane %v4176_v33, 1  ;;  %v308_v55 = vadd.f32 %v4063_v10, %v3996_v16  ;;  %2172 = vmatpush.bf16.msrb.mxu1 %v3284_v19 }
 0x3cf   :  { %v3288_v50 = vor.u32 %v3616_v62, %v3287_v51  ;;  %v1754_v46 = vperm.slane %v4176_v33, 2 }
 0x3d0   :  { %1894 = vmatmul.bf16.vlgmr.msra.gmra.mxu1 %v1717_v8  ;;  %1907 = vmatmul.bf16.vlgmr.msra.gmra.mxu2 %v1717_v8 }
 0x3d1   :  { %1920 = vmatmul.bf16.vlgmr.msrb.gmra.mxu3 %v1717_v8  ;;  %2185 = vmatpush.bf16.msrb.mxu2 %v3288_v50 }
 0x3d2   :  { %2160 = vmatpush.bf16.msrb.mxu0 %v3268_v1  ;;  %2173 = vmatpush.bf16.msrb.mxu1 %v3272_v31 }
 0x3d5   :  { %2186 = vmatpush.bf16.msrb.mxu2 %v3276_v29 }
 0x3d6   :  { %2161 = vmatpush.bf16.msrb.mxu0 %v3256_v52  ;;  %2174 = vmatpush.bf16.msrb.mxu1 %v3260_v57  ;;  %v3427_v52 = vld [vmem:[#allocation8 + $0xb4] sm:$0xf0]  ;;  %v3434_v57 = vor.u32 %v3652_v21, %v3433_v17  ;;  %v3635_v17 = vld [vmem:[#allocation8 + $0x34] sm:$0xf] }
 0x3d9   :  { %2187 = vmatpush.bf16.msrb.mxu2 %v3264_v22  ;;  %v3648_v22 = vld [vmem:[#allocation8 + $0x98] sm:$0xf0] }
 0x44d   :  { %v1895_v26 = vpop.f32.mrf.mxu1 }
 0x44e   :  { %v1896_v18 = vadd.f32 %v1895_v26, %v1752_v14  ;;  %v3606_v26 = vld [vmem:[#allocation8 + $0x8] sm:$0xf0] }
 0x44f   :  { %v3244_v27 = vor.u32 %v3606_v26, %v3243_v34  ;;  %v3647_v34 = vld [vmem:[#allocation8 + $0x94] sm:$0xf]  ;;  %v3414_v26 = vor.u32 %v3648_v22, %v3413_v7  ;;  %v3637_v7 = vld [vmem:[#allocation8 + $0x40] sm:$0xf0] }
 0x450   :  { %v1925_v41 = vadd.f32 %v1896_v18, %v4012_v60  ;;  %v3605_v18 = vld [vmem:[#allocation8 + $0x4] sm:$0xf] }
 0x451   :  { %v3248_v58 = vor.u32 %v3605_v18, %v3245_v36  ;;  %2162 = vmatpush.bf16.msrb.mxu0 %v3244_v27  ;;  %v3415_v18 = vld [vmem:[#allocation8 + $0x9c] sm:$0xf0]  ;;  %v3421_v27 = vld [vmem:[#allocation8 + $0x98] sm:$0xf]  ;;  %v3649_v36 = vld [vmem:[#allocation8 + $0xa0] sm:$0xf0] }
 0x452   :  { %v3239_v45 = vmul.f32 -1.442695, %v1925_v41  ;;  %v3252_v41 = vor.u32 %v3607_v43, %v3251_v0  ;;  %v3418_v0 = vor.u32 %v3647_v34, %v3415_v18  ;;  %v3353_v18 = vld [vmem:[#allocation8 + $0x18] sm:$0xf] }
 0x453   :  { %v1908_v24 = vpop.f32.mrf.mxu2  ;;  %2175 = vmatpush.bf16.msrb.mxu1 %v3248_v58 }
 0x454   :  { %3716 = vpow2.f32 %v3239_v45  ;;  %v1909_v60 = vadd.f32 %v1908_v24, %v1753_v42  ;;  %v4183_v8 = vpop.f32.mrf.mxu3  ;;  %2188 = vmatpush.bf16.msrb.mxu2 %v3252_v41  ;;  %v3645_v41 = vld [vmem:[#allocation8 + $0x80] sm:$0xf0] }
 0x455   :  { %v1897_v63 = vpop.f32.mrf.mxu1 }
 0x456   :  { %v1945_v37 = vadd.f32 %v1909_v60, %v308_v55  ;;  %v1922_v60 = vadd.f32 %v4183_v8, %v1754_v46  ;;  %v3646_v46 = vld [vmem:[#allocation8 + $0x88] sm:$0xf0] }
 0x457   :  { %2450 = vmatpush.bf16.msra.mxu1 %v3434_v57  ;;  %v3373_v57 = vld [vmem:[#allocation8 + $0x38] sm:$0xf] }
 0x458   :  { %v3240_v10 = vmul.f32 -1.442695, %v1945_v37  ;;  %v3374_v34 = vor.u32 %v3637_v7, %v3373_v57 }
 0x45a   :  { %v3717_v9 = vpop.eup %3716  ;;  %3718 = vpow2.f32 %v3240_v10 }
 0x45b   :  { %v1929_v14 = vadd.f32 1.0, %v3717_v9  ;;  %v1910_v15 = vpop.f32.mrf.mxu2 }
 0x45c   :  { %v1923_v23 = vpop.f32.mrf.mxu3  ;;  %v3426_v15 = vor.u32 %v3651_v12, %v3425_v6  ;;  %v3640_v6 = vld [vmem:[#allocation8 + $0x58] sm:$0xf0] }
 0x45d   :  { %3720 = vrcp.f32 %v1929_v14  ;;  %v1941_v45 = vand.u32 2147483648, %v1929_v14  ;;  %v1939_v24 = vand.u32 2147483647, %v1929_v14  ;;  %vm1935_vm6 = vweird.f32 %v1929_v14 }
 0x45e   :  { %2424 = vmatpush.bf16.msra.mxu3 %v3426_v15  ;;  %v3365_v15 = vld [vmem:[#allocation8 + $0x30] sm:$0xf] }
 0x45f   :  { %v1942_v51 = vor.u32 1.1754944e-38, %v1941_v45  ;;  %vm1940_vm8 = vcmp.eq.f32.partialorder %v1939_v24, 8.507059e+37  ;;  %v3409_v45 = vld [vmem:[#allocation8 + $0x80] sm:$0xf] }
 0x460   :  { %v3719_v38 = vpop.eup %3718  ;;  %v3410_v24 = vor.u32 %v3646_v46, %v3409_v45  ;;  %v3341_v45 = vld [vmem:[#allocation8] sm:$0xf] }
 0x461   :  { %v1949_v30 = vadd.f32 1.0, %v3719_v38  ;;  %v3422_v38 = vor.u32 %v3649_v36, %v3421_v27  ;;  %v3633_v27 = vld [vmem:[#allocation8 + $0x20] sm:$0xf0]  ;;  %v3632_v36 = vld [vmem:[#allocation8 + $0x1c] sm:$0xf] }
 0x462   :  { %2425 = vmatpush.bf16.msra.mxu3 %v3414_v26 }
 0x463   :  { %v3721_v42 = vpop.eup %3720  ;;  %3722 = vrcp.f32 %v1949_v30  ;;  %v1961_v50 = vand.u32 2147483648, %v1949_v30  ;;  %v1959_v33 = vand.u32 2147483647, %v1949_v30  ;;  %vm1955_vm10 = vweird.f32 %v1949_v30  ;;  %2451 = vmatpush.bf16.msra.mxu1 %v3422_v38 }
 0x464   :  { %v1931_v48 = vmul.f32 %v3721_v42, %v1929_v14  ;;  %vm1936_vm5 = vweird.f32 %v3721_v42  ;;  %v3650_v14 = vld [vmem:[#allocation8 + $0xac] sm:$0xf] }
 0x465   :  { %vm1937_vm7 = vmor %vm1935_vm6, %vm1936_vm5  ;;  %v1962_v3 = vor.u32 1.1754944e-38, %v1961_v50  ;;  %vm1960_vm12 = vcmp.eq.f32.partialorder %v1959_v33, 8.507059e+37  ;;  %v3430_v23 = vor.u32 %v3650_v14, %v3427_v52  ;;  %v3391_v50 = vld [vmem:[#allocation8 + $0x6c] sm:$0xf0]  ;;  %v3643_v33 = vld [vmem:[#allocation8 + $0x70] sm:$0xf0] }
 0x466   :  { %v1932_v32 = vsub.f32 1.0, %v1931_v48  ;;  %v3636_v52 = vld [vmem:[#allocation8 + $0x38] sm:$0xf0] }
 0x467   :  { %2437 = vmatpush.bf16.msra.mxu0 %v3430_v23  ;;  %2452 = vmatpush.bf16.msra.mxu1 %v3410_v24  ;;  %v3366_v21 = vor.u32 %v3636_v52, %v3365_v15  ;;  %v3367_v23 = vld [vmem:[#allocation8 + $0x3c] sm:$0xf0]  ;;  %v3629_v24 = vld [vmem:[#allocation8 + $0x4] sm:$0xf] }
 0x468   :  { %v1933_v47 = vmul.f32 %v3721_v42, %v1932_v32  ;;  %v3403_v32 = vld [vmem:[#allocation8 + $0x84] sm:$0xf0]  ;;  %v3370_v22 = vor.u32 %v3635_v17, %v3367_v23 }
 0x469   :  { %v3723_v53 = vpop.eup %3722 }
 0x46a   :  { %v1951_v54 = vmul.f32 %v3723_v53, %v1949_v30  ;;  %v1934_v56 = vadd.f32 %v3721_v42, %v1933_v47  ;;  %vm1956_vm9 = vweird.f32 %v3723_v53  ;;  %v3401_v30 = vld [vmem:[#allocation8 + $0x78] sm:$0xf] }
 0x46b   :  { %vm1957_vm11 = vmor %vm1955_vm10, %vm1956_vm9  ;;  %2438 = vmatpush.bf16.msra.mxu0 %v3418_v0  ;;  %v3402_v48 = vor.u32 %v3645_v41, %v3401_v30 }
 0x46c   :  { %v1952_v55 = vsub.f32 1.0, %v1951_v54  ;;  %v1938_v19 = vsel %vm1937_vm7, %v3721_v42, %v1934_v56  ;;  %v3644_v42 = vld [vmem:[#allocation8 + $0x7c] sm:$0xf]  ;;  %v311_v56 = vadd.f32 %v4065_v35, %v3996_v16  ;;  %v3377_v35 = vld [vmem:[#allocation8 + $0x48] sm:$0xf] }
 0x46d   :  { %v1943_v62 = vsel %vm1940_vm8, %v1942_v51, %v1938_v19  ;;  %v3406_v47 = vor.u32 %v3644_v42, %v3403_v32  ;;  %2426 = vmatpush.bf16.msra.mxu3 %v3402_v48  ;;  %v3642_v19 = vld [vmem:[#allocation8 + $0x68] sm:$0xf0]  ;;  %v3361_v48 = vld [vmem:[#allocation8 + $0x20] sm:$0xf] }
 0x46e   :  { %v1953_v63 = vmul.f32 %v3723_v53, %v1952_v55  ;;  %v1965_v37 = vmul.f32 %v1943_v62, %v1922_v60  ;;  %v3389_v60 = vld [vmem:[#allocation8 + $0x60] sm:$0xf]  ;;  %v3641_v62 = vld [vmem:[#allocation8 + $0x64] sm:$0xf]  ;;  %v3634_v32 = vld [vmem:[#allocation8 + $0x28] sm:$0xf0] }
 0x46f   :  { %2439 = vmatpush.bf16.msra.mxu0 %v3406_v47  ;;  %v3362_v46 = vor.u32 %v3634_v32, %v3361_v48  ;;  %v3630_v47 = vld [vmem:[#allocation8 + $0x8] sm:$0xf0] }
 0x470   :  { %v1954_v2 = vadd.f32 %v3723_v53, %v1953_v63  ;;  %v1966_v5 = vadd.f32 %v1965_v37, %v4045_v20  ;;  %v3390_v63 = vor.u32 %v3642_v19, %v3389_v60  ;;  %v3397_v37 = vld [vmem:[#allocation8 + $0x68] sm:$0xf] }
 0x472   :  { %v1958_v1 = vsel %vm1957_vm11, %v3723_v53, %v1954_v2  ;;  %3724 = vtanh.f32 %v1966_v5  ;;  %2427 = vmatpush.bf16.msra.mxu3 %v3390_v63 }
 0x473   :  { %v1963_v61 = vsel %vm1960_vm12, %v1962_v3, %v1958_v1  ;;  %v3394_v3 = vor.u32 %v3641_v62, %v3391_v50  ;;  %v3398_v1 = vor.u32 %v3643_v33, %v3397_v37 }
 0x474   :  { %v1968_v39 = vsub.f32 1.0, %v1963_v61  ;;  %v1970_v31 = vmul.f32 %v1963_v61, %v4169_v59 }
 0x475   :  { %2440 = vmatpush.bf16.msra.mxu0 %v3394_v3  ;;  %2453 = vmatpush.bf16.msra.mxu1 %v3398_v1 }
 0x478   :  { %v3725_v8 = vpop.eup %3724 }
 0x479   :  { %v1969_v10 = vmul.f32 %v3725_v8, %v1968_v39  ;;  %v3639_v8 = vld [vmem:[#allocation8 + $0x50] sm:$0xf0] }
 0x47b   :  { %v1971_v29 = vadd.f32 %v1970_v31, %v1969_v10  ;;  %v3379_v10 = vld [vmem:[#allocation8 + $0x54] sm:$0xf0] }
 0x47d   :  { %v1978_v9 = vsel %vm1977_vm13, %v1971_v29, 0.0  ;;  %v4190_v11 = vsel %vm1977_vm13, %v1971_v29, %v4169_v59  ;;  %v4197_v59 = vld [vmem:[%s4239_s5] sm:$0x7]  ;;  %v3378_v29 = vor.u32 %v3639_v8, %v3377_v35 }
 0x47e   :  { %1980 = vst [vmem:[#allocation9 + $0x28] sm:$0xff] %v1978_v9  ;;  %v1986_v20 = vpack.c.bf16 %v4190_v11, %v4190_v11  ;;  %v2021_v58 = vperm.slane %v4197_v59, 0  ;;  %v2022_v43 = vperm.slane %v4197_v59, 1  ;;  %v3382_v9 = vor.u32 %v3638_v13, %v3379_v10 }
 0x47f   :  { %2428 = vmatpush.bf16.msra.mxu3 %v3378_v29 }
 0x480   :  { %2163 = vmatmul.bf16.vlgmr.msrb.gmra.mxu0 %v1986_v20  ;;  %2176 = vmatmul.bf16.vlgmr.msrb.gmra.mxu1 %v1986_v20 }
 0x481   :  { %2189 = vmatmul.bf16.vlgmr.msrb.gmra.mxu2 %v1986_v20  ;;  %v3385_v20 = vld [vmem:[#allocation8 + $0x50] sm:$0xf]  ;;  %2441 = vmatpush.bf16.msra.mxu0 %v3382_v9 }
 0x482   :  { %v3386_v14 = vor.u32 %v3640_v6, %v3385_v20 }
 0x483   :  { %2429 = vmatpush.bf16.msra.mxu3 %v3366_v21 }
 0x484   :  { %2454 = vmatpush.bf16.msra.mxu1 %v3386_v14 }
 0x485   :  { %2442 = vmatpush.bf16.msra.mxu0 %v3370_v22  ;;  %v2288_v22 = vld [vmem:[%s4239_s5] sm:$0x7]  ;;  %s3883_s5 = smov [#allocation9]  }
 0x486   :  { %s2525_s21 = sshll.u32 %s3883_s5, 4  ;;  %s2526_s21 = int_to_ptr.vmem [resolvable:$true] %s2525_s21 }
 0x488   :  { %2455 = vmatpush.bf16.msra.mxu1 %v3374_v34  ;;  %v2291_v34 = vperm.slane %v2288_v22, 1 }
 0x48c   :  { %2456 = vmatpush.bf16.msra.mxu1 %v3362_v46 }
 0x4fd   :  { %v2164_v53 = vpop.f32.mrf.mxu0  ;;  %v2177_v54 = vpop.f32.mrf.mxu1 }
 0x4fe   :  { %v2165_v51 = vadd.f32 %v2164_v53, %v2021_v58  ;;  %v2178_v55 = vadd.f32 %v2177_v54, %v2022_v43  ;;  %v3354_v58 = vor.u32 %v3633_v27, %v3353_v18  ;;  %v3355_v43 = vld [vmem:[#allocation8 + $0x24] sm:$0xf0]  ;;  %v3342_v53 = vor.u32 %v3630_v47, %v3341_v45  ;;  %v3343_v54 = vld [vmem:[#allocation8 + $0xc] sm:$0xf0] }
 0x4ff   :  { %v3358_v42 = vor.u32 %v3632_v36, %v3355_v43  ;;  %v313_v18 = vadd.f32 %v4067_v49, %v3996_v16 }
 0x500   :  { %v2194_v2 = vadd.f32 %v2165_v51, %v4019_v25  ;;  %v2214_v5 = vadd.f32 %v2178_v55, %v311_v56  ;;  %2430 = vmatpush.bf16.msra.mxu3 %v3354_v58  ;;  %v3349_v56 = vld [vmem:[#allocation8 + $0x8] sm:$0xf]  ;;  %v3346_v51 = vor.u32 %v3629_v24, %v3343_v54  ;;  %v3631_v55 = vld [vmem:[#allocation8 + $0x10] sm:$0xf0] }
 0x501   :  { %2443 = vmatpush.bf16.msra.mxu0 %v3358_v42  ;;  %v3350_v60 = vor.u32 %v3631_v55, %v3349_v56 }
 0x502   :  { %v3337_v61 = vmul.f32 -1.442695, %v2194_v2  ;;  %v3338_v39 = vmul.f32 -1.442695, %v2214_v5  ;;  %v2023_v5 = vperm.slane %v4197_v59, 2 }
 0x503   :  { %2457 = vmatpush.bf16.msra.mxu1 %v3350_v60  ;;  %v2292_v60 = vperm.slane %v2288_v22, 2 }
 0x504   :  { %3726 = vpow2.f32 %v3337_v61  ;;  %v4204_v31 = vpop.f32.mrf.mxu2  ;;  %2431 = vmatpush.bf16.msra.mxu3 %v3342_v53 }
 0x505   :  { %3728 = vpow2.f32 %v3338_v39  ;;  %v2166_v25 = vpop.f32.mrf.mxu0  ;;  %v2179_v12 = vpop.f32.mrf.mxu1  ;;  %2444 = vmatpush.bf16.msra.mxu0 %v3346_v51  ;;  %v2191_v8 = vadd.f32 %v4204_v31, %v2023_v5 }
 0x506   :  { %v2245_v31 = vpop.permute.xlu0 %2244 }
 0x507   :  { %vm2246_vm6 = vcmp.eq.s32.totalorder %v2245_v31, 1 }
 0x50a   :  { %v3727_v26 = vpop.eup %3726 }
 0x50b   :  { %v3729_v0 = vpop.eup %3728  ;;  %v2198_v38 = vadd.f32 1.0, %v3727_v26 }
 0x50c   :  { %v2218_v30 = vadd.f32 1.0, %v3729_v0  ;;  %v2192_v41 = vpop.f32.mrf.mxu2  ;;  %v2290_v0 = vperm.slane %v2288_v22, 0 }
 0x50d   :  { %3730 = vrcp.f32 %v2198_v38  ;;  %v2210_v2 = vand.u32 2147483648, %v2198_v38  ;;  %v2208_v1 = vand.u32 2147483647, %v2198_v38  ;;  %vm2204_vm15 = vweird.f32 %v2198_v38 }
 0x50e   :  { %3732 = vrcp.f32 %v2218_v30  ;;  %v2230_v9 = vand.u32 2147483648, %v2218_v30  ;;  %vm2224_vm3 = vweird.f32 %v2218_v30  ;;  %v2228_v6 = vand.u32 2147483647, %v2218_v30 }
 0x50f   :  { %v2211_v35 = vor.u32 1.1754944e-38, %v2210_v2  ;;  %vm2209_vm1 = vcmp.eq.f32.partialorder %v2208_v1, 8.507059e+37 }
 0x510   :  { %v2231_v12 = vor.u32 1.1754944e-38, %v2230_v9  ;;  %vm2229_vm5 = vcmp.eq.f32.partialorder %v2228_v6, 8.507059e+37 }
 0x513   :  { %v3731_v19 = vpop.eup %3730 }
 0x514   :  { %v3733_v62 = vpop.eup %3732  ;;  %v2200_v63 = vmul.f32 %v3731_v19, %v2198_v38  ;;  %vm2205_vm14 = vweird.f32 %v3731_v19 }
 0x515   :  { %v2220_v50 = vmul.f32 %v3733_v62, %v2218_v30  ;;  %vm2206_vm0 = vmor %vm2204_vm15, %vm2205_vm14  ;;  %vm2225_vm2 = vweird.f32 %v3733_v62 }
 0x516   :  { %v2201_v37 = vsub.f32 1.0, %v2200_v63  ;;  %vm2226_vm4 = vmor %vm2224_vm3, %vm2225_vm2 }
 0x517   :  { %v2221_v33 = vsub.f32 1.0, %v2220_v50 }
 0x518   :  { %v2202_v3 = vmul.f32 %v3731_v19, %v2201_v37 }
 0x519   :  { %v2222_v61 = vmul.f32 %v3733_v62, %v2221_v33 }
 0x51a   :  { %v2203_v39 = vadd.f32 %v3731_v19, %v2202_v3  ;;  %v342_v3 = vadd.f32 %v4075_v4, %v4005_v40 }
 0x51b   :  { %v2223_v29 = vadd.f32 %v3733_v62, %v2222_v61 }
 0x51c   :  { %v2207_v13 = vsel %vm2206_vm0, %v3731_v19, %v2203_v39 }
 0x51d   :  { %v2212_v10 = vsel %vm2209_vm1, %v2211_v35, %v2207_v13  ;;  %v2227_v25 = vsel %vm2226_vm4, %v3733_v62, %v2223_v29 }
 0x51e   :  { %v2234_v20 = vmul.f32 %v2212_v10, %v2191_v8  ;;  %v2232_v14 = vsel %vm2229_vm5, %v2231_v12, %v2227_v25 }
 0x51f   :  { %v2237_v15 = vsub.f32 1.0, %v2232_v14  ;;  %v2239_v21 = vmul.f32 %v2232_v14, %v4190_v11 }
 0x520   :  { %v2235_v59 = vadd.f32 %v2234_v20, %v4053_v28  ;;  %v2514_v20 = vpop.permute.xlu1 %2513 }
 0x521   :  { %vm2515_vm15 = vcmp.eq.s32.totalorder %v2514_v20, 1 }
 0x522   :  { %3734 = vtanh.f32 %v2235_v59 }
 0x528   :  { %v3735_v52 = vpop.eup %3734 }
 0x529   :  { %v2238_v17 = vmul.f32 %v3735_v52, %v2237_v15 }
 0x52b   :  { %v2240_v23 = vadd.f32 %v2239_v21, %v2238_v17 }
 0x52d   :  { %v2247_v57 = vsel %vm2246_vm6, %v2240_v23, 0.0  ;;  %v4211_v7 = vsel %vm2246_vm6, %v2240_v23, %v4190_v11 }
 0x52e   :  { %2249 = vst [vmem:[#allocation9 + $0x30] sm:$0xff] %v2247_v57  ;;  %v2255_v28 = vpack.c.bf16 %v4211_v7, %v4211_v7 }
 0x530   :  { %2432 = vmatmul.bf16.vlgmr.msra.gmra.mxu3 %v2255_v28  ;;  %2445 = vmatmul.bf16.vlgmr.msra.gmra.mxu0 %v2255_v28 }
 0x531   :  { %2458 = vmatmul.bf16.vlgmr.msra.gmra.mxu1 %v2255_v28 }
 0x5ad   :  { %v2446_v26 = vpop.f32.mrf.mxu0 }
 0x5ae   :  { %v2447_v27 = vadd.f32 %v2446_v26, %v2291_v34  ;;  %v2459_v36 = vpop.f32.mrf.mxu1 }
 0x5af   :  { %v2460_v37 = vadd.f32 %v2459_v36, %v2292_v60 }
 0x5b0   :  { %v2483_v11 = vadd.f32 %v2447_v27, %v313_v18 }
 0x5b2   :  { %v3436_v38 = vmul.f32 -1.442695, %v2483_v11 }
 0x5b3   :  { %v2433_v58 = vpop.f32.mrf.mxu3 }
 0x5b4   :  { %3736 = vpow2.f32 %v3436_v38  ;;  %v2434_v43 = vadd.f32 %v2433_v58, %v2290_v0 }
 0x5b5   :  { %v2448_v30 = vpop.f32.mrf.mxu0 }
 0x5b6   :  { %v2463_v41 = vadd.f32 %v2434_v43, %v4026_v44  ;;  %v2461_v42 = vpop.f32.mrf.mxu1 }
 0x5b8   :  { %v3435_v48 = vmul.f32 -1.442695, %v2463_v41 }
 0x5ba   :  { %v3737_v32 = vpop.eup %3736  ;;  %3738 = vpow2.f32 %v3435_v48 }
 0x5bb   :  { %v2487_v45 = vadd.f32 1.0, %v3737_v32  ;;  %v2435_v46 = vpop.f32.mrf.mxu3 }
 0x5bd   :  { %3740 = vrcp.f32 %v2487_v45  ;;  %v2499_v1 = vand.u32 2147483648, %v2487_v45  ;;  %vm2493_vm12 = vweird.f32 %v2487_v45  ;;  %v2497_v39 = vand.u32 2147483647, %v2487_v45 }
 0x5bf   :  { %v2500_v13 = vor.u32 1.1754944e-38, %v2499_v1  ;;  %vm2498_vm14 = vcmp.eq.f32.partialorder %v2497_v39, 8.507059e+37 }
 0x5c0   :  { %v3739_v47 = vpop.eup %3738 }
 0x5c1   :  { %v2467_v16 = vadd.f32 1.0, %v3739_v47 }
 0x5c3   :  { %3742 = vrcp.f32 %v2467_v16  ;;  %v3741_v49 = vpop.eup %3740  ;;  %v2479_v55 = vand.u32 2147483648, %v2467_v16  ;;  %v2477_v44 = vand.u32 2147483647, %v2467_v16  ;;  %vm2473_vm8 = vweird.f32 %v2467_v16 }
 0x5c4   :  { %v2489_v24 = vmul.f32 %v3741_v49, %v2487_v45  ;;  %vm2494_vm11 = vweird.f32 %v3741_v49 }
 0x5c5   :  { %v2480_v50 = vor.u32 1.1754944e-38, %v2479_v55  ;;  %vm2478_vm10 = vcmp.eq.f32.partialorder %v2477_v44, 8.507059e+37  ;;  %vm2495_vm13 = vmor %vm2493_vm12, %vm2494_vm11 }
 0x5c6   :  { %v2490_v56 = vsub.f32 1.0, %v2489_v24 }
 0x5c8   :  { %v2491_v62 = vmul.f32 %v3741_v49, %v2490_v56 }
 0x5c9   :  { %v3743_v53 = vpop.eup %3742 }
 0x5ca   :  { %v2469_v54 = vmul.f32 %v3743_v53, %v2467_v16  ;;  %vm2474_vm7 = vweird.f32 %v3743_v53  ;;  %v2492_v2 = vadd.f32 %v3741_v49, %v2491_v62 }
 0x5cb   :  { %vm2475_vm9 = vmor %vm2473_vm8, %vm2474_vm7 }
 0x5cc   :  { %v2470_v51 = vsub.f32 1.0, %v2469_v54  ;;  %v2496_v8 = vsel %vm2495_vm13, %v3741_v49, %v2492_v2 }
 0x5cd   :  { %v2501_v10 = vsel %vm2498_vm14, %v2500_v13, %v2496_v8 }
 0x5ce   :  { %v2471_v19 = vmul.f32 %v3743_v53, %v2470_v51  ;;  %v2506_v29 = vsub.f32 1.0, %v2501_v10  ;;  %v2508_v6 = vmul.f32 %v2501_v10, %v4211_v7 }
 0x5d0   :  { %v2472_v63 = vadd.f32 %v3743_v53, %v2471_v19 }
 0x5d2   :  { %v2476_v33 = vsel %vm2475_vm9, %v3743_v53, %v2472_v63 }
 0x5d3   :  { %v2481_v5 = vsel %vm2478_vm10, %v2480_v50, %v2476_v33 }
 0x5d4   :  { %v2503_v61 = vmul.f32 %v2481_v5, %v2460_v37 }
 0x5d6   :  { %v2504_v35 = vadd.f32 %v2503_v61, %v342_v3 }
 0x5d8   :  { %3744 = vtanh.f32 %v2504_v35 }
 0x5de   :  { %v3745_v9 = vpop.eup %3744 }
 0x5df   :  { %v2507_v59 = vmul.f32 %v3745_v9, %v2506_v29 }
 0x5e1   :  { %v2509_v40 = vadd.f32 %v2508_v6, %v2507_v59 }
 0x5e3   :  { %v2516_v4 = vsel %vm2515_vm15, %v2509_v40, 0.0  ;;  %v2519_v25 = vsel %vm2515_vm15, %v2509_v40, %v4211_v7 }
 0x5e4   :  { %2518 = vst [vmem:[#allocation9 + $0x38] sm:$0xff] %v2516_v4 }
 0x5e5   :  { %2533 = dma.vmem_to_hbm [thread:$0]  %s2526_s21, 1024, %s2528_s22, [#allocation5], %s3879_s17, %s3879_s17, %s3880_s18   ;;  %2520 = vst [vmem:[#allocation10] sm:$0xff] %v2519_v25 }
 0x5e6   :  { %2544 = dma.vmem_to_hbm [thread:$0]  %s2540_s23, 128, %s2542_s26, [#allocation11]  }
 0x5e7   :  { %3871 = dma.done.wait [#allocation5], 1024  }
 0x5e8   :  { %3872 = vsyncadd [#allocation5], 4294966272 }
 0x5e9   :  { %3873 = dma.done.wait [#allocation11], 128  }
 0x5ea   :  { %3874 = vsyncadd [#allocation11], 4294967168 }
 0x5eb   :  { %2553 = vsyncpa [#allocation4], 1 }
 0x5ec   :  { %2554 = vsyncpa [#allocation7], 1 }
 0x5ed   :  { %2555 = vsyncpa [#allocation5], 1 }
 0x5ee   :  { %2556 = vsyncpa [#allocation11], 1 }

</bundles_post_ra>
